<compile_context>
chip_gen: v7x
topology: tpu7x:2x2x1
jax: 0.10.0
libtpu: 0.0.40
codegen_flags: <defaults>
</compile_context>

<pallas_src>
import jax
import jax.numpy as jnp
from jax import lax
from jax.experimental import pallas as pl
from jax.experimental.pallas import tpu as pltpu

BN_EPS = 1e-5


def _pick_hw_tile(hw: int, cap: int = 2048) -> int:
    """Pick a lane-friendly tile of the H*W axis (multiple of 128 if possible)."""
    if hw <= cap:
        return hw
    t = (cap // 128) * 128
    while t >= 128:
        if hw % t == 0:
            return t
        t -= 128
    return hw


def rep_vgg_block(x_nchw, w3_oihw, gamma3, beta3, w1_oihw, gamma1, beta1):
    """Forward of RepVggBlock: relu(hswish(bn(conv3x3(x))) + hswish(bn(conv1x1(x))))."""
    N, Cin, H, W = x_nchw.shape
    Cout = w3_oihw.shape[0]
    assert w3_oihw.shape == (Cout, Cin, 3, 3)
    assert w1_oihw.shape == (Cout, Cin, 1, 1)
    # TODO(synk): groups > 1 not implemented (module default is groups=1).

    KH = KW = 3
    PAD = 1
    Hp, Wp = H + 2 * PAD, W + 2 * PAD
    HW = H * W
    Cin_p = ((Cin + 7) // 8) * 8          # sublane-align the contraction dim
    Cp = ((Cout + 127) // 128) * 128      # lane-pad output channels (free on the MXU)

    # ---- layout glue (pure data movement; no 9x im2col blow-up) -------------
    x_nhwc = jnp.transpose(x_nchw, (0, 2, 3, 1))
    xpad = jnp.pad(
        x_nhwc, ((0, 0), (PAD, PAD), (PAD, PAD), (0, Cin_p - Cin))
    ).astype(jnp.bfloat16)                                          # (N, Hp, Wp, Cin_p)
    w3t = jnp.transpose(w3_oihw, (2, 3, 1, 0)).reshape(KH * KW, Cin, Cout)
    w3p = jnp.pad(w3t, ((0, 0), (0, Cin_p - Cin), (0, Cp - Cout))).astype(jnp.bfloat16)
    w1t = jnp.transpose(w1_oihw, (2, 3, 1, 0)).reshape(Cin, Cout)
    w1p = jnp.pad(w1t, ((0, Cin_p - Cin), (0, Cp - Cout))).astype(jnp.bfloat16)

    # ---- kernel 1: both conv branches + per-image BN partial sums -----------
    # TODO(synk): for very large feature maps add an H-strip grid axis with halo
    # handling (overlapping windows need pl.Element / manual DMA); a per-image
    # block comfortably fits VMEM at RepVGG feature-map sizes.
    def conv_branches_kernel(x_ref, w3_ref, w1_ref, y3_ref, y1_ref, st_ref):
        acc3 = jnp.zeros((HW, Cp), jnp.float32)
        acc1 = None
        for r in range(KH * KW):                    # unrolled 3x3 tap loop (no im2col)
            kh, kw = divmod(r, KW)
            xs = x_ref[0, kh:kh + H, kw:kw + W, :]  # shifted (H, W, Cin_p) bf16 view
            xs2 = xs.reshape(HW, Cin_p)
            acc3 = acc3 + jnp.dot(xs2, w3_ref[r], preferred_element_type=jnp.float32)
            if kh == PAD and kw == PAD:             # center tap == un-padded x (1x1 branch)
                acc1 = jnp.dot(xs2, w1_ref[...], preferred_element_type=jnp.float32)
        # phase-1 BN statistics: per-image per-channel sum / sum-of-squares
        st_ref[0] = jnp.concatenate(
            [jnp.sum(acc3, axis=0, keepdims=True),
             jnp.sum(acc3 * acc3, axis=0, keepdims=True),
             jnp.sum(acc1, axis=0, keepdims=True),
             jnp.sum(acc1 * acc1, axis=0, keepdims=True)],
            axis=0)                                                  # (4, Cp)
        # lane-dense (Cout, H*W) stores via a tile-aligned (HW, Cp)->(Cp, HW) transpose
        y3_ref[0] = jnp.transpose(acc3)[0:Cout, :]
        y1_ref[0] = jnp.transpose(acc1)[0:Cout, :]

    y3, y1, stats = pl.pallas_call(
        conv_branches_kernel,
        out_shape=(
            jax.ShapeDtypeStruct((N, Cout, HW), jnp.float32),
            jax.ShapeDtypeStruct((N, Cout, HW), jnp.float32),
            jax.ShapeDtypeStruct((N, 4, Cp), jnp.float32),
        ),
        grid=(N,),
        in_specs=[
            pl.BlockSpec((1, Hp, Wp, Cin_p), lambda n: (n, 0, 0, 0)),
            pl.BlockSpec((KH * KW, Cin_p, Cp), lambda n: (0, 0, 0)),   # resident weights
            pl.BlockSpec((Cin_p, Cp), lambda n: (0, 0)),               # resident weights
        ],
        out_specs=(
            pl.BlockSpec((1, Cout, HW), lambda n: (n, 0, 0)),
            pl.BlockSpec((1, Cout, HW), lambda n: (n, 0, 0)),
            pl.BlockSpec((1, 4, Cp), lambda n: (n, 0, 0)),
        ),
        compiler_params=pltpu.CompilerParams(
            dimension_semantics=("parallel",),
            vmem_limit_bytes=32 * 1024 * 1024,
        ),
    )(xpad, w3p, w1p)

    # ---- BN finalize (O(Cout) math, done once in plain JAX) -----------------
    P = N * HW
    tot = jnp.sum(stats, axis=0)[:, :Cout]          # (4, Cout): [s3, q3, s1, q1]
    mean3, ex2_3 = tot[0] / P, tot[1] / P
    mean1, ex2_1 = tot[2] / P, tot[3] / P
    var3 = jnp.maximum(ex2_3 - mean3 * mean3, 0.0)  # biased variance (train-mode BN)
    var1 = jnp.maximum(ex2_1 - mean1 * mean1, 0.0)
    scale3 = gamma3 * lax.rsqrt(var3 + BN_EPS)
    shift3 = beta3 - mean3 * scale3
    scale1 = gamma1 * lax.rsqrt(var1 + BN_EPS)
    shift1 = beta1 - mean1 * scale1
    params = jnp.stack([scale3, shift3, scale1, shift1], axis=1).astype(jnp.float32)  # (Cout, 4)

    # ---- kernel 2: fused BN-affine + hardswish (both branches) + add + ReLU --
    T = _pick_hw_tile(HW)

    def fuse_bn_act_kernel(y3_ref, y1_ref, p_ref, o_ref):
        s3, t3 = p_ref[:, 0:1], p_ref[:, 1:2]
        s1, t1 = p_ref[:, 2:3], p_ref[:, 3:4]
        a3 = y3_ref[0] * s3 + t3
        a1 = y1_ref[0] * s1 + t1
        h3 = a3 * jnp.clip(a3 + 3.0, 0.0, 6.0) * (1.0 / 6.0)   # Hardswish
        h1 = a1 * jnp.clip(a1 + 3.0, 0.0, 6.0) * (1.0 / 6.0)
        o_ref[0] = jnp.maximum(h3 + h1, 0.0)                   # branch sum + ReLU

    out = pl.pallas_call(
        fuse_bn_act_kernel,
        out_shape=jax.ShapeDtypeStruct((N, Cout, HW), jnp.float32),
        grid=(N, HW // T),
        in_specs=[
            pl.BlockSpec((1, Cout, T), lambda n, t: (n, 0, t)),
            pl.BlockSpec((1, Cout, T), lambda n, t: (n, 0, t)),
            pl.BlockSpec((Cout, 4), lambda n, t: (0, 0)),       # resident fused BN params
        ],
        out_specs=pl.BlockSpec((1, Cout, T), lambda n, t: (n, 0, t)),
        compiler_params=pltpu.CompilerParams(
            dimension_semantics=("parallel", "parallel"),
            vmem_limit_bytes=32 * 1024 * 1024,
        ),
    )(y3, y1, params)

    # (N, Cout, H*W) is already NCHW order -> no transpose, just reshape.
    return out.reshape(N, Cout, H, W)


# ------------------------- plain-JAX reference ------------------------------
def _conv_bn_hswish_ref(x, w, gamma, beta, padding):
    y = lax.conv_general_dilated(
        x.astype(jnp.float32), w.astype(jnp.float32),
        window_strides=(1, 1),
        padding=[(padding, padding), (padding, padding)],
        dimension_numbers=("NCHW", "OIHW", "NCHW"),
        precision=lax.Precision.HIGHEST,
    )
    mean = jnp.mean(y, axis=(0, 2, 3), keepdims=True)
    var = jnp.mean((y - mean) ** 2, axis=(0, 2, 3), keepdims=True)
    yn = (y - mean) / jnp.sqrt(var + BN_EPS)
    yn = yn * gamma.reshape(1, -1, 1, 1) + beta.reshape(1, -1, 1, 1)
    return yn * jnp.clip(yn + 3.0, 0.0, 6.0) / 6.0


def reference(x, w3, g3, b3, w1, g1, b1):
    y = _conv_bn_hswish_ref(x, w3, g3, b3, 1) + _conv_bn_hswish_ref(x, w1, g1, b1, 0)
    return jnp.maximum(y, 0.0)


if __name__ == "__main__":
    key = jax.random.PRNGKey(0)
    kx, kw3, kg3, kb3, kw1, kg1, kb1 = jax.random.split(key, 7)

    # Small shapes consistent with RepVggBlock(in_channels=4, out_channels=8)
    N, Cin, H, W = 2, 4, 16, 16
    Cout = 8

    x = jax.random.normal(kx, (N, Cin, H, W), jnp.float32)
    w3 = jax.random.normal(kw3, (Cout, Cin, 3, 3), jnp.float32) * 0.1   # conv1 weight (no bias)
    g3 = 1.0 + 0.1 * jax.random.normal(kg3, (Cout,), jnp.float32)       # bn1 weight
    b3 = 0.1 * jax.random.normal(kb3, (Cout,), jnp.float32)             # bn1 bias
    w1 = jax.random.normal(kw1, (Cout, Cin, 1, 1), jnp.float32) * 0.1   # conv2 weight (no bias)
    g1 = 1.0 + 0.1 * jax.random.normal(kg1, (Cout,), jnp.float32)       # bn2 weight
    b1 = 0.1 * jax.random.normal(kb1, (Cout,), jnp.float32)             # bn2 bias

    fwd = jax.jit(rep_vgg_block)
    out = jax.block_until_ready(fwd(x, w3, g3, b3, w1, g1, b1))

    ref = reference(x, w3, g3, b3, w1, g1, b1)
    assert out.shape == ref.shape == (N, Cout, H, W), (out.shape, ref.shape)
    # bf16 MXU matmuls vs. an f32 HIGHEST reference -> tolerance ~3e-2
    if not jnp.allclose(out, ref, atol=3e-2, rtol=3e-2):
        raise AssertionError(f"mismatch, max abs err {jnp.max(jnp.abs(out - ref))}")
    print("KERNEL_OK")
</pallas_src>

<mosaic_0001>
module attributes {stable_mosaic.version = 11 : i64} {
  func.func @conv_branches_kernel(%arg0: i32, %arg1: memref<1x18x18x8xbf16, #tpu.memory_space<vmem>>, %arg2: memref<9x8x128xbf16, #tpu.memory_space<vmem>>, %arg3: memref<8x128xbf16, #tpu.memory_space<vmem>>, %arg4: memref<1x8x256xf32, #tpu.memory_space<vmem>>, %arg5: memref<1x8x256xf32, #tpu.memory_space<vmem>>, %arg6: memref<1x4x128xf32, #tpu.memory_space<vmem>>) attributes {dimension_semantics = [#tpu.dimension_semantics<parallel>], iteration_bounds = array<i64: 2>, scalar_prefetch = 0 : i64, scratch_operands = 0 : i64, tpu.core_type = #tpu.core_type<tc>, window_params = [{transform_indices = @transform_0, window_bounds = array<i64: 1, 18, 18, 8>}, {pipeline_mode = #tpu.pipeline_mode<synchronous>, transform_indices = @transform_1, window_bounds = array<i64: 9, 8, 128>}, {pipeline_mode = #tpu.pipeline_mode<synchronous>, transform_indices = @transform_2, window_bounds = array<i64: 8, 128>}, {transform_indices = @transform_3, window_bounds = array<i64: 1, 8, 256>}, {transform_indices = @transform_4, window_bounds = array<i64: 1, 8, 256>}, {transform_indices = @transform_5, window_bounds = array<i64: 1, 4, 128>}]} {
    %cst = arith.constant 0.000000e+00 : f32
    %0 = vector.broadcast %cst : f32 to vector<256x128xf32>
    %c0 = arith.constant 0 : index
    %c0_0 = arith.constant 0 : index
    %c0_1 = arith.constant 0 : index
    %c0_2 = arith.constant 0 : index
    %1 = vector.load %arg1[%c0, %c0_0, %c0_1, %c0_2] : memref<1x18x18x8xbf16, #tpu.memory_space<vmem>>, vector<1x16x16x8xbf16>
    %2 = vector.shape_cast %1 : vector<1x16x16x8xbf16> to vector<16x16x8xbf16>
    %3 = vector.shape_cast %2 : vector<16x16x8xbf16> to vector<256x8xbf16>
    %c0_3 = arith.constant 0 : index
    %c0_4 = arith.constant 0 : index
    %c0_5 = arith.constant 0 : index
    %4 = vector.load %arg2[%c0_3, %c0_4, %c0_5] : memref<9x8x128xbf16, #tpu.memory_space<vmem>>, vector<1x8x128xbf16>
    %5 = vector.shape_cast %4 : vector<1x8x128xbf16> to vector<8x128xbf16>
    %cst_6 = arith.constant dense<0.000000e+00> : vector<256x128xf32>
    %6 = tpu.matmul %3, %5, %cst_6 {dimension_numbers = #tpu.dot_dimension_numbers<[1], [0], [0], [1], [0, 0, 1, 1], [], []>} : vector<256x8xbf16>, vector<8x128xbf16>, vector<256x128xf32> -> vector<256x128xf32>
    %7 = arith.addf %0, %6 : vector<256x128xf32>
    %c0_7 = arith.constant 0 : index
    %c0_8 = arith.constant 0 : index
    %c1 = arith.constant 1 : index
    %c0_9 = arith.constant 0 : index
    %8 = vector.load %arg1[%c0_7, %c0_8, %c1, %c0_9] : memref<1x18x18x8xbf16, #tpu.memory_space<vmem>>, vector<1x16x16x8xbf16>
    %9 = vector.shape_cast %8 : vector<1x16x16x8xbf16> to vector<16x16x8xbf16>
    %10 = vector.shape_cast %9 : vector<16x16x8xbf16> to vector<256x8xbf16>
    %c1_10 = arith.constant 1 : index
    %c0_11 = arith.constant 0 : index
    %c0_12 = arith.constant 0 : index
    %11 = vector.load %arg2[%c1_10, %c0_11, %c0_12] : memref<9x8x128xbf16, #tpu.memory_space<vmem>>, vector<1x8x128xbf16>
    %12 = vector.shape_cast %11 : vector<1x8x128xbf16> to vector<8x128xbf16>
    %cst_13 = arith.constant dense<0.000000e+00> : vector<256x128xf32>
    %13 = tpu.matmul %10, %12, %cst_13 {dimension_numbers = #tpu.dot_dimension_numbers<[1], [0], [0], [1], [0, 0, 1, 1], [], []>} : vector<256x8xbf16>, vector<8x128xbf16>, vector<256x128xf32> -> vector<256x128xf32>
    %14 = arith.addf %7, %13 : vector<256x128xf32>
    %c0_14 = arith.constant 0 : index
    %c0_15 = arith.constant 0 : index
    %c2 = arith.constant 2 : index
    %c0_16 = arith.constant 0 : index
    %15 = vector.load %arg1[%c0_14, %c0_15, %c2, %c0_16] : memref<1x18x18x8xbf16, #tpu.memory_space<vmem>>, vector<1x16x16x8xbf16>
    %16 = vector.shape_cast %15 : vector<1x16x16x8xbf16> to vector<16x16x8xbf16>
    %17 = vector.shape_cast %16 : vector<16x16x8xbf16> to vector<256x8xbf16>
    %c2_17 = arith.constant 2 : index
    %c0_18 = arith.constant 0 : index
    %c0_19 = arith.constant 0 : index
    %18 = vector.load %arg2[%c2_17, %c0_18, %c0_19] : memref<9x8x128xbf16, #tpu.memory_space<vmem>>, vector<1x8x128xbf16>
    %19 = vector.shape_cast %18 : vector<1x8x128xbf16> to vector<8x128xbf16>
    %cst_20 = arith.constant dense<0.000000e+00> : vector<256x128xf32>
    %20 = tpu.matmul %17, %19, %cst_20 {dimension_numbers = #tpu.dot_dimension_numbers<[1], [0], [0], [1], [0, 0, 1, 1], [], []>} : vector<256x8xbf16>, vector<8x128xbf16>, vector<256x128xf32> -> vector<256x128xf32>
    %21 = arith.addf %14, %20 : vector<256x128xf32>
    %c0_21 = arith.constant 0 : index
    %c1_22 = arith.constant 1 : index
    %c0_23 = arith.constant 0 : index
    %c0_24 = arith.constant 0 : index
    %22 = vector.load %arg1[%c0_21, %c1_22, %c0_23, %c0_24] : memref<1x18x18x8xbf16, #tpu.memory_space<vmem>>, vector<1x16x16x8xbf16>
    %23 = vector.shape_cast %22 : vector<1x16x16x8xbf16> to vector<16x16x8xbf16>
    %24 = vector.shape_cast %23 : vector<16x16x8xbf16> to vector<256x8xbf16>
    %c3 = arith.constant 3 : index
    %c0_25 = arith.constant 0 : index
    %c0_26 = arith.constant 0 : index
    %25 = vector.load %arg2[%c3, %c0_25, %c0_26] : memref<9x8x128xbf16, #tpu.memory_space<vmem>>, vector<1x8x128xbf16>
    %26 = vector.shape_cast %25 : vector<1x8x128xbf16> to vector<8x128xbf16>
    %cst_27 = arith.constant dense<0.000000e+00> : vector<256x128xf32>
    %27 = tpu.matmul %24, %26, %cst_27 {dimension_numbers = #tpu.dot_dimension_numbers<[1], [0], [0], [1], [0, 0, 1, 1], [], []>} : vector<256x8xbf16>, vector<8x128xbf16>, vector<256x128xf32> -> vector<256x128xf32>
    %28 = arith.addf %21, %27 : vector<256x128xf32>
    %c0_28 = arith.constant 0 : index
    %c1_29 = arith.constant 1 : index
    %c1_30 = arith.constant 1 : index
    %c0_31 = arith.constant 0 : index
    %29 = vector.load %arg1[%c0_28, %c1_29, %c1_30, %c0_31] : memref<1x18x18x8xbf16, #tpu.memory_space<vmem>>, vector<1x16x16x8xbf16>
    %30 = vector.shape_cast %29 : vector<1x16x16x8xbf16> to vector<16x16x8xbf16>
    %31 = vector.shape_cast %30 : vector<16x16x8xbf16> to vector<256x8xbf16>
    %c4 = arith.constant 4 : index
    %c0_32 = arith.constant 0 : index
    %c0_33 = arith.constant 0 : index
    %32 = vector.load %arg2[%c4, %c0_32, %c0_33] : memref<9x8x128xbf16, #tpu.memory_space<vmem>>, vector<1x8x128xbf16>
    %33 = vector.shape_cast %32 : vector<1x8x128xbf16> to vector<8x128xbf16>
    %cst_34 = arith.constant dense<0.000000e+00> : vector<256x128xf32>
    %34 = tpu.matmul %31, %33, %cst_34 {dimension_numbers = #tpu.dot_dimension_numbers<[1], [0], [0], [1], [0, 0, 1, 1], [], []>} : vector<256x8xbf16>, vector<8x128xbf16>, vector<256x128xf32> -> vector<256x128xf32>
    %35 = arith.addf %28, %34 : vector<256x128xf32>
    %c0_35 = arith.constant 0 : index
    %c0_36 = arith.constant 0 : index
    %36 = vector.load %arg3[%c0_35, %c0_36] : memref<8x128xbf16, #tpu.memory_space<vmem>>, vector<8x128xbf16>
    %cst_37 = arith.constant dense<0.000000e+00> : vector<256x128xf32>
    %37 = tpu.matmul %31, %36, %cst_37 {dimension_numbers = #tpu.dot_dimension_numbers<[1], [0], [0], [1], [0, 0, 1, 1], [], []>} : vector<256x8xbf16>, vector<8x128xbf16>, vector<256x128xf32> -> vector<256x128xf32>
    %c0_38 = arith.constant 0 : index
    %c1_39 = arith.constant 1 : index
    %c2_40 = arith.constant 2 : index
    %c0_41 = arith.constant 0 : index
    %38 = vector.load %arg1[%c0_38, %c1_39, %c2_40, %c0_41] : memref<1x18x18x8xbf16, #tpu.memory_space<vmem>>, vector<1x16x16x8xbf16>
    %39 = vector.shape_cast %38 : vector<1x16x16x8xbf16> to vector<16x16x8xbf16>
    %40 = vector.shape_cast %39 : vector<16x16x8xbf16> to vector<256x8xbf16>
    %c5 = arith.constant 5 : index
    %c0_42 = arith.constant 0 : index
    %c0_43 = arith.constant 0 : index
    %41 = vector.load %arg2[%c5, %c0_42, %c0_43] : memref<9x8x128xbf16, #tpu.memory_space<vmem>>, vector<1x8x128xbf16>
    %42 = vector.shape_cast %41 : vector<1x8x128xbf16> to vector<8x128xbf16>
    %cst_44 = arith.constant dense<0.000000e+00> : vector<256x128xf32>
    %43 = tpu.matmul %40, %42, %cst_44 {dimension_numbers = #tpu.dot_dimension_numbers<[1], [0], [0], [1], [0, 0, 1, 1], [], []>} : vector<256x8xbf16>, vector<8x128xbf16>, vector<256x128xf32> -> vector<256x128xf32>
    %44 = arith.addf %35, %43 : vector<256x128xf32>
    %c0_45 = arith.constant 0 : index
    %c2_46 = arith.constant 2 : index
    %c0_47 = arith.constant 0 : index
    %c0_48 = arith.constant 0 : index
    %45 = vector.load %arg1[%c0_45, %c2_46, %c0_47, %c0_48] : memref<1x18x18x8xbf16, #tpu.memory_space<vmem>>, vector<1x16x16x8xbf16>
    %46 = vector.shape_cast %45 : vector<1x16x16x8xbf16> to vector<16x16x8xbf16>
    %47 = vector.shape_cast %46 : vector<16x16x8xbf16> to vector<256x8xbf16>
    %c6 = arith.constant 6 : index
    %c0_49 = arith.constant 0 : index
    %c0_50 = arith.constant 0 : index
    %48 = vector.load %arg2[%c6, %c0_49, %c0_50] : memref<9x8x128xbf16, #tpu.memory_space<vmem>>, vector<1x8x128xbf16>
    %49 = vector.shape_cast %48 : vector<1x8x128xbf16> to vector<8x128xbf16>
    %cst_51 = arith.constant dense<0.000000e+00> : vector<256x128xf32>
    %50 = tpu.matmul %47, %49, %cst_51 {dimension_numbers = #tpu.dot_dimension_numbers<[1], [0], [0], [1], [0, 0, 1, 1], [], []>} : vector<256x8xbf16>, vector<8x128xbf16>, vector<256x128xf32> -> vector<256x128xf32>
    %51 = arith.addf %44, %50 : vector<256x128xf32>
    %c0_52 = arith.constant 0 : index
    %c2_53 = arith.constant 2 : index
    %c1_54 = arith.constant 1 : index
    %c0_55 = arith.constant 0 : index
    %52 = vector.load %arg1[%c0_52, %c2_53, %c1_54, %c0_55] : memref<1x18x18x8xbf16, #tpu.memory_space<vmem>>, vector<1x16x16x8xbf16>
    %53 = vector.shape_cast %52 : vector<1x16x16x8xbf16> to vector<16x16x8xbf16>
    %54 = vector.shape_cast %53 : vector<16x16x8xbf16> to vector<256x8xbf16>
    %c7 = arith.constant 7 : index
    %c0_56 = arith.constant 0 : index
    %c0_57 = arith.constant 0 : index
    %55 = vector.load %arg2[%c7, %c0_56, %c0_57] : memref<9x8x128xbf16, #tpu.memory_space<vmem>>, vector<1x8x128xbf16>
    %56 = vector.shape_cast %55 : vector<1x8x128xbf16> to vector<8x128xbf16>
    %cst_58 = arith.constant dense<0.000000e+00> : vector<256x128xf32>
    %57 = tpu.matmul %54, %56, %cst_58 {dimension_numbers = #tpu.dot_dimension_numbers<[1], [0], [0], [1], [0, 0, 1, 1], [], []>} : vector<256x8xbf16>, vector<8x128xbf16>, vector<256x128xf32> -> vector<256x128xf32>
    %58 = arith.addf %51, %57 : vector<256x128xf32>
    %c0_59 = arith.constant 0 : index
    %c2_60 = arith.constant 2 : index
    %c2_61 = arith.constant 2 : index
    %c0_62 = arith.constant 0 : index
    %59 = vector.load %arg1[%c0_59, %c2_60, %c2_61, %c0_62] : memref<1x18x18x8xbf16, #tpu.memory_space<vmem>>, vector<1x16x16x8xbf16>
    %60 = vector.shape_cast %59 : vector<1x16x16x8xbf16> to vector<16x16x8xbf16>
    %61 = vector.shape_cast %60 : vector<16x16x8xbf16> to vector<256x8xbf16>
    %c8 = arith.constant 8 : index
    %c0_63 = arith.constant 0 : index
    %c0_64 = arith.constant 0 : index
    %62 = vector.load %arg2[%c8, %c0_63, %c0_64] : memref<9x8x128xbf16, #tpu.memory_space<vmem>>, vector<1x8x128xbf16>
    %63 = vector.shape_cast %62 : vector<1x8x128xbf16> to vector<8x128xbf16>
    %cst_65 = arith.constant dense<0.000000e+00> : vector<256x128xf32>
    %64 = tpu.matmul %61, %63, %cst_65 {dimension_numbers = #tpu.dot_dimension_numbers<[1], [0], [0], [1], [0, 0, 1, 1], [], []>} : vector<256x8xbf16>, vector<8x128xbf16>, vector<256x128xf32> -> vector<256x128xf32>
    %65 = arith.addf %58, %64 : vector<256x128xf32>
    %cst_66 = arith.constant dense<0.000000e+00> : vector<128xf32>
    %66 = vector.multi_reduction <add>, %65, %cst_66 [0] : vector<256x128xf32> to vector<128xf32>
    %67 = vector.shape_cast %66 : vector<128xf32> to vector<1x128xf32>
    %68 = arith.mulf %65, %65 : vector<256x128xf32>
    %cst_67 = arith.constant dense<0.000000e+00> : vector<128xf32>
    %69 = vector.multi_reduction <add>, %68, %cst_67 [0] : vector<256x128xf32> to vector<128xf32>
    %70 = vector.shape_cast %69 : vector<128xf32> to vector<1x128xf32>
    %cst_68 = arith.constant dense<0.000000e+00> : vector<128xf32>
    %71 = vector.multi_reduction <add>, %37, %cst_68 [0] : vector<256x128xf32> to vector<128xf32>
    %72 = vector.shape_cast %71 : vector<128xf32> to vector<1x128xf32>
    %73 = arith.mulf %37, %37 : vector<256x128xf32>
    %cst_69 = arith.constant dense<0.000000e+00> : vector<128xf32>
    %74 = vector.multi_reduction <add>, %73, %cst_69 [0] : vector<256x128xf32> to vector<128xf32>
    %75 = vector.shape_cast %74 : vector<128xf32> to vector<1x128xf32>
    %76 = tpu.concatenate %67, %70, %72, %75 in 0 : vector<1x128xf32>, vector<1x128xf32>, vector<1x128xf32>, vector<1x128xf32> -> vector<4x128xf32>
    %c0_70 = arith.constant 0 : index
    %c0_71 = arith.constant 0 : index
    %c0_72 = arith.constant 0 : index
    %77 = vector.load %arg6[%c0_70, %c0_71, %c0_72] : memref<1x4x128xf32, #tpu.memory_space<vmem>>, vector<1x4x128xf32>
    %78 = vector.shape_cast %77 : vector<1x4x128xf32> to vector<4x128xf32>
    %79 = vector.shape_cast %76 : vector<4x128xf32> to vector<1x4x128xf32>
    tpu.vector_store %arg6[%c0_70, %c0_71, %c0_72], %79 {strides = array<i32>} : memref<1x4x128xf32, #tpu.memory_space<vmem>>, vector<1x4x128xf32>,
    %80 = tpu.transpose %65, [1, 0] : vector<256x128xf32> -> vector<128x256xf32>
    %81 = vector.extract_strided_slice %80 {offsets = [0, 0], sizes = [8, 256], strides = [1, 1]} : vector<128x256xf32> to vector<8x256xf32>
    %c0_73 = arith.constant 0 : index
    %c0_74 = arith.constant 0 : index
    %c0_75 = arith.constant 0 : index
    %82 = vector.load %arg4[%c0_73, %c0_74, %c0_75] : memref<1x8x256xf32, #tpu.memory_space<vmem>>, vector<1x8x256xf32>
    %83 = vector.shape_cast %82 : vector<1x8x256xf32> to vector<8x256xf32>
    %84 = vector.shape_cast %81 : vector<8x256xf32> to vector<1x8x256xf32>
    tpu.vector_store %arg4[%c0_73, %c0_74, %c0_75], %84 {strides = array<i32>} : memref<1x8x256xf32, #tpu.memory_space<vmem>>, vector<1x8x256xf32>,
    %85 = tpu.transpose %37, [1, 0] : vector<256x128xf32> -> vector<128x256xf32>
    %86 = vector.extract_strided_slice %85 {offsets = [0, 0], sizes = [8, 256], strides = [1, 1]} : vector<128x256xf32> to vector<8x256xf32>
    %c0_76 = arith.constant 0 : index
    %c0_77 = arith.constant 0 : index
    %c0_78 = arith.constant 0 : index
    %87 = vector.load %arg5[%c0_76, %c0_77, %c0_78] : memref<1x8x256xf32, #tpu.memory_space<vmem>>, vector<1x8x256xf32>
    %88 = vector.shape_cast %87 : vector<1x8x256xf32> to vector<8x256xf32>
    %89 = vector.shape_cast %86 : vector<8x256xf32> to vector<1x8x256xf32>
    tpu.vector_store %arg5[%c0_76, %c0_77, %c0_78], %89 {strides = array<i32>} : memref<1x8x256xf32, #tpu.memory_space<vmem>>, vector<1x8x256xf32>,
    return
  }
  func.func @transform_0(%arg0: i32) -> (i32, i32, i32, i32) {
    %c0_i32 = arith.constant 0 : i32
    %c0_i32_0 = arith.constant 0 : i32
    %c0_i32_1 = arith.constant 0 : i32
    %c0_i32_2 = arith.constant 0 : i32
    return %arg0, %c0_i32, %c0_i32_0, %c0_i32_1 : i32, i32, i32, i32
  }
  func.func @transform_1(%arg0: i32) -> (i32, i32, i32) {
    %c0_i32 = arith.constant 0 : i32
    %c0_i32_0 = arith.constant 0 : i32
    %c0_i32_1 = arith.constant 0 : i32
    %c0_i32_2 = arith.constant 0 : i32
    return %c0_i32, %c0_i32_0, %c0_i32_1 : i32, i32, i32
  }
  func.func @transform_2(%arg0: i32) -> (i32, i32) {
    %c0_i32 = arith.constant 0 : i32
    %c0_i32_0 = arith.constant 0 : i32
    %c0_i32_1 = arith.constant 0 : i32
    return %c0_i32, %c0_i32_0 : i32, i32
  }
  func.func @transform_3(%arg0: i32) -> (i32, i32, i32) {
    %c0_i32 = arith.constant 0 : i32
    %c0_i32_0 = arith.constant 0 : i32
    %c0_i32_1 = arith.constant 0 : i32
    return %arg0, %c0_i32, %c0_i32_0 : i32, i32, i32
  }
  func.func @transform_4(%arg0: i32) -> (i32, i32, i32) {
    %c0_i32 = arith.constant 0 : i32
    %c0_i32_0 = arith.constant 0 : i32
    %c0_i32_1 = arith.constant 0 : i32
    return %arg0, %c0_i32, %c0_i32_0 : i32, i32, i32
  }
  func.func @transform_5(%arg0: i32) -> (i32, i32, i32) {
    %c0_i32 = arith.constant 0 : i32
    %c0_i32_0 = arith.constant 0 : i32
    %c0_i32_1 = arith.constant 0 : i32
    return %arg0, %c0_i32, %c0_i32_0 : i32, i32, i32
  }
}

module attributes {stable_mosaic.version = 11 : i64} {
  func.func @fuse_bn_act_kernel(%arg0: i32, %arg1: i32, %arg2: memref<1x8x256xf32, #tpu.memory_space<vmem>>, %arg3: memref<1x8x256xf32, #tpu.memory_space<vmem>>, %arg4: memref<8x4xf32, #tpu.memory_space<vmem>>, %arg5: memref<1x8x256xf32, #tpu.memory_space<vmem>>) attributes {dimension_semantics = [#tpu.dimension_semantics<parallel>, #tpu.dimension_semantics<parallel>], iteration_bounds = array<i64: 2, 1>, scalar_prefetch = 0 : i64, scratch_operands = 0 : i64, tpu.core_type = #tpu.core_type<tc>, window_params = [{transform_indices = @transform_0, window_bounds = array<i64: 1, 8, 256>}, {transform_indices = @transform_1, window_bounds = array<i64: 1, 8, 256>}, {pipeline_mode = #tpu.pipeline_mode<synchronous>, transform_indices = @transform_2, window_bounds = array<i64: 8, 4>}, {transform_indices = @transform_3, window_bounds = array<i64: 1, 8, 256>}]} {
    %c0 = arith.constant 0 : index
    %c0_0 = arith.constant 0 : index
    %0 = vector.load %arg4[%c0, %c0_0] : memref<8x4xf32, #tpu.memory_space<vmem>>, vector<8x1xf32>
    %c0_1 = arith.constant 0 : index
    %c1 = arith.constant 1 : index
    %1 = vector.load %arg4[%c0_1, %c1] : memref<8x4xf32, #tpu.memory_space<vmem>>, vector<8x1xf32>
    %c0_2 = arith.constant 0 : index
    %c2 = arith.constant 2 : index
    %2 = vector.load %arg4[%c0_2, %c2] : memref<8x4xf32, #tpu.memory_space<vmem>>, vector<8x1xf32>
    %c0_3 = arith.constant 0 : index
    %c3 = arith.constant 3 : index
    %3 = vector.load %arg4[%c0_3, %c3] : memref<8x4xf32, #tpu.memory_space<vmem>>, vector<8x1xf32>
    %c0_4 = arith.constant 0 : index
    %c0_5 = arith.constant 0 : index
    %c0_6 = arith.constant 0 : index
    %4 = vector.load %arg2[%c0_4, %c0_5, %c0_6] : memref<1x8x256xf32, #tpu.memory_space<vmem>>, vector<1x8x256xf32>
    %5 = vector.shape_cast %4 : vector<1x8x256xf32> to vector<8x256xf32>
    %6 = vector.broadcast %0 : vector<8x1xf32> to vector<8x256xf32>
    %7 = arith.mulf %5, %6 : vector<8x256xf32>
    %8 = vector.broadcast %1 : vector<8x1xf32> to vector<8x256xf32>
    %9 = arith.addf %7, %8 : vector<8x256xf32>
    %c0_7 = arith.constant 0 : index
    %c0_8 = arith.constant 0 : index
    %c0_9 = arith.constant 0 : index
    %10 = vector.load %arg3[%c0_7, %c0_8, %c0_9] : memref<1x8x256xf32, #tpu.memory_space<vmem>>, vector<1x8x256xf32>
    %11 = vector.shape_cast %10 : vector<1x8x256xf32> to vector<8x256xf32>
    %12 = vector.broadcast %2 : vector<8x1xf32> to vector<8x256xf32>
    %13 = arith.mulf %11, %12 : vector<8x256xf32>
    %14 = vector.broadcast %3 : vector<8x1xf32> to vector<8x256xf32>
    %15 = arith.addf %13, %14 : vector<8x256xf32>
    %cst = arith.constant 3.000000e+00 : f32
    %16 = vector.broadcast %cst : f32 to vector<8x256xf32>
    %17 = arith.addf %9, %16 : vector<8x256xf32>
    %cst_10 = arith.constant 0.000000e+00 : f32
    %cst_11 = arith.constant 6.000000e+00 : f32
    %18 = vector.broadcast %cst_10 : f32 to vector<8x256xf32>
    %19 = arith.maximumf %18, %17 : vector<8x256xf32>
    %20 = vector.broadcast %cst_11 : f32 to vector<8x256xf32>
    %21 = arith.minimumf %20, %19 : vector<8x256xf32>
    %22 = arith.mulf %9, %21 : vector<8x256xf32>
    %cst_12 = arith.constant 0.166666672 : f32
    %23 = vector.broadcast %cst_12 : f32 to vector<8x256xf32>
    %24 = arith.mulf %22, %23 : vector<8x256xf32>
    %cst_13 = arith.constant 3.000000e+00 : f32
    %25 = vector.broadcast %cst_13 : f32 to vector<8x256xf32>
    %26 = arith.addf %15, %25 : vector<8x256xf32>
    %cst_14 = arith.constant 0.000000e+00 : f32
    %cst_15 = arith.constant 6.000000e+00 : f32
    %27 = vector.broadcast %cst_14 : f32 to vector<8x256xf32>
    %28 = arith.maximumf %27, %26 : vector<8x256xf32>
    %29 = vector.broadcast %cst_15 : f32 to vector<8x256xf32>
    %30 = arith.minimumf %29, %28 : vector<8x256xf32>
    %31 = arith.mulf %15, %30 : vector<8x256xf32>
    %cst_16 = arith.constant 0.166666672 : f32
    %32 = vector.broadcast %cst_16 : f32 to vector<8x256xf32>
    %33 = arith.mulf %31, %32 : vector<8x256xf32>
    %34 = arith.addf %24, %33 : vector<8x256xf32>
    %cst_17 = arith.constant 0.000000e+00 : f32
    %35 = vector.broadcast %cst_17 : f32 to vector<8x256xf32>
    %36 = arith.maximumf %34, %35 : vector<8x256xf32>
    %c0_18 = arith.constant 0 : index
    %c0_19 = arith.constant 0 : index
    %c0_20 = arith.constant 0 : index
    %37 = vector.load %arg5[%c0_18, %c0_19, %c0_20] : memref<1x8x256xf32, #tpu.memory_space<vmem>>, vector<1x8x256xf32>
    %38 = vector.shape_cast %37 : vector<1x8x256xf32> to vector<8x256xf32>
    %39 = vector.shape_cast %36 : vector<8x256xf32> to vector<1x8x256xf32>
    tpu.vector_store %arg5[%c0_18, %c0_19, %c0_20], %39 {strides = array<i32>} : memref<1x8x256xf32, #tpu.memory_space<vmem>>, vector<1x8x256xf32>,
    return
  }
  func.func @transform_0(%arg0: i32, %arg1: i32) -> (i32, i32, i32) {
    %c0_i32 = arith.constant 0 : i32
    %c0_i32_0 = arith.constant 0 : i32
    return %arg0, %c0_i32, %arg1 : i32, i32, i32
  }
  func.func @transform_1(%arg0: i32, %arg1: i32) -> (i32, i32, i32) {
    %c0_i32 = arith.constant 0 : i32
    %c0_i32_0 = arith.constant 0 : i32
    return %arg0, %c0_i32, %arg1 : i32, i32, i32
  }
  func.func @transform_2(%arg0: i32, %arg1: i32) -> (i32, i32) {
    %c0_i32 = arith.constant 0 : i32
    %c0_i32_0 = arith.constant 0 : i32
    %c0_i32_1 = arith.constant 0 : i32
    return %c0_i32, %c0_i32_0 : i32, i32
  }
  func.func @transform_3(%arg0: i32, %arg1: i32) -> (i32, i32, i32) {
    %c0_i32 = arith.constant 0 : i32
    %c0_i32_0 = arith.constant 0 : i32
    return %arg0, %c0_i32, %arg1 : i32, i32, i32
  }
}

</mosaic_0001>

<bundles_post_ra>
// kernel: rep_vgg_block.3
= control target key start
LH: loop header
LB: loop body
LE: loop exit
PB: predicated region body
PF: predicated region fallthrough
CT: control target
= control target key end

     0   :  { %s504_s12 = smov 0   ;;  %s506_s13 = smov 0   ;;  %s548_s0 = inlined_call_operand.vmem [shape: f32[2,8,256], index: 0, kind: input, shape index: {}]   ;;  %s549_s1 = inlined_call_operand.vmem [shape: f32[2,8,256], index: 1, kind: input, shape index: {}]   ;;  %s550_s2 = inlined_call_operand.vmem [shape: f32[8,4], index: 2, kind: input, shape index: {}]   ;;  %s551_s3 = inlined_call_operand.vmem [shape: f32[2,8,256], index: 3, kind: output, shape index: {}]  }
   0x1   :  { %s508_s14 = smov 0  }
   0x2 LB: > { %s25_s15 = sadd.s32 1, %s474_s13  ;;  %p411_p0 = scmp.ge.s32.totalorder %s478_s14, 1  ;;  %s478_s14 = sphi %s508_s14, %s13_s14   ;;  %s474_s13 = sphi %s506_s13, %s553_s13   ;;  %s470_s12 = sphi %s504_s12, %s552_s12  }
   0x3   : > { %p27_p1 = scmp.ge.s32.totalorder %s25_s15, 2  ;;  %p175_p2 = scmp.lt.s32.totalorder %s478_s14, 3 }
   0x5   : > { %s555_s15 = smov (%p27_p1, %s25_s15), 0  ;;  %p176_p3 = pnand %p411_p0, %p175_p2 }
   0x6   : > { %v246_v0 = vld [vmem:[%s550_s2] sm:$0xff] (!%p176_p3)  ;;  %v480_v1 = vmov (!%p176_p3), 0   ;;  %v481_v2 = vmov (!%p176_p3), 1   ;;  %v482_v3 = vmov (!%p176_p3), 2   ;;  %v483_v4 = vmov (!%p176_p3), 3   ;;  %p217_p4 = scmp.lt.s32.totalorder (!%p176_p3), %s470_s12, 1 }
   0x7   : > { %179 = sbr.rel (%p176_p3) target bundleno = 160 (0xa0), region = 32  ;;  %451 = vset.pattern.permute.xlu0 (!%p176_p3), %v480_v1  ;;  %453 = vset.pattern.permute.xlu1 (!%p176_p3), %v481_v2 }
   0x8   : > { %251 = vperm.xlu0 (!%p176_p3), %451, %v246_v0   ;;  %257 = vperm.xlu1 (!%p176_p3), %453, %v246_v0  }
   0xc   : > { %452 = vset.pattern.permute.xlu0 (!%p176_p3), %v482_v3  ;;  %454 = vset.pattern.permute.xlu1 (!%p176_p3), %v483_v4 }
   0xd   : > { %265 = vperm.xlu0 (!%p176_p3), %452, %v246_v0   ;;  %271 = vperm.xlu1 (!%p176_p3), %454, %v246_v0  }
   0xe   : > { %s557_s12 = smov (!%p217_p4, %s470_s12), 1 }
   0xf   : > { %s525_s18 = sshll.u32 %s557_s12, 4 }
  0x10   : > { %s224_s21 = scalar_lea.vmem %s548_s0, %s525_s18  ;;  %s234_s24 = scalar_lea.vmem %s549_s1, %s525_s18 }
  0x11   : > { %455 = vset.pattern.permute.xlu0 %v483_v4  ;;  %v247_v5 = vld [vmem:[%s224_s21] sm:$0xff]  ;;  %v248_v6 = vld [vmem:[%s224_s21 + $0x8] sm:$0xff]  ;;  %s244_s27 = scalar_lea.vmem %s551_s3, %s525_s18 }
  0x12   : > { %v262_v13 = vld [vmem:[%s234_s24] sm:$0xff]  ;;  %v263_v14 = vld [vmem:[%s234_s24 + $0x8] sm:$0xff] }
  0x87   : > { %v252_v7 = vpop.permute.xlu0 %251  ;;  %v258_v8 = vpop.permute.xlu1 %257 }
  0x88   : > { %v254_v9 = vmul.f32 %v252_v7, %v247_v5  ;;  %v255_v10 = vmul.f32 %v252_v7, %v248_v6 }
  0x8a   : > { %v260_v11 = vadd.f32 %v258_v8, %v254_v9  ;;  %v261_v12 = vadd.f32 %v258_v8, %v255_v10 }
  0x8c   : > { %v276_v15 = vadd.f32 3.0, %v260_v11  ;;  %v277_v16 = vadd.f32 3.0, %v261_v12  ;;  %v266_v17 = vpop.permute.xlu0 %265  ;;  %v272_v18 = vpop.permute.xlu1 %271 }
  0x8d   : > { %v268_v19 = vmul.f32 %v266_v17, %v262_v13  ;;  %v269_v20 = vmul.f32 %v266_v17, %v263_v14 }
  0x8e   : > { %v278_v21 = vmax.f32 %v276_v15, 0.0  ;;  %v279_v22 = vmax.f32 %v277_v16, 0.0 }
  0x8f   : > { %v274_v23 = vadd.f32 %v272_v18, %v268_v19  ;;  %v275_v24 = vadd.f32 %v272_v18, %v269_v20 }
  0x90   : > { %v280_v25 = vmin.f32 %v278_v21, 6.0  ;;  %v281_v26 = vmin.f32 %v279_v22, 6.0 }
  0x91   : > { %v286_v27 = vadd.f32 3.0, %v274_v23  ;;  %v287_v28 = vadd.f32 3.0, %v275_v24 }
  0x92   : > { %v282_v31 = vmul.f32 %v280_v25, %v260_v11  ;;  %v283_v32 = vmul.f32 %v281_v26, %v261_v12 }
  0x93   : > { %v288_v29 = vmax.f32 %v286_v27, 0.0  ;;  %v289_v30 = vmax.f32 %v287_v28, 0.0 }
  0x94   : > { %v284_v37 = vmul.f32 0.16666667, %v282_v31  ;;  %v285_v38 = vmul.f32 0.16666667, %v283_v32 }
  0x95   : > { %v290_v33 = vmin.f32 %v288_v29, 6.0  ;;  %v291_v34 = vmin.f32 %v289_v30, 6.0 }
  0x97   : > { %v292_v35 = vmul.f32 %v290_v33, %v274_v23  ;;  %v293_v36 = vmul.f32 %v291_v34, %v275_v24 }
  0x99   : > { %v294_v39 = vmul.f32 0.16666667, %v292_v35  ;;  %v295_v40 = vmul.f32 0.16666667, %v293_v36 }
  0x9b   : > { %v296_v41 = vadd.f32 %v294_v39, %v284_v37  ;;  %v297_v42 = vadd.f32 %v295_v40, %v285_v38 }
  0x9d   : > { %v298_v43 = vmax.f32 %v296_v41, 0.0  ;;  %v299_v44 = vmax.f32 %v297_v42, 0.0 }
  0x9f   : > { %300 = vst [vmem:[%s244_s27] sm:$0xff] %v298_v43  ;;  %301 = vst [vmem:[%s244_s27 + $0x8] sm:$0xff] %v299_v44 }
  0xa0 PF: > { %s13_s14 = sadd.s32 1, %s478_s14   ;;  %s552_s12 = smov %s474_s13 }
  0xa1   : > { %p10_p5 = scmp.ge.s32.totalorder %s13_s14, 4   ;;  %s553_s13 = smov %s555_s15 }
  0xa3   :  { %12 = sbr.rel (!%p10_p5) target bundleno = 2 (0x2), region = 65 }

// kernel: rep_vgg_block.2
= control target key start
LH: loop header
LB: loop body
LE: loop exit
PB: predicated region body
PF: predicated region fallthrough
CT: control target
= control target key end

     0   :  { %s6934_s18 = smov 0   ;;  %s9190_s0 = inlined_call_operand.vmem [shape: bf16[2,18,18,8], index: 0, kind: input, shape index: {}]   ;;  %s9191_s1 = inlined_call_operand.vmem [shape: bf16[9,8,128], index: 1, kind: input, shape index: {}]   ;;  %s9192_s2 = inlined_call_operand.vmem [shape: bf16[8,128], index: 2, kind: input, shape index: {}]   ;;  %s9193_s3 = inlined_call_operand.vmem [shape: f32[2,8,256], index: 3, kind: output, shape index: {0}]   ;;  %s9194_s4 = inlined_call_operand.vmem [shape: f32[2,8,256], index: 4, kind: output, shape index: {1}]   ;;  %s9195_s5 = inlined_call_operand.vmem [shape: f32[2,4,128], index: 5, kind: output, shape index: {2}]  }
   0x1 LB: > { %s5443_s19 = sadd.s32 4294967295, %s6902_s18   ;;  %p5447_p0 = scmp.ge.s32.totalorder %s6902_s18, 1  ;;  %s6902_s18 = sphi %s6934_s18, %s16_s18  }
   0x2   : > { %p192_p1 = scmp.lt.s32.totalorder %s6902_s18, 3 }
   0x4   : > { %p193_p2 = pnand %p5447_p0, %p192_p1 }
   0x6   : > { %196 = sbr.rel (%p193_p2) target bundleno = 804 (0x324), region = 32 }
   0xd   : > { %vm784_vm0 = vcmask 1043456   ;;  %v5681_v0 = vld [vmem:[%s9191_s1 + $0x10] sm:$0xf]  ;;  %v5454_v1 = vld [vmem:[%s9191_s1 + $0x4] sm:$0xf]  ;;  %p229_p3 = scmp.lt.s32.totalorder %s5443_s19, 1 }
   0xe   : > { %6780 = vmatprep.subr.msk.bf16.mxu0 %vm784_vm0, %v5681_v0  ;;  %6776 = vmatprep.subr.msk.bf16.mxu1 %vm784_vm0, %v5454_v1  ;;  %v2588_v2 = vsel %vm784_vm0, %v5681_v0, 0  ;;  %v786_v3 = vsel %vm784_vm0, %v5454_v1, 0  ;;  %v6957_v4 = vld [vmem:[%s9191_s1 + $0x14] sm:$0xf]  ;;  %vm298_vm1 = vsmask.f32 3328 }
   0xf   : > { %6317 = vmatpush3.bf16.msra.mxu0 %v2588_v2  ;;  %6181 = vmatpush3.bf16.msra.mxu1 %v786_v3  ;;  %s9345_s19 = smov (!%p229_p3, %s5443_s19), 1  ;;  %vm299_vm2 = vsmask.f32 7440  ;;  %v9233_v29 = vmov 0  ;;  %vm735_vm4 = vcmask 64512   ;;  %v7006_v60 = vsel %vm784_vm0, %v6957_v4, 0 }
  0x10   : > { %6782 = vmatprep.subr.msk.bf16.mxu0 %vm784_vm0, %v6957_v4  ;;  %s6786_s26 = smul.u32 216, %s9345_s19  ;;  %vm6983_vm3 = vmor %vm298_vm1, %vm299_vm2  ;;  %vm1289_vm5 = vcmask 1042432   ;;  %vm1290_vm6 = vcmask 1046532   ;;  %s5453_s21 = sshll.u32 %s9345_s19, 2  ;;  %vm5185_vm8 = vcmask 1040384   ;;  %vm5187_vm9 = vcmask 1041408  }
  0x11   : > { %v9234_v29 = vsel %vm6983_vm3, 4294967295, %v9233_v29  ;;  %vm7441_vm7 = vmor %vm1289_vm5, %vm1290_vm6  ;;  %s247_s24 = scalar_lea.vmem %s9195_s5, %s5453_s21  ;;  %s6008_s25 = sshll.u32 %s9345_s19, 4 }
  0x12   : > { %s6965_s29 = scalar_lea.vmem %s9190_s0, %s6786_s26  ;;  %9235 = vst [vmem:[#allocation2_spill] sm:$0xff] %v9234_v29  ;;  %s238_s28 = scalar_lea.vmem %s9193_s3, %s6008_s25 }
  0x13   : > { %v249_v5 = vld [vmem:[%s6965_s29] sm:$0xf]  ;;  %v250_v6 = vld [vmem:[%s6965_s29 + $0x4] sm:$0xf]  ;;  %v282_v7 = vld [vmem:[%s6965_s29 + $0x8] sm:$0x1]  ;;  %s243_s30 = scalar_lea.vmem %s9194_s4, %s6008_s25 }
  0x14   : > { %v302_v8 = vshrl.u32 %v249_v5, 16  ;;  %v305_v9 = vshll.u32 %v249_v5, 16  ;;  %v311_v10 = vshll.u32 %v250_v6, 16  ;;  %v315_v11 = vshrl.u32 %v250_v6, 16  ;;  %v5633_v12 = vld [vmem:[%s6965_s29 + $0xc] sm:$0xf] }
  0x15   : > { %v321_v13 = vshll.u32 %v282_v7, 16  ;;  %v6972_v14 = vld [vmem:[%s6965_s29 + $0x10] sm:$0xf]  ;;  %v6975_v15 = vld [vmem:[%s6965_s29 + $0x14] sm:$0x1]  ;;  %v2106_v21 = vshrl.u32 %v5633_v12, 16 }
  0x16   : > { %v304_v16 = vrot.slane %v302_v8, 4  ;;  %v307_v17 = vrot.slane %v305_v9, 5  ;;  %v313_v18 = vrot.slane %v311_v10, 5  ;;  %v317_v19 = vrot.slane %v315_v11, 4  ;;  %v251_v28 = vld [vmem:[%s6965_s29 + $0xc] sm:$0xf] }
  0x17   : > { %v323_v20 = vrot.slane %v321_v13, 5  ;;  %v2109_v22 = vshll.u32 %v5633_v12, 16  ;;  %v2115_v23 = vshll.u32 %v6972_v14, 16  ;;  %v2119_v26 = vshrl.u32 %v6972_v14, 16  ;;  %v252_v33 = vld [vmem:[%s6965_s29 + $0x10] sm:$0xf] }
  0x18   : > { %v308_v24 = vor.u32 %v307_v17, %v304_v16  ;;  %v318_v25 = vor.u32 %v317_v19, %v313_v18  ;;  %v2125_v27 = vshll.u32 %v6975_v15, 16  ;;  %v2108_v30 = vrot.slane %v2106_v21, 4  ;;  %v283_v39 = vld [vmem:[%s6965_s29 + $0x14] sm:$0x1]  ;;  %v5636_v50 = vld [vmem:[%s6965_s29 + $0x18] sm:$0xf] }
  0x19   : > { %v2111_v31 = vrot.slane %v2109_v22, 5  ;;  %v2117_v32 = vrot.slane %v2115_v23, 5  ;;  %v2121_v36 = vrot.slane %v2119_v26, 4  ;;  %v326_v40 = vshrl.u32 %v251_v28, 16  ;;  %v6995_v55 = vld [vmem:[%s6965_s29 + $0x1c] sm:$0xf] }
  0x1a   : > { %v309_v34 = vrot.slane %v308_v24, 4  ;;  %v319_v35 = vrot.slane %v318_v25, 4  ;;  %v2127_v38 = vrot.slane %v2125_v27, 5  ;;  %v329_v41 = vshll.u32 %v251_v28, 16  ;;  %v7002_v59 = vld [vmem:[%s6965_s29 + $0x20] sm:$0x1] }
  0x1b   : > { %v2112_v37 = vor.u32 %v2111_v31, %v2108_v30  ;;  %v2122_v44 = vor.u32 %v2121_v36, %v2117_v32  ;;  %v335_v45 = vshll.u32 %v252_v33, 16  ;;  %v328_v48 = vrot.slane %v326_v40, 4  ;;  %v253_v9 = vld [vmem:[%s6965_s29 + $0x18] sm:$0xf]  ;;  %v254_v16 = vld [vmem:[%s6965_s29 + $0x1c] sm:$0xf] }
  0x1c   : > { %v314_v42 = vsel %vm6983_vm3, %v309_v34, %v313_v18  ;;  %v324_v43 = vsel %vm6983_vm3, %v319_v35, %v323_v20  ;;  %v331_v49 = vrot.slane %v329_v41, 5  ;;  %v339_v53 = vshrl.u32 %v252_v33, 16  ;;  %v284_v23 = vld [vmem:[%s6965_s29 + $0x20] sm:$0x1]  ;;  %v5639_v31 = vld [vmem:[%s6965_s29 + $0x24] sm:$0xf] }
  0x1d   : > { %v5455_v46 = vcombine.low %v314_v42, %v324_v43  ;;  %v2113_v47 = vrot.slane %v2112_v37, 4  ;;  %v2123_v51 = vrot.slane %v2122_v44, 4  ;;  %v337_v52 = vrot.slane %v335_v45, 5  ;;  %v5640_v36 = vld [vmem:[%s6965_s29 + $0x28] sm:$0xf] }
  0x1e   : > { %v345_v54 = vshll.u32 %v283_v39, 16  ;;  %v332_v58 = vor.u32 %v331_v49, %v328_v48  ;;  %v341_v62 = vrot.slane %v339_v53, 4  ;;  %v2130_v0 = vshrl.u32 %v5636_v50, 16  ;;  %v5641_v43 = vld [vmem:[%s6965_s29 + $0x2c] sm:$0x1] }
  0x1f   : > { %6182 = vmatprep.mubr.msk.bf16.mxu1 %vm735_vm4, %v5455_v46  ;;  %v2118_v56 = vsel %vm6983_vm3, %v2113_v47, %v2117_v32  ;;  %v2128_v61 = vsel %vm6983_vm3, %v2123_v51, %v2127_v38  ;;  %v2133_v3 = vshll.u32 %v5636_v50, 16  ;;  %v2139_v5 = vshll.u32 %v6995_v55, 16  ;;  %v255_v50 = vld [vmem:[%s6965_s29 + $0x24] sm:$0xf]  ;;  %v7329_v20 = vld [vmem:[%s6965_s29 + $0xb0] sm:$0x1] }
  0x20   : > { %v347_v63 = vrot.slane %v345_v54, 5  ;;  %v7010_v1 = vcombine.low %v2118_v56, %v2128_v61  ;;  %v333_v2 = vrot.slane %v332_v58, 4  ;;  %v342_v6 = vor.u32 %v341_v62, %v337_v52  ;;  %v256_v56 = vld [vmem:[%s6965_s29 + $0x28] sm:$0xf] }
  0x21   : > { %v2132_v7 = vrot.slane %v2130_v0, 4  ;;  %v2143_v8 = vshrl.u32 %v6995_v55, 16  ;;  %v2149_v4 = vshll.u32 %v7002_v59, 16  ;;  %v2135_v12 = vrot.slane %v2133_v3, 5  ;;  %v285_v3 = vld [vmem:[%s6965_s29 + $0x2c] sm:$0x1] }
  0x22   : > { %9236 = vst [vmem:[#allocation3_spill] sm:$0xff] %v7010_v1  ;;  %6318 = vmatprep.mubr.msk.bf16.mxu0 %vm735_vm4, %v7010_v1  ;;  %v338_v11 = vsel %vm6983_vm3, %v333_v2, %v337_v52  ;;  %v2141_v13 = vrot.slane %v2139_v5, 5  ;;  %v343_v17 = vrot.slane %v342_v6, 4  ;;  %v350_v24 = vshrl.u32 %v253_v9, 16  ;;  %v6860_v1 = vld [vmem:[%s6965_s29 + $0x30] sm:$0xf] }
  0x23   : > { %v2145_v18 = vrot.slane %v2143_v8, 4  ;;  %v2151_v19 = vrot.slane %v2149_v4, 5  ;;  %v2136_v21 = vor.u32 %v2135_v12, %v2132_v7  ;;  %v353_v25 = vshll.u32 %v253_v9, 16 }
  0x24   : > { %v348_v26 = vsel %vm6983_vm3, %v343_v17, %v347_v63  ;;  %v359_v28 = vshll.u32 %v254_v16, 16  ;;  %v363_v30 = vshrl.u32 %v254_v16, 16  ;;  %v352_v34 = vrot.slane %v350_v24, 4 }
  0x25   : > { %v2146_v27 = vor.u32 %v2145_v18, %v2141_v13  ;;  %v5456_v32 = vcombine.low %v338_v11, %v348_v26  ;;  %v2137_v33 = vrot.slane %v2136_v21, 4  ;;  %v355_v35 = vrot.slane %v353_v25, 5  ;;  %v5642_v11 = vld [vmem:[%s6965_s29 + $0x30] sm:$0xf]  ;;  %v5643_v18 = vld [vmem:[%s6965_s29 + $0x34] sm:$0xf] }
  0x26   : > { %v361_v38 = vrot.slane %v359_v28, 5  ;;  %v365_v39 = vrot.slane %v363_v30, 4  ;;  %v369_v40 = vshll.u32 %v284_v23, 16  ;;  %v2154_v44 = vshrl.u32 %v5639_v31, 16  ;;  %v5644_v26 = vld [vmem:[%s6965_s29 + $0x38] sm:$0x1] }
  0x27   : > { %v2147_v37 = vrot.slane %v2146_v27, 4  ;;  %6183 = vmatmul.mubr.msk.bf16.vlgmr.msra.gmra.mrb[0].mxu1 %vm735_vm4, %v5456_v32  ;;  %v2142_v41 = vsel %vm6983_vm3, %v2137_v33, %v2141_v13  ;;  %v356_v42 = vor.u32 %v355_v35, %v352_v34  ;;  %v2157_v45 = vshll.u32 %v5639_v31, 16 }
  0x28   : > { %v366_v47 = vor.u32 %v365_v39, %v361_v38  ;;  %v371_v48 = vrot.slane %v369_v40, 5  ;;  %v2163_v49 = vshll.u32 %v5640_v36, 16  ;;  %v2156_v53 = vrot.slane %v2154_v44, 4 }
  0x29   : > { %v2152_v46 = vsel %vm6983_vm3, %v2147_v37, %v2151_v19  ;;  %v357_v52 = vrot.slane %v356_v42, 4  ;;  %v2159_v54 = vrot.slane %v2157_v45, 5  ;;  %v2167_v62 = vshrl.u32 %v5640_v36, 16 }
  0x2a   : > { %v7036_v51 = vcombine.low %v2142_v41, %v2152_v46  ;;  %v367_v58 = vrot.slane %v366_v47, 4  ;;  %v2165_v61 = vrot.slane %v2163_v49, 5  ;;  %v2173_v63 = vshll.u32 %v5641_v43, 16  ;;  %v258_v43 = vld [vmem:[%s6965_s29 + $0x34] sm:$0xf] }
  0x2b   : > { %v362_v0 = vsel %vm6983_vm3, %v357_v52, %v361_v38  ;;  %v2160_v2 = vor.u32 %v2159_v54, %v2156_v53  ;;  %v374_v5 = vshrl.u32 %v255_v50, 16  ;;  %v377_v6 = vshll.u32 %v255_v50, 16  ;;  %v257_v38 = vld [vmem:[%s6965_s29 + $0x30] sm:$0xf] }
  0x2c   : > { %9237 = vst [vmem:[#allocation4_spill] sm:$0xff] %v7036_v51  ;;  %6319 = vmatmul.mubr.msk.bf16.vlgmr.msra.gmra.mrb[0].mxu0 %vm735_vm4, %v7036_v51  ;;  %v372_v7 = vsel %vm6983_vm3, %v367_v58, %v371_v48  ;;  %v2169_v8 = vrot.slane %v2167_v62, 4  ;;  %v2175_v4 = vrot.slane %v2173_v63, 5  ;;  %v383_v9 = vshll.u32 %v256_v56, 16  ;;  %v286_v48 = vld [vmem:[%s6965_s29 + $0x38] sm:$0x1] }
  0x2d   : > { %6385 = vmatpush3.bf16.msra.mxu0 %v7006_v60  ;;  %v5457_v12 = vcombine.low %v362_v0, %v372_v7  ;;  %v2161_v13 = vrot.slane %v2160_v2, 4  ;;  %v376_v16 = vrot.slane %v374_v5, 4  ;;  %v379_v17 = vrot.slane %v377_v6, 5  ;;  %v5645_v62 = vld [vmem:[%s6965_s29 + $0x3c] sm:$0xf] }
  0x2e   : > { %v2170_v19 = vor.u32 %v2169_v8, %v2165_v61  ;;  %v385_v21 = vrot.slane %v383_v9, 5  ;;  %v387_v23 = vshrl.u32 %v256_v56, 16  ;;  %v393_v24 = vshll.u32 %v285_v3, 16  ;;  %v5646_v5 = vld [vmem:[%s6965_s29 + $0x40] sm:$0xf] }
  0x2f   : > { %6186 = vmatprep.mubr.msk.bf16.mxu1 %vm735_vm4, %v5457_v12  ;;  %v2166_v60 = vsel %vm6983_vm3, %v2161_v13, %v2165_v61  ;;  %v380_v25 = vor.u32 %v379_v17, %v376_v16  ;;  %v2178_v27 = vshrl.u32 %v5642_v11, 16  ;;  %v2181_v28 = vshll.u32 %v5642_v11, 16  ;;  %v5647_v13 = vld [vmem:[%s6965_s29 + $0x44] sm:$0x1] }
  0x30   : > { %v2171_v30 = vrot.slane %v2170_v19, 4  ;;  %v389_v31 = vrot.slane %v387_v23, 4  ;;  %v395_v32 = vrot.slane %v393_v24, 5  ;;  %v2187_v33 = vshll.u32 %v5643_v18, 16  ;;  %v259_v23 = vld [vmem:[%s6965_s29 + $0x3c] sm:$0xf] }
  0x31   : > { %v381_v34 = vrot.slane %v380_v25, 4  ;;  %v2180_v35 = vrot.slane %v2178_v27, 4  ;;  %v2183_v36 = vrot.slane %v2181_v28, 5  ;;  %v2191_v37 = vshrl.u32 %v5643_v18, 16  ;;  %v260_v27 = vld [vmem:[%s6965_s29 + $0x40] sm:$0xf] }
  0x32   : > { %v2176_v39 = vsel %vm6983_vm3, %v2171_v30, %v2175_v4  ;;  %v390_v40 = vor.u32 %v389_v31, %v385_v21  ;;  %v2189_v41 = vrot.slane %v2187_v33, 5  ;;  %v2197_v42 = vshll.u32 %v5644_v26, 16 }
  0x33   : > { %v7057_v44 = vcombine.low %v2166_v60, %v2176_v39  ;;  %v386_v45 = vsel %vm6983_vm3, %v381_v34, %v385_v21  ;;  %v2184_v46 = vor.u32 %v2183_v36, %v2180_v35  ;;  %v2193_v47 = vrot.slane %v2191_v37, 4 }
  0x34   : > { %v391_v49 = vrot.slane %v390_v40, 4  ;;  %v2199_v50 = vrot.slane %v2197_v42, 5  ;;  %v398_v52 = vshrl.u32 %v257_v38, 16  ;;  %v401_v53 = vshll.u32 %v257_v38, 16  ;;  %v287_v40 = vld [vmem:[%s6965_s29 + $0x44] sm:$0x1] }
  0x35   : > { %9238 = vst [vmem:[#allocation5_spill] sm:$0xff] %v7057_v44  ;;  %6322 = vmatprep.mubr.msk.bf16.mxu0 %vm735_vm4, %v7057_v44  ;;  %v2185_v54 = vrot.slane %v2184_v46, 4  ;;  %v2194_v56 = vor.u32 %v2193_v47, %v2189_v41  ;;  %v407_v58 = vshll.u32 %v258_v43, 16  ;;  %v411_v61 = vshrl.u32 %v258_v43, 16  ;;  %v5648_v42 = vld [vmem:[%s6965_s29 + $0x48] sm:$0xf] }
  0x36   : > { %v396_v63 = vsel %vm6983_vm3, %v391_v49, %v395_v32  ;;  %v400_v0 = vrot.slane %v398_v52, 4  ;;  %v403_v2 = vrot.slane %v401_v53, 5  ;;  %v417_v3 = vshll.u32 %v286_v48, 16  ;;  %v5649_v48 = vld [vmem:[%s6965_s29 + $0x4c] sm:$0xf] }
  0x37   : > { %v5458_v6 = vcombine.low %v386_v45, %v396_v63  ;;  %v2190_v7 = vsel %vm6983_vm3, %v2185_v54, %v2189_v41  ;;  %v2195_v8 = vrot.slane %v2194_v56, 4  ;;  %v409_v4 = vrot.slane %v407_v58, 5 }
  0x38   : > { %v404_v9 = vor.u32 %v403_v2, %v400_v0  ;;  %v413_v11 = vrot.slane %v411_v61, 4  ;;  %v419_v12 = vrot.slane %v417_v3, 5  ;;  %v2202_v16 = vshrl.u32 %v5645_v62, 16  ;;  %v5650_v0 = vld [vmem:[%s6965_s29 + $0x50] sm:$0x1] }
  0x39   : > { %6187 = vmatmul.mubr.msk.bf16.gmra.mrb[4].mxu1 %vm735_vm4, %v5458_v6  ;;  %v2200_v17 = vsel %vm6983_vm3, %v2195_v8, %v2199_v50  ;;  %v2205_v18 = vshll.u32 %v5645_v62, 16  ;;  %v2211_v19 = vshll.u32 %v5646_v5, 16  ;;  %v2215_v21 = vshrl.u32 %v5646_v5, 16  ;;  %v261_v5 = vld [vmem:[%s6965_s29 + $0x48] sm:$0xf] }
  0x3a   : > { %v7075_v24 = vcombine.low %v2190_v7, %v2200_v17  ;;  %v405_v60 = vrot.slane %v404_v9, 4  ;;  %v414_v25 = vor.u32 %v413_v11, %v409_v4  ;;  %v2204_v26 = vrot.slane %v2202_v16, 4  ;;  %v262_v9 = vld [vmem:[%s6965_s29 + $0x4c] sm:$0xf] }
  0x3b   : > { %v2207_v28 = vrot.slane %v2205_v18, 5  ;;  %v2213_v30 = vrot.slane %v2211_v19, 5  ;;  %v2217_v31 = vrot.slane %v2215_v21, 4  ;;  %v2221_v32 = vshll.u32 %v5647_v13, 16  ;;  %v288_v21 = vld [vmem:[%s6965_s29 + $0x50] sm:$0x1] }
  0x3c   : > { %9239 = vst [vmem:[#allocation6_spill] sm:$0xff] %v7075_v24  ;;  %6323 = vmatmul.mubr.msk.bf16.gmra.mrb[4].mxu0 %vm735_vm4, %v7075_v24  ;;  %v410_v33 = vsel %vm6983_vm3, %v405_v60, %v409_v4  ;;  %v415_v34 = vrot.slane %v414_v25, 4  ;;  %v422_v35 = vshrl.u32 %v259_v23, 16  ;;  %v425_v36 = vshll.u32 %v259_v23, 16 }
  0x3d   : > { %v2208_v37 = vor.u32 %v2207_v28, %v2204_v26  ;;  %v2218_v38 = vor.u32 %v2217_v31, %v2213_v30  ;;  %v2223_v39 = vrot.slane %v2221_v32, 5  ;;  %v431_v41 = vshll.u32 %v260_v27, 16  ;;  %v5651_v28 = vld [vmem:[%s6965_s29 + $0x54] sm:$0xf] }
  0x3e   : > { %v420_v43 = vsel %vm6983_vm3, %v415_v34, %v419_v12  ;;  %v424_v45 = vrot.slane %v422_v35, 4  ;;  %v427_v46 = vrot.slane %v425_v36, 5  ;;  %v435_v47 = vshrl.u32 %v260_v27, 16 }
  0x3f   : > { %v5459_v49 = vcombine.low %v410_v33, %v420_v43  ;;  %v2209_v50 = vrot.slane %v2208_v37, 4  ;;  %v2219_v52 = vrot.slane %v2218_v38, 4  ;;  %v433_v53 = vrot.slane %v431_v41, 5  ;;  %v5652_v38 = vld [vmem:[%s6965_s29 + $0x58] sm:$0xf] }
  0x40   : > { %v428_v54 = vor.u32 %v427_v46, %v424_v45  ;;  %v437_v56 = vrot.slane %v435_v47, 4  ;;  %v441_v58 = vshll.u32 %v287_v40, 16  ;;  %v2226_v61 = vshrl.u32 %v5648_v42, 16  ;;  %v5653_v47 = vld [vmem:[%s6965_s29 + $0x5c] sm:$0x1] }
  0x41   : > { %6190 = vmatprep.mubr.msk.bf16.mxu1 %vm735_vm4, %v5459_v49  ;;  %v2214_v62 = vsel %vm6983_vm3, %v2209_v50, %v2213_v30  ;;  %v2224_v63 = vsel %vm6983_vm3, %v2219_v52, %v2223_v39  ;;  %v2229_v2 = vshll.u32 %v5648_v42, 16  ;;  %v2235_v3 = vshll.u32 %v5649_v48, 16 }
  0x42   : > { %v7094_v6 = vcombine.low %v2214_v62, %v2224_v63  ;;  %v429_v7 = vrot.slane %v428_v54, 4  ;;  %v438_v8 = vor.u32 %v437_v56, %v433_v53  ;;  %v443_v4 = vrot.slane %v441_v58, 5  ;;  %v263_v54 = vld [vmem:[%s6965_s29 + $0x54] sm:$0xf]  ;;  %v264_v63 = vld [vmem:[%s6965_s29 + $0x58] sm:$0xf] }
  0x43   : > { %v2228_v11 = vrot.slane %v2226_v61, 4  ;;  %v2231_v12 = vrot.slane %v2229_v2, 5  ;;  %v2237_v13 = vrot.slane %v2235_v3, 5  ;;  %v2239_v16 = vshrl.u32 %v5649_v48, 16 }
  0x44   : > { %9240 = vst [vmem:[#allocation7_spill] sm:$0xff] %v7094_v6  ;;  %6326 = vmatprep.mubr.msk.bf16.mxu0 %vm735_vm4, %v7094_v6  ;;  %v434_v17 = vsel %vm6983_vm3, %v429_v7, %v433_v53  ;;  %v439_v18 = vrot.slane %v438_v8, 4  ;;  %v2245_v19 = vshll.u32 %v5650_v0, 16  ;;  %v446_v23 = vshrl.u32 %v261_v5, 16  ;;  %v7383_v6 = vld [vmem:[%s6965_s29 + $0xbc] sm:$0x1] }
  0x45   : > { %v2232_v60 = vor.u32 %v2231_v12, %v2228_v11  ;;  %v2241_v25 = vrot.slane %v2239_v16, 4  ;;  %v449_v26 = vshll.u32 %v261_v5, 16  ;;  %v455_v27 = vshll.u32 %v262_v9, 16  ;;  %9251 = vst [vmem:[#allocation18_spill] sm:$0xff] %v7383_v6 }
  0x46   : > { %v444_v30 = vsel %vm6983_vm3, %v439_v18, %v443_v4  ;;  %v2247_v31 = vrot.slane %v2245_v19, 5  ;;  %v448_v32 = vrot.slane %v446_v23, 4  ;;  %v459_v33 = vshrl.u32 %v262_v9, 16  ;;  %v289_v9 = vld [vmem:[%s6965_s29 + $0x5c] sm:$0x1] }
  0x47   : > { %v5460_v34 = vcombine.low %v434_v17, %v444_v30  ;;  %v2233_v35 = vrot.slane %v2232_v60, 4  ;;  %v2242_v36 = vor.u32 %v2241_v25, %v2237_v13  ;;  %v451_v37 = vrot.slane %v449_v26, 5  ;;  %v5654_v18 = vld [vmem:[%s6965_s29 + $0x60] sm:$0xf]  ;;  %v5655_v25 = vld [vmem:[%s6965_s29 + $0x64] sm:$0xf] }
  0x48   : > { %v457_v39 = vrot.slane %v455_v27, 5  ;;  %v461_v40 = vrot.slane %v459_v33, 4  ;;  %v465_v41 = vshll.u32 %v288_v21, 16  ;;  %v2250_v42 = vshrl.u32 %v5651_v28, 16  ;;  %v5656_v33 = vld [vmem:[%s6965_s29 + $0x68] sm:$0x1] }
  0x49   : > { %6191 = vmatmul.mubr.msk.bf16.gmra.mrb[8].mxu1 %vm735_vm4, %v5460_v34  ;;  %v2238_v43 = vsel %vm6983_vm3, %v2233_v35, %v2237_v13  ;;  %v2243_v45 = vrot.slane %v2242_v36, 4  ;;  %v452_v46 = vor.u32 %v451_v37, %v448_v32  ;;  %v2253_v48 = vshll.u32 %v5651_v28, 16 }
  0x4a   : > { %v462_v49 = vor.u32 %v461_v40, %v457_v39  ;;  %v467_v50 = vrot.slane %v465_v41, 5  ;;  %v2252_v52 = vrot.slane %v2250_v42, 4  ;;  %v2259_v53 = vshll.u32 %v5652_v38, 16  ;;  %v265_v40 = vld [vmem:[%s6965_s29 + $0x60] sm:$0xf] }
  0x4b   : > { %v2248_v56 = vsel %vm6983_vm3, %v2243_v45, %v2247_v31  ;;  %v453_v58 = vrot.slane %v452_v46, 4  ;;  %v2255_v61 = vrot.slane %v2253_v48, 5  ;;  %v2263_v62 = vshrl.u32 %v5652_v38, 16  ;;  %v7133_v46 = vld [vmem:[%s6965_s29 + $0x64] sm:$0xf] }
  0x4c   : > { %v7114_v0 = vcombine.low %v2238_v43, %v2248_v56  ;;  %v463_v2 = vrot.slane %v462_v49, 4  ;;  %v2261_v3 = vrot.slane %v2259_v53, 5  ;;  %v2269_v5 = vshll.u32 %v5653_v47, 16 }
  0x4d   : > { %v458_v7 = vsel %vm6983_vm3, %v453_v58, %v457_v39  ;;  %v2256_v8 = vor.u32 %v2255_v61, %v2252_v52  ;;  %v2265_v4 = vrot.slane %v2263_v62, 4  ;;  %v470_v11 = vshrl.u32 %v263_v54, 16  ;;  %v290_v62 = vld [vmem:[%s6965_s29 + $0x68] sm:$0x1] }
  0x4e   : > { %9241 = vst [vmem:[#allocation8_spill] sm:$0xff] %v7114_v0  ;;  %6327 = vmatmul.mubr.msk.bf16.gmra.mrb[8].mxu0 %vm735_vm4, %v7114_v0  ;;  %v468_v12 = vsel %vm6983_vm3, %v463_v2, %v467_v50  ;;  %v2271_v13 = vrot.slane %v2269_v5, 5  ;;  %v473_v16 = vshll.u32 %v263_v54, 16  ;;  %v479_v17 = vshll.u32 %v264_v63, 16 }
  0x4f   : > { %v5461_v19 = vcombine.low %v458_v7, %v468_v12  ;;  %v2257_v21 = vrot.slane %v2256_v8, 4  ;;  %v2266_v23 = vor.u32 %v2265_v4, %v2261_v3  ;;  %v472_v60 = vrot.slane %v470_v11, 4  ;;  %v5657_v4 = vld [vmem:[%s6965_s29 + $0x6c] sm:$0xf] }
  0x50   : > { %v475_v26 = vrot.slane %v473_v16, 5  ;;  %v481_v27 = vrot.slane %v479_v17, 5  ;;  %v483_v28 = vshrl.u32 %v264_v63, 16  ;;  %v489_v30 = vshll.u32 %v289_v9, 16  ;;  %v7148_v16 = vld [vmem:[%s6965_s29 + $0x70] sm:$0xf] }
  0x51   : > { %6194 = vmatprep.mubr.msk.bf16.mxu1 %vm735_vm4, %v5461_v19  ;;  %v2262_v31 = vsel %vm6983_vm3, %v2257_v21, %v2261_v3  ;;  %v2267_v32 = vrot.slane %v2266_v23, 4  ;;  %v2274_v34 = vshrl.u32 %v5654_v18, 16  ;;  %v2277_v35 = vshll.u32 %v5654_v18, 16  ;;  %v7153_v23 = vld [vmem:[%s6965_s29 + $0x74] sm:$0x1] }
  0x52   : > { %v476_v36 = vor.u32 %v475_v26, %v472_v60  ;;  %v485_v37 = vrot.slane %v483_v28, 4  ;;  %v491_v38 = vrot.slane %v489_v30, 5  ;;  %v2283_v39 = vshll.u32 %v5655_v25, 16  ;;  %v7158_v60 = vld [vmem:[%s9191_s1] sm:$0xf] }
  0x53   : > { %v2272_v41 = vsel %vm6983_vm3, %v2267_v32, %v2271_v13  ;;  %v2276_v42 = vrot.slane %v2274_v34, 4  ;;  %v2279_v43 = vrot.slane %v2277_v35, 5  ;;  %v2287_v45 = vshrl.u32 %v5655_v25, 16  ;;  %v267_v30 = vld [vmem:[%s6965_s29 + $0x6c] sm:$0xf]  ;;  %6777 = vmatprep.subr.msk.bf16.mxu1 %vm784_vm0, %v7158_v60 }
  0x54   : > { %v7135_v47 = vcombine.low %v2262_v31, %v2272_v41  ;;  %v477_v48 = vrot.slane %v476_v36, 4  ;;  %v486_v49 = vor.u32 %v485_v37, %v481_v27  ;;  %v2285_v50 = vrot.slane %v2283_v39, 5  ;;  %v7171_v35 = vld [vmem:[%s9191_s1 + $0x18] sm:$0xf] }
  0x55   : > { %v2280_v52 = vor.u32 %v2279_v43, %v2276_v42  ;;  %v2289_v53 = vrot.slane %v2287_v45, 4  ;;  %v2293_v54 = vshll.u32 %v5656_v33, 16  ;;  %v494_v56 = vshrl.u32 %v265_v40, 16  ;;  %6783 = vmatprep.subr.msk.bf16.mxu0 %vm784_vm0, %v7171_v35 }
  0x56   : > { %9242 = vst [vmem:[#allocation9_spill] sm:$0xff] %v7135_v47  ;;  %6330 = vmatprep.mubr.msk.bf16.mxu0 %vm735_vm4, %v7135_v47  ;;  %v482_v58 = vsel %vm6983_vm3, %v477_v48, %v481_v27  ;;  %v487_v61 = vrot.slane %v486_v49, 4  ;;  %v497_v63 = vshll.u32 %v265_v40, 16  ;;  %v503_v2 = vshll.u32 %v7133_v46, 16  ;;  %v268_v40 = vld [vmem:[%s6965_s29 + $0x70] sm:$0xf] }
  0x57   : > { %v2281_v3 = vrot.slane %v2280_v52, 4  ;;  %v2290_v5 = vor.u32 %v2289_v53, %v2285_v50  ;;  %v2295_v7 = vrot.slane %v2293_v54, 5  ;;  %v496_v8 = vrot.slane %v494_v56, 4 }
  0x58   : > { %v492_v9 = vsel %vm6983_vm3, %v487_v61, %v491_v38  ;;  %v499_v11 = vrot.slane %v497_v63, 5  ;;  %v505_v12 = vrot.slane %v503_v2, 5  ;;  %v507_v13 = vshrl.u32 %v7133_v46, 16 }
  0x59   : > { %v5462_v17 = vcombine.low %v482_v58, %v492_v9  ;;  %v2286_v18 = vsel %vm6983_vm3, %v2281_v3, %v2285_v50  ;;  %v2291_v19 = vrot.slane %v2290_v5, 4  ;;  %v513_v21 = vshll.u32 %v290_v62, 16  ;;  %v291_v58 = vld [vmem:[%s6965_s29 + $0x74] sm:$0x1]  ;;  %v5660_v62 = vld [vmem:[%s6965_s29 + $0x78] sm:$0xf] }
  0x5a   : > { %v500_v25 = vor.u32 %v499_v11, %v496_v8  ;;  %v509_v26 = vrot.slane %v507_v13, 4  ;;  %v2298_v27 = vshrl.u32 %v5657_v4, 16  ;;  %v2301_v28 = vshll.u32 %v5657_v4, 16 }
  0x5b   : > { %6195 = vmatmul.mubr.msk.bf16.gmra.mrb[12].mxu1 %vm735_vm4, %v5462_v17  ;;  %v2296_v31 = vsel %vm6983_vm3, %v2291_v19, %v2295_v7  ;;  %v515_v32 = vrot.slane %v513_v21, 5  ;;  %v2307_v33 = vshll.u32 %v7148_v16, 16  ;;  %v2311_v34 = vshrl.u32 %v7148_v16, 16  ;;  %v7188_v7 = vld [vmem:[%s6965_s29 + $0x7c] sm:$0xf] }
  0x5c   : > { %v7173_v36 = vcombine.low %v2286_v18, %v2296_v31  ;;  %v501_v37 = vrot.slane %v500_v25, 4  ;;  %v510_v38 = vor.u32 %v509_v26, %v505_v12  ;;  %v2300_v39 = vrot.slane %v2298_v27, 4  ;;  %v7196_v25 = vld [vmem:[%s6965_s29 + $0x80] sm:$0x1] }
  0x5d   : > { %v2303_v41 = vrot.slane %v2301_v28, 5  ;;  %v2309_v42 = vrot.slane %v2307_v33, 5  ;;  %v2313_v43 = vrot.slane %v2311_v34, 4  ;;  %v2317_v45 = vshll.u32 %v7153_v23, 16  ;;  %v7200_v28 = vld [vmem:[%s6965_s29 + $0x78] sm:$0xf] }
  0x5e   : > { %9243 = vst [vmem:[#allocation10_spill] sm:$0xff] %v7173_v36  ;;  %6331 = vmatmul.mubr.msk.bf16.gmra.mrb[12].mxu0 %vm735_vm4, %v7173_v36  ;;  %v506_v48 = vsel %vm6983_vm3, %v501_v37, %v505_v12  ;;  %v511_v49 = vrot.slane %v510_v38, 4  ;;  %v518_v50 = vshrl.u32 %v267_v30, 16  ;;  %v521_v52 = vshll.u32 %v267_v30, 16  ;;  %v7205_v34 = vld [vmem:[%s6965_s29 + $0x7c] sm:$0xf] }
  0x5f   : > { %v2304_v53 = vor.u32 %v2303_v41, %v2300_v39  ;;  %v2314_v54 = vor.u32 %v2313_v43, %v2309_v42  ;;  %v2319_v56 = vrot.slane %v2317_v45, 5  ;;  %v527_v61 = vshll.u32 %v268_v40, 16  ;;  %v292_v45 = vld [vmem:[%s6965_s29 + $0x80] sm:$0x1] }
  0x60   : > { %v516_v63 = vsel %vm6983_vm3, %v511_v49, %v515_v32  ;;  %v520_v2 = vrot.slane %v518_v50, 4  ;;  %v523_v3 = vrot.slane %v521_v52, 5  ;;  %v531_v5 = vshrl.u32 %v268_v40, 16 }
  0x61   : > { %v5463_v8 = vcombine.low %v506_v48, %v516_v63  ;;  %v2305_v4 = vrot.slane %v2304_v53, 4  ;;  %v2315_v9 = vrot.slane %v2314_v54, 4  ;;  %v529_v11 = vrot.slane %v527_v61, 5  ;;  %v5663_v54 = vld [vmem:[%s6965_s29 + $0x84] sm:$0xf] }
  0x62   : > { %v524_v12 = vor.u32 %v523_v3, %v520_v2  ;;  %v533_v13 = vrot.slane %v531_v5, 4  ;;  %v537_v17 = vshll.u32 %v291_v58, 16  ;;  %v2322_v18 = vshrl.u32 %v5660_v62, 16  ;;  %v7222_v63 = vld [vmem:[%s6965_s29 + $0x88] sm:$0xf] }
  0x63   : > { %6198 = vmatprep.mubr.msk.bf16.mxu1 %vm735_vm4, %v5463_v8  ;;  %v2310_v19 = vsel %vm6983_vm3, %v2305_v4, %v2309_v42  ;;  %v2320_v21 = vsel %vm6983_vm3, %v2315_v9, %v2319_v56  ;;  %v2325_v26 = vshll.u32 %v5660_v62, 16  ;;  %v2331_v27 = vshll.u32 %v7188_v7, 16  ;;  %v7225_v4 = vld [vmem:[%s6965_s29 + $0x8c] sm:$0x1] }
  0x64   : > { %v7202_v30 = vcombine.low %v2310_v19, %v2320_v21  ;;  %v525_v31 = vrot.slane %v524_v12, 4  ;;  %v534_v32 = vor.u32 %v533_v13, %v529_v11  ;;  %v539_v33 = vrot.slane %v537_v17, 5  ;;  %v7228_v17 = vld [vmem:[%s6965_s29 + $0x84] sm:$0xf] }
  0x65   : > { %v2324_v37 = vrot.slane %v2322_v18, 4  ;;  %v2327_v38 = vrot.slane %v2325_v26, 5  ;;  %v2333_v39 = vrot.slane %v2331_v27, 5  ;;  %v2335_v40 = vshrl.u32 %v7188_v7, 16  ;;  %v7234_v27 = vld [vmem:[%s6965_s29 + $0x88] sm:$0xf] }
  0x66   : > { %9244 = vst [vmem:[#allocation11_spill] sm:$0xff] %v7202_v30  ;;  %6334 = vmatprep.mubr.msk.bf16.mxu0 %vm735_vm4, %v7202_v30  ;;  %v530_v41 = vsel %vm6983_vm3, %v525_v31, %v529_v11  ;;  %v535_v42 = vrot.slane %v534_v32, 4  ;;  %v2341_v43 = vshll.u32 %v7196_v25, 16  ;;  %v542_v48 = vshrl.u32 %v7200_v28, 16 }
  0x67   : > { %v2328_v49 = vor.u32 %v2327_v38, %v2324_v37  ;;  %v2337_v50 = vrot.slane %v2335_v40, 4  ;;  %v545_v52 = vshll.u32 %v7200_v28, 16  ;;  %v551_v53 = vshll.u32 %v7205_v34, 16 }
  0x68   : > { %v540_v56 = vsel %vm6983_vm3, %v535_v42, %v539_v33  ;;  %v2343_v58 = vrot.slane %v2341_v43, 5  ;;  %v544_v61 = vrot.slane %v542_v48, 4  ;;  %v555_v62 = vshrl.u32 %v7205_v34, 16 }
  0x69   : > { %v5464_v2 = vcombine.low %v530_v41, %v540_v56  ;;  %v2329_v3 = vrot.slane %v2328_v49, 4  ;;  %v2338_v5 = vor.u32 %v2337_v50, %v2333_v39  ;;  %v547_v8 = vrot.slane %v545_v52, 5  ;;  %v5666_v50 = vld [vmem:[%s6965_s29 + $0x90] sm:$0xf] }
  0x6a   : > { %v553_v9 = vrot.slane %v551_v53, 5  ;;  %v557_v11 = vrot.slane %v555_v62, 4  ;;  %v561_v12 = vshll.u32 %v292_v45, 16  ;;  %v2346_v13 = vshrl.u32 %v5663_v54, 16 }
  0x6b   : > { %6199 = vmatmul.mubr.msk.bf16.gmra.mrb[16].mxu1 %vm735_vm4, %v5464_v2  ;;  %v2334_v18 = vsel %vm6983_vm3, %v2329_v3, %v2333_v39  ;;  %v2339_v19 = vrot.slane %v2338_v5, 4  ;;  %v548_v21 = vor.u32 %v547_v8, %v544_v61  ;;  %v2349_v26 = vshll.u32 %v5663_v54, 16  ;;  %v293_v39 = vld [vmem:[%s6965_s29 + $0x8c] sm:$0x1] }
  0x6c   : > { %v558_v31 = vor.u32 %v557_v11, %v553_v9  ;;  %v563_v32 = vrot.slane %v561_v12, 5  ;;  %v2348_v33 = vrot.slane %v2346_v13, 4  ;;  %v2355_v37 = vshll.u32 %v7222_v63, 16 }
  0x6d   : > { %v2344_v38 = vsel %vm6983_vm3, %v2339_v19, %v2343_v58  ;;  %v549_v40 = vrot.slane %v548_v21, 4  ;;  %v2351_v41 = vrot.slane %v2349_v26, 5  ;;  %v2359_v42 = vshrl.u32 %v7222_v63, 16  ;;  %v7249_v58 = vld [vmem:[%s6965_s29 + $0x94] sm:$0xf] }
  0x6e   : > { %v7241_v43 = vcombine.low %v2334_v18, %v2344_v38  ;;  %v559_v45 = vrot.slane %v558_v31, 4  ;;  %v2357_v48 = vrot.slane %v2355_v37, 5  ;;  %v2365_v49 = vshll.u32 %v7225_v4, 16  ;;  %v7259_v21 = vld [vmem:[%s6965_s29 + $0x98] sm:$0x1] }
  0x6f   : > { %v554_v52 = vsel %vm6983_vm3, %v549_v40, %v553_v9  ;;  %v2352_v53 = vor.u32 %v2351_v41, %v2348_v33  ;;  %v2361_v54 = vrot.slane %v2359_v42, 4  ;;  %v566_v56 = vshrl.u32 %v7228_v17, 16  ;;  %v7262_v26 = vld [vmem:[%s6965_s29 + $0x90] sm:$0xf] }
  0x70   : > { %9245 = vst [vmem:[#allocation12_spill] sm:$0xff] %v7241_v43  ;;  %6335 = vmatmul.mubr.msk.bf16.gmra.mrb[16].mxu0 %vm735_vm4, %v7241_v43  ;;  %v564_v61 = vsel %vm6983_vm3, %v559_v45, %v563_v32  ;;  %v2367_v62 = vrot.slane %v2365_v49, 5  ;;  %v569_v2 = vshll.u32 %v7228_v17, 16  ;;  %v575_v3 = vshll.u32 %v7234_v27, 16 }
  0x71   : > { %v5465_v5 = vcombine.low %v554_v52, %v564_v61  ;;  %v2353_v8 = vrot.slane %v2352_v53, 4  ;;  %v2362_v9 = vor.u32 %v2361_v54, %v2357_v48  ;;  %v568_v11 = vrot.slane %v566_v56, 4  ;;  %v294_v61 = vld [vmem:[%s6965_s29 + $0x98] sm:$0x1] }
  0x72   : > { %v571_v12 = vrot.slane %v569_v2, 5  ;;  %v577_v13 = vrot.slane %v575_v3, 5  ;;  %v579_v18 = vshrl.u32 %v7234_v27, 16  ;;  %v585_v19 = vshll.u32 %v293_v39, 16  ;;  %v7269_v39 = vld [vmem:[%s6965_s29 + $0x94] sm:$0xf] }
  0x73   : > { %6202 = vmatprep.mubr.msk.bf16.mxu1 %vm735_vm4, %v5465_v5  ;;  %v2358_v31 = vsel %vm6983_vm3, %v2353_v8, %v2357_v48  ;;  %v2363_v32 = vrot.slane %v2362_v9, 4  ;;  %v2370_v33 = vshrl.u32 %v5666_v50, 16  ;;  %v2373_v37 = vshll.u32 %v5666_v50, 16  ;;  %v5669_v9 = vld [vmem:[%s6965_s29 + $0x9c] sm:$0xf] }
  0x74   : > { %v572_v38 = vor.u32 %v571_v12, %v568_v11  ;;  %v581_v40 = vrot.slane %v579_v18, 4  ;;  %v587_v41 = vrot.slane %v585_v19, 5  ;;  %v2379_v42 = vshll.u32 %v7249_v58, 16  ;;  %v7287_v19 = vld [vmem:[%s6965_s29 + $0xa0] sm:$0xf] }
  0x75   : > { %v2368_v45 = vsel %vm6983_vm3, %v2363_v32, %v2367_v62  ;;  %v2372_v49 = vrot.slane %v2370_v33, 4  ;;  %v2375_v52 = vrot.slane %v2373_v37, 5  ;;  %v2383_v53 = vshrl.u32 %v7249_v58, 16 }
  0x76   : > { %v7274_v48 = vcombine.low %v2358_v31, %v2368_v45  ;;  %v573_v54 = vrot.slane %v572_v38, 4  ;;  %v582_v50 = vor.u32 %v581_v40, %v577_v13  ;;  %v2381_v56 = vrot.slane %v2379_v42, 5  ;;  %v7293_v45 = vld [vmem:[%s6965_s29 + $0xa4] sm:$0x1] }
  0x77   : > { %v2376_v2 = vor.u32 %v2375_v52, %v2372_v49  ;;  %v2385_v3 = vrot.slane %v2383_v53, 4  ;;  %v2389_v5 = vshll.u32 %v7259_v21, 16  ;;  %v590_v8 = vshrl.u32 %v7262_v26, 16 }
  0x78   : > { %9246 = vst [vmem:[#allocation13_spill] sm:$0xff] %v7274_v48  ;;  %6338 = vmatprep.mubr.msk.bf16.mxu0 %vm735_vm4, %v7274_v48  ;;  %v578_v62 = vsel %vm6983_vm3, %v573_v54, %v577_v13  ;;  %v583_v11 = vrot.slane %v582_v50, 4  ;;  %v593_v12 = vshll.u32 %v7262_v26, 16  ;;  %v599_v18 = vshll.u32 %v7269_v39, 16  ;;  %v7298_v50 = vld [vmem:[%s6965_s29 + $0x9c] sm:$0xf] }
  0x79   : > { %v2377_v31 = vrot.slane %v2376_v2, 4  ;;  %v2386_v32 = vor.u32 %v2385_v3, %v2381_v56  ;;  %v2391_v33 = vrot.slane %v2389_v5, 5  ;;  %v592_v37 = vrot.slane %v590_v8, 4 }
  0x7a   : > { %v588_v38 = vsel %vm6983_vm3, %v583_v11, %v587_v41  ;;  %v595_v40 = vrot.slane %v593_v12, 5  ;;  %v601_v42 = vrot.slane %v599_v18, 5  ;;  %v603_v13 = vshrl.u32 %v7269_v39, 16  ;;  %v7301_v41 = vld [vmem:[%s6965_s29 + $0xa0] sm:$0xf] }
  0x7b   : > { %v5466_v49 = vcombine.low %v578_v62, %v588_v38  ;;  %v2382_v52 = vsel %vm6983_vm3, %v2377_v31, %v2381_v56  ;;  %v2387_v53 = vrot.slane %v2386_v32, 4  ;;  %v609_v54 = vshll.u32 %v294_v61, 16 }
  0x7c   : > { %v596_v2 = vor.u32 %v595_v40, %v592_v37  ;;  %v605_v3 = vrot.slane %v603_v13, 4  ;;  %v2394_v5 = vshrl.u32 %v5669_v9, 16  ;;  %v2397_v8 = vshll.u32 %v5669_v9, 16  ;;  %v7312_v13 = vld [vmem:[%s6965_s29 + $0xa4] sm:$0x1] }
  0x7d   : > { %6203 = vmatmul.mubr.msk.bf16.gmra.mrb[20].mxu1 %vm735_vm4, %v5466_v49  ;;  %v2392_v62 = vsel %vm6983_vm3, %v2387_v53, %v2391_v33  ;;  %v611_v11 = vrot.slane %v609_v54, 5  ;;  %v2403_v56 = vshll.u32 %v7287_v19, 16  ;;  %v2407_v61 = vshrl.u32 %v7287_v19, 16  ;;  %9248 = vst [vmem:[#allocation15_spill] sm:$0xff] %v7312_v13  ;;  %v5672_v49 = vld [vmem:[%s6965_s29 + $0xa8] sm:$0xf] }
  0x7e   : > { %v7308_v12 = vcombine.low %v2382_v52, %v2392_v62  ;;  %v597_v18 = vrot.slane %v596_v2, 4  ;;  %v606_v31 = vor.u32 %v605_v3, %v601_v42  ;;  %v2396_v32 = vrot.slane %v2394_v5, 4 }
  0x7f   : > { %v2399_v37 = vrot.slane %v2397_v8, 5  ;;  %v2405_v9 = vrot.slane %v2403_v56, 5  ;;  %v2409_v38 = vrot.slane %v2407_v61, 4  ;;  %v2413_v40 = vshll.u32 %v7293_v45, 16 }
  0x80   : > { %9247 = vst [vmem:[#allocation14_spill] sm:$0xff] %v7308_v12  ;;  %6339 = vmatmul.mubr.msk.bf16.gmra.mrb[20].mxu0 %vm735_vm4, %v7308_v12  ;;  %v602_v33 = vsel %vm6983_vm3, %v597_v18, %v601_v42  ;;  %v607_v52 = vrot.slane %v606_v31, 4  ;;  %v614_v53 = vshrl.u32 %v7298_v50, 16  ;;  %v617_v54 = vshll.u32 %v7298_v50, 16  ;;  %v7326_v18 = vld [vmem:[%s6965_s29 + $0xac] sm:$0xf] }
  0x81   : > { %v2400_v2 = vor.u32 %v2399_v37, %v2396_v32  ;;  %v2410_v3 = vor.u32 %v2409_v38, %v2405_v9  ;;  %v2415_v5 = vrot.slane %v2413_v40, 5  ;;  %v623_v8 = vshll.u32 %v7301_v41, 16  ;;  %v7332_v32 = vld [vmem:[%s6965_s29 + $0xa8] sm:$0xf] }
  0x82   : > { %v612_v62 = vsel %vm6983_vm3, %v607_v52, %v611_v11  ;;  %v616_v56 = vrot.slane %v614_v53, 4  ;;  %v619_v61 = vrot.slane %v617_v54, 5  ;;  %v627_v42 = vshrl.u32 %v7301_v41, 16  ;;  %v7336_v52 = vld [vmem:[%s6965_s29 + $0xac] sm:$0xf] }
  0x83   : > { %v5467_v31 = vcombine.low %v602_v33, %v612_v62  ;;  %v2401_v22 = vrot.slane %v2400_v2, 4  ;;  %v2411_v10 = vrot.slane %v2410_v3, 4  ;;  %v625_v57 = vrot.slane %v623_v8, 5 }
  0x84   : > { %v620_v37 = vor.u32 %v619_v61, %v616_v56  ;;  %v629_v38 = vrot.slane %v627_v42, 4  ;;  %v633_v40 = vshll.u32 %v7312_v13, 16  ;;  %v2418_v11 = vshrl.u32 %v5672_v49, 16 }
  0x85   : > { %6206 = vmatprep.mubr.msk.bf16.mxu1 %vm735_vm4, %v5467_v31  ;;  %v2406_v33 = vsel %vm6983_vm3, %v2401_v22, %v2405_v9  ;;  %v2416_v53 = vsel %vm6983_vm3, %v2411_v10, %v2415_v5  ;;  %v2421_v54 = vshll.u32 %v5672_v49, 16  ;;  %v2427_v2 = vshll.u32 %v7326_v18, 16  ;;  %v7348_v31 = vld [vmem:[%s6965_s29 + $0xb0] sm:$0x1]  ;;  %v5675_v22 = vld [vmem:[%s6965_s29 + $0xb4] sm:$0xf] }
  0x86   : > { %v7344_v3 = vcombine.low %v2406_v33, %v2416_v53  ;;  %v621_v8 = vrot.slane %v620_v37, 4  ;;  %v630_v62 = vor.u32 %v629_v38, %v625_v57  ;;  %v635_v56 = vrot.slane %v633_v40, 5  ;;  %9250 = vst [vmem:[#allocation17_spill] sm:$0xff] %v7348_v31 }
  0x87   : > { %v2420_v61 = vrot.slane %v2418_v11, 4  ;;  %v2423_v42 = vrot.slane %v2421_v54, 5  ;;  %v2429_v12 = vrot.slane %v2427_v2, 5  ;;  %v2431_v48 = vshrl.u32 %v7326_v18, 16  ;;  %v7363_v2 = vld [vmem:[%s6965_s29 + $0xb8] sm:$0xf] }
  0x88   : > { %9249 = vst [vmem:[#allocation16_spill] sm:$0xff] %v7344_v3  ;;  %6342 = vmatprep.mubr.msk.bf16.mxu0 %vm735_vm4, %v7344_v3  ;;  %v626_v10 = vsel %vm6983_vm3, %v621_v8, %v625_v57  ;;  %v631_v9 = vrot.slane %v630_v62, 4  ;;  %v2437_v49 = vshll.u32 %v7329_v20, 16  ;;  %v638_v5 = vshrl.u32 %v7332_v32, 16 }
  0x89   : > { %v2424_v37 = vor.u32 %v2423_v42, %v2420_v61  ;;  %v2433_v38 = vrot.slane %v2431_v48, 4  ;;  %v641_v40 = vshll.u32 %v7332_v32, 16  ;;  %v647_v11 = vshll.u32 %v7336_v52, 16  ;;  %v7366_v48 = vld [vmem:[%s6965_s29 + $0xbc] sm:$0x1] }
  0x8a   : > { %v636_v33 = vsel %vm6983_vm3, %v631_v9, %v635_v56  ;;  %v2439_v53 = vrot.slane %v2437_v49, 5  ;;  %v640_v54 = vrot.slane %v638_v5, 4  ;;  %v651_v57 = vshrl.u32 %v7336_v52, 16  ;;  %v7370_v56 = vld [vmem:[%s6965_s29 + $0xb4] sm:$0xf] }
  0x8b   : > { %v5468_v8 = vcombine.low %v626_v10, %v636_v33  ;;  %v2425_v62 = vrot.slane %v2424_v37, 4  ;;  %v2434_v3 = vor.u32 %v2433_v38, %v2429_v12  ;;  %v643_v61 = vrot.slane %v641_v40, 5  ;;  %v7376_v37 = vld [vmem:[%s6965_s29 + $0xb8] sm:$0xf] }
  0x8c   : > { %v649_v42 = vrot.slane %v647_v11, 5  ;;  %v653_v43 = vrot.slane %v651_v57, 4  ;;  %v657_v30 = vshll.u32 %v7348_v31, 16  ;;  %v2442_v36 = vshrl.u32 %v5675_v22, 16  ;;  %v5742_v31 = vld [vmem:[%s6965_s29 + $0x9c] sm:$0xe] }
  0x8d   : > { %6207 = vmatmul.mubr.msk.bf16.gmra.mrb[24].mxu1 %vm735_vm4, %v5468_v8  ;;  %v2430_v9 = vsel %vm6983_vm3, %v2425_v62, %v2429_v12  ;;  %v2435_v49 = vrot.slane %v2434_v3, 4  ;;  %v644_v10 = vor.u32 %v643_v61, %v640_v54  ;;  %v2445_v5 = vshll.u32 %v5675_v22, 16 }
  0x8e   : > { %v654_v38 = vor.u32 %v653_v43, %v649_v42  ;;  %v659_v40 = vrot.slane %v657_v30, 5  ;;  %v2444_v11 = vrot.slane %v2442_v36, 4  ;;  %v2451_v33 = vshll.u32 %v7363_v2, 16 }
  0x8f   : > { %v2440_v57 = vsel %vm6983_vm3, %v2435_v49, %v2439_v53  ;;  %v645_v47 = vrot.slane %v644_v10, 4  ;;  %v2447_v0 = vrot.slane %v2445_v5, 5  ;;  %v2455_v8 = vshrl.u32 %v7363_v2, 16  ;;  %v5678_v10 = vld [vmem:[%s6965_s29 + $0xc0] sm:$0xf] }
  0x90   : > { %v7385_v12 = vcombine.low %v2430_v9, %v2440_v57  ;;  %v655_v3 = vrot.slane %v654_v38, 4  ;;  %v2453_v22 = vrot.slane %v2451_v33, 5  ;;  %v2461_v30 = vshll.u32 %v7366_v48, 16 }
  0x91   : > { %v650_v36 = vsel %vm6983_vm3, %v645_v47, %v649_v42  ;;  %v2448_v43 = vor.u32 %v2447_v0, %v2444_v11  ;;  %v2457_v54 = vrot.slane %v2455_v8, 4  ;;  %v662_v53 = vshrl.u32 %v7370_v56, 16  ;;  %v7399_v42 = vld [vmem:[%s6965_s29 + $0xc4] sm:$0xf] }
  0x92   : > { %9252 = vst [vmem:[#allocation19_spill] sm:$0xff] %v7385_v12  ;;  %6343 = vmatmul.mubr.msk.bf16.gmra.mrb[24].mxu0 %vm735_vm4, %v7385_v12  ;;  %v660_v62 = vsel %vm6983_vm3, %v655_v3, %v659_v40  ;;  %v2463_v61 = vrot.slane %v2461_v30, 5  ;;  %v665_v9 = vshll.u32 %v7370_v56, 16  ;;  %v671_v49 = vshll.u32 %v7376_v37, 16  ;;  %v7404_v40 = vld [vmem:[%s6965_s29 + $0xc8] sm:$0x1] }
  0x93   : > { %v5469_v5 = vcombine.low %v650_v36, %v660_v62  ;;  %v2449_v38 = vrot.slane %v2448_v43, 4  ;;  %v2458_v47 = vor.u32 %v2457_v54, %v2453_v22  ;;  %v664_v0 = vrot.slane %v662_v53, 4 }
  0x94   : > { %v667_v11 = vrot.slane %v665_v9, 5  ;;  %v673_v33 = vrot.slane %v671_v49, 5  ;;  %v675_v57 = vshrl.u32 %v7376_v37, 16  ;;  %v681_v8 = vshll.u32 %v7383_v6, 16  ;;  %v7413_v49 = vld [vmem:[%s9191_s1 + $0x8] sm:$0xf] }
  0x95   : > { %6210 = vmatprep.mubr.msk.bf16.mxu1 %vm735_vm4, %v5469_v5  ;;  %v2454_v3 = vsel %vm6983_vm3, %v2449_v38, %v2453_v22  ;;  %v2459_v30 = vrot.slane %v2458_v47, 4  ;;  %v2466_v36 = vshrl.u32 %v5678_v10, 16  ;;  %v2469_v43 = vshll.u32 %v5678_v10, 16  ;;  %v5730_v38 = vld [vmem:[%s6965_s29 + $0xc] sm:$0xe] }
  0x96   : > { %v668_v54 = vor.u32 %v667_v11, %v664_v0  ;;  %v677_v53 = vrot.slane %v675_v57, 4  ;;  %v683_v62 = vrot.slane %v681_v8, 5  ;;  %v2475_v9 = vshll.u32 %v7399_v42, 16  ;;  %v7538_v6 = vld [vmem:[%s6965_s29 + $0x40] sm:$0xf] }
  0x97   : > { %v2464_v12 = vsel %vm6983_vm3, %v2459_v30, %v2463_v61  ;;  %v2468_v5 = vrot.slane %v2466_v36, 4  ;;  %v2471_v24 = vrot.slane %v2469_v43, 5  ;;  %v2479_v22 = vshrl.u32 %v7399_v42, 16 }
  0x98   : > { %v7419_v10 = vcombine.low %v2454_v3, %v2464_v12  ;;  %v669_v47 = vrot.slane %v668_v54, 4  ;;  %v678_v0 = vor.u32 %v677_v53, %v673_v33  ;;  %v2477_v11 = vrot.slane %v2475_v9, 5  ;;  %v6843_v9 = vld [vmem:[%s6965_s29] sm:$0xf] }
  0x99   : > { %v2472_v57 = vor.u32 %v2471_v24, %v2468_v5  ;;  %v2481_v8 = vrot.slane %v2479_v22, 4  ;;  %v2485_v44 = vshll.u32 %v7404_v40, 16  ;;  %v1078_v61 = vsel %vm784_vm0, %v7158_v60, 0  ;;  %v5731_v24 = vld [vmem:[%s6965_s29 + $0x18] sm:$0xe] }
  0x9a   : > { %9253 = vst [vmem:[#allocation20_spill] sm:$0xff] %v7419_v10  ;;  %v9254_v30 = vrot.slane %v6995_v55, 5  ;;  %6346 = vmatprep.mubr.msk.bf16.mxu0 %vm735_vm4, %v7419_v10  ;;  %v674_v12 = vsel %vm6983_vm3, %v669_v47, %v673_v33  ;;  %v679_v3 = vrot.slane %v678_v0, 4  ;;  %6215 = vmatpush3.bf16.msra.mxu1 %v1078_v61  ;;  %v7437_v5 = vld [vmem:[%s6965_s29 + $0x4] sm:$0xf]  ;;  %v5746_v47 = vrot.slane %v5730_v38, 9 }
  0x9b   : > { %v2473_v43 = vrot.slane %v2472_v57, 4  ;;  %v2482_v54 = vor.u32 %v2481_v8, %v2477_v11  ;;  %v2487_v53 = vrot.slane %v2485_v44, 5  ;;  %6778 = vmatprep.subr.msk.bf16.mxu1 %vm784_vm0, %v7413_v49  ;;  %v5487_v33 = vcombine.low %v6843_v9, %v7437_v5 }
  0x9c   : > { %v3023_v36 = vrot.slane %v9254_v30, 4  ;;  %v684_v60 = vsel %vm6983_vm3, %v679_v3, %v683_v62  ;;  %v9257_v44 = vrot.slane %v6972_v14, 5  ;;  %v5747_v61 = vrot.slane %v5731_v24, 9  ;;  %v5732_v30 = vld [vmem:[%s6965_s29 + $0x24] sm:$0xe] }
  0x9d   : > { %v5470_v57 = vcombine.low %v674_v12, %v684_v60  ;;  %v2478_v8 = vsel %vm6983_vm3, %v2473_v43, %v2477_v11  ;;  %v2483_v62 = vrot.slane %v2482_v54, 4  ;;  %v9259_v10 = vrot.slane %v6975_v15, 5  ;;  %v6845_v43 = vld [vmem:[%s6965_s29 + $0x28] sm:$0xf] }
  0x9e   : > { %v3016_v0 = vrot.slane %v9257_v44, 4  ;;  %v9258_v3 = vmov %v9257_v44  ;;  %v9260_v12 = vrot.slane %v7002_v59, 5  ;;  %v9261_v24 = vrot.slane %v6995_v55, 5  ;;  %v6847_v44 = vld [vmem:[%s6965_s29 + $0xc] sm:$0xf] }
  0x9f   : > { %v3015_v9 = vsel %vm7441_vm7, %v5746_v47, %v9258_v3  ;;  %6211 = vmatmul.mubr.msk.bf16.gmra.mrb[28].mxu1 %vm735_vm4, %v5470_v57  ;;  %v2488_v14 = vsel %vm6983_vm3, %v2483_v62, %v2487_v53  ;;  %v3028_v54 = vrot.slane %v6845_v43, 5  ;;  %v6846_v47 = vld [vmem:[%s6965_s29 + $0x2c] sm:$0x1]  ;;  %v5733_v57 = vld [vmem:[%s6965_s29 + $0x30] sm:$0xe] }
  0xa0   : > { %v3018_v38 = vsel %vm7441_vm7, %v3016_v0, %v9259_v10  ;;  %v3025_v60 = vsel %vm7441_vm7, %v3023_v36, %v9260_v12  ;;  %v3022_v15 = vsel %vm7441_vm7, %v5747_v61, %v9261_v24  ;;  %v7469_v10 = vcombine.low %v2478_v8, %v2488_v14  ;;  %6216 = vmatprep.mubr.msk.bf16.mxu1 %vm735_vm4, %v5487_v33  ;;  %v7479_v0 = vld [vmem:[%s6965_s29 + $0x10] sm:$0xf]  ;;  %v6849_v8 = vld [vmem:[%s6965_s29 + $0x34] sm:$0xf]  ;;  %v6850_v61 = vld [vmem:[%s6965_s29 + $0x18] sm:$0xf] }
  0xa1   : > { %v5763_v11 = vcombine.low %v3015_v9, %v3018_v38  ;;  %v5764_v59 = vcombine.low %v3022_v15, %v3025_v60  ;;  %v5748_v36 = vrot.slane %v5732_v30, 9  ;;  %v3031_v53 = vrot.slane %v6846_v47, 5  ;;  %v7486_v30 = vld [vmem:[%s6965_s29 + $0x1c] sm:$0xf]  ;;  %v6852_v60 = vld [vmem:[%s6965_s29 + $0x40] sm:$0xf] }
  0xa2   : > { %9262 = vst [vmem:[#allocation21_spill] sm:$0xff] %v7469_v10  ;;  %6347 = vmatmul.mubr.msk.bf16.gmra.mrb[28].mxu0 %vm735_vm4, %v7469_v10  ;;  %v3030_v55 = vrot.slane %v3028_v54, 4  ;;  %v5488_v33 = vcombine.low %v6847_v44, %v7479_v0  ;;  %v3035_v62 = vrot.slane %v6849_v8, 5  ;;  %v5489_v3 = vcombine.low %v6850_v61, %v7486_v30  ;;  %v5734_v12 = vld [vmem:[%s6965_s29 + $0x3c] sm:$0xe] }
  0xa3   : > { %6386 = vmatprep.mubr.msk.bf16.mxu0 %vm735_vm4, %v5763_v11  ;;  %v3029_v9 = vsel %vm7441_vm7, %v5748_v36, %v3028_v54  ;;  %v3042_v14 = vrot.slane %v6852_v60, 5  ;;  %v3582_v11 = vsel %vm784_vm0, %v7171_v35, 0  ;;  %v5749_v24 = vrot.slane %v5733_v57, 9  ;;  %v6853_v15 = vld [vmem:[%s6965_s29 + $0x38] sm:$0x1] }
  0xa4   : > { %v3032_v38 = vsel %vm7441_vm7, %v3030_v55, %v3031_v53  ;;  %v3038_v43 = vrot.slane %v6853_v15, 5  ;;  %v5735_v47 = vld [vmem:[%s6965_s29 + $0x48] sm:$0xe]  ;;  %v3037_v54 = vrot.slane %v3035_v62, 4  ;;  %v5750_v53 = vrot.slane %v5734_v12, 9 }
  0xa5   : > { %v5765_v36 = vcombine.low %v3029_v9, %v3032_v38  ;;  %v6854_v55 = vld [vmem:[%s6965_s29 + $0x4c] sm:$0xf]  ;;  %v3044_v8 = vrot.slane %v3042_v14, 4  ;;  %v6855_v61 = vld [vmem:[%s6965_s29 + $0x44] sm:$0x1]  ;;  %v3036_v12 = vsel %vm7441_vm7, %v5749_v24, %v3035_v62 }
  0xa6   : > { %v3049_v44 = vrot.slane %v6854_v55, 5  ;;  %v3045_v35 = vrot.slane %v6855_v61, 5  ;;  %v5736_v57 = vld [vmem:[%s6965_s29 + $0x54] sm:$0xe]  ;;  %v6856_v60 = vld [vmem:[%s6965_s29 + $0x58] sm:$0xf]  ;;  %v3039_v61 = vsel %vm7441_vm7, %v3037_v54, %v3038_v43 }
  0xa7   : > { %6217 = vmatmul.mubr.msk.bf16.vlgmr.msra.gmra.mrb[0].mxu1 %vm735_vm4, %v5488_v33  ;;  %v3056_v15 = vrot.slane %v6856_v60, 5  ;;  %v7508_v33 = vld [vmem:[%s9191_s1 + $0x1c] sm:$0xf]  ;;  %v6857_v9 = vld [vmem:[%s6965_s29 + $0x24] sm:$0xf]  ;;  %v5751_v60 = vrot.slane %v5735_v47, 9  ;;  %v5766_v29 = vcombine.low %v3036_v12, %v3039_v61 }
  0xa8   : > { %6220 = vmatprep.mubr.msk.bf16.mxu1 %vm735_vm4, %v5489_v3  ;;  %v7513_v38 = vld [vmem:[%s6965_s29 + $0x28] sm:$0xf]  ;;  %v5737_v55 = vld [vmem:[%s6965_s29 + $0x60] sm:$0xe]  ;;  %v6859_v10 = vld [vmem:[%s6965_s29 + $0x50] sm:$0x1]  ;;  %v3046_v24 = vsel %vm7441_vm7, %v3044_v8, %v3045_v35 }
  0xa9   : > { %v5490_v3 = vcombine.low %v6857_v9, %v7513_v38  ;;  %v3052_v51 = vrot.slane %v6859_v10, 5  ;;  %v7525_v9 = vld [vmem:[%s6965_s29 + $0x34] sm:$0xf]  ;;  %v3058_v43 = vrot.slane %v3056_v15, 4  ;;  %v6862_v10 = vld [vmem:[%s6965_s29 + $0x5c] sm:$0x1] }
  0xaa   : > { %6387 = vmatmul.mubr.msk.bf16.vlgmr.msra.gmra.mrb[0].mxu0 %vm735_vm4, %v5764_v59  ;;  %v3051_v59 = vrot.slane %v3049_v44, 4  ;;  %v5491_v62 = vcombine.low %v6860_v1, %v7525_v9  ;;  %v3059_v47 = vrot.slane %v6862_v10, 5  ;;  %v5741_v54 = vld [vmem:[%s6965_s29 + $0x90] sm:$0xe]  ;;  %v6863_v1 = vld [vmem:[%s6965_s29 + $0x3c] sm:$0xf] }
  0xab   : > { %6419 = vmatpush3.bf16.msra.mxu0 %v3582_v11  ;;  %6390 = vmatprep.mubr.msk.bf16.mxu0 %vm735_vm4, %v5765_v36  ;;  %v3043_v11 = vsel %vm7441_vm7, %v5750_v53, %v3042_v14  ;;  %v5752_v36 = vrot.slane %v5736_v57, 9  ;;  %v5492_v14 = vcombine.low %v6863_v1, %v7538_v6  ;;  %v5753_v53 = vrot.slane %v5737_v55, 9  ;;  %v7542_v8 = vld [vmem:[%s6965_s29 + $0x6c] sm:$0xe]  ;;  %v6865_v61 = vld [vmem:[%s6965_s29 + $0x64] sm:$0xf] }
  0xac   : > { %6784 = vmatprep.subr.msk.bf16.mxu0 %vm784_vm0, %v7508_v33  ;;  %v5767_v35 = vcombine.low %v3043_v11, %v3046_v24  ;;  %v3050_v57 = vsel %vm7441_vm7, %v5751_v60, %v3049_v44  ;;  %v3053_v12 = vsel %vm7441_vm7, %v3051_v59, %v3052_v51  ;;  %v3063_v10 = vrot.slane %v6865_v61, 5  ;;  %v6866_v1 = vld [vmem:[%s6965_s29 + $0x48] sm:$0xf]  ;;  %v7554_v55 = vld [vmem:[%s6965_s29 + $0x4c] sm:$0xf] }
  0xad   : > { %9263 = vst [vmem:[#allocation22_spill] sm:$0xff] %v7554_v55  ;;  %v5493_v13 = vcombine.low %v6866_v1, %v7554_v55  ;;  %v7560_v11 = vld [vmem:[%s6965_s29 + $0x54] sm:$0xf]  ;;  %v7563_v44 = vld [vmem:[%s6965_s29 + $0x58] sm:$0xf]  ;;  %v5757_v60 = vrot.slane %v5741_v54, 9  ;;  %v3060_v59 = vsel %vm7441_vm7, %v3058_v43, %v3059_v47  ;;  %v5768_v1 = vcombine.low %v3050_v57, %v3053_v12 }
  0xae   : > { %v7571_v61 = vld [vmem:[%s6965_s29 + $0x60] sm:$0xf]  ;;  %v7579_v51 = vsel %vm7441_vm7, %v5753_v53, %v3063_v10  ;;  %v3091_v54 = vrot.slane %v7249_v58, 5  ;;  %v3094_v43 = vrot.slane %v7259_v21, 5  ;;  %v5743_v47 = vld [vmem:[%s6965_s29 + $0xa8] sm:$0xe] }
  0xaf   : > { %6221 = vmatmul.mubr.msk.bf16.gmra.mrb[4].mxu1 %vm735_vm4, %v5490_v3  ;;  %v3057_v3 = vsel %vm7441_vm7, %v5752_v36, %v3056_v15  ;;  %v5754_v36 = vrot.slane %v7542_v8, 9  ;;  %v5758_v55 = vrot.slane %v5742_v31, 9  ;;  %v3098_v15 = vrot.slane %v7287_v19, 5 }
  0xb0   : > { %6224 = vmatprep.mubr.msk.bf16.mxu1 %vm735_vm4, %v5491_v62  ;;  %v6870_v62 = vld [vmem:[%s6965_s29 + $0x68] sm:$0x1]  ;;  %v3101_v8 = vrot.slane %v7293_v45, 5  ;;  %v5769_v57 = vcombine.low %v3057_v3, %v3060_v59  ;;  %v3070_v12 = vrot.slane %v7148_v16, 5  ;;  %v7591_v53 = vsel %vm7441_vm7, %v5757_v60, %v3091_v54  ;;  %v5745_v60 = vld [vmem:[%s6965_s29 + $0xc0] sm:$0xe] }
  0xb1   : > { %v3066_v24 = vrot.slane %v6870_v62, 5  ;;  %v3065_v62 = vrot.slane %v3063_v10, 4  ;;  %v3093_v58 = vrot.slane %v3091_v54, 4  ;;  %v7595_v21 = vsel %vm7441_vm7, %v5758_v55, %v3098_v15 }
  0xb2   : > { %6391 = vmatmul.mubr.msk.bf16.gmra.mrb[4].mxu0 %vm735_vm4, %v5766_v29  ;;  %v5744_v29 = vld [vmem:[%s6965_s29 + $0xb4] sm:$0xe]  ;;  %v5759_v31 = vrot.slane %v5743_v47, 9  ;;  %v3105_v10 = vrot.slane %v7326_v18, 5  ;;  %v3073_v19 = vrot.slane %v7153_v23, 5  ;;  %v3108_v16 = vrot.slane %v7329_v20, 5 }
  0xb3   : > { %6394 = vmatprep.mubr.msk.bf16.mxu0 %vm735_vm4, %v5767_v35  ;;  %v3100_v35 = vrot.slane %v3098_v15, 4  ;;  %v7601_v45 = vsel %vm7441_vm7, %v3093_v58, %v3094_v43  ;;  %v5760_v3 = vrot.slane %v5744_v29, 9  ;;  %v3072_v15 = vrot.slane %v3070_v12, 4 }
  0xb4   : > { %v5774_v55 = vcombine.low %v7591_v53, %v7601_v45  ;;  %v7614_v23 = vsel %vm7441_vm7, %v5759_v31, %v3105_v10  ;;  %v3107_v18 = vrot.slane %v3105_v10, 4  ;;  %v3115_v54 = vrot.slane %v7366_v48, 5  ;;  %v1242_v45 = vld [vmem:[%s6965_s29 + $0xc] sm:$0xe] }
  0xb5   : > { %v7610_v59 = vsel %vm7441_vm7, %v3100_v35, %v3101_v8  ;;  %v5761_v47 = vrot.slane %v5745_v60, 9  ;;  %v3119_v8 = vrot.slane %v7399_v42, 5  ;;  %v3122_v29 = vrot.slane %v7404_v40, 5 }
  0xb6   : > { %v5775_v20 = vcombine.low %v7595_v21, %v7610_v59  ;;  %v7623_v43 = vsel %vm7441_vm7, %v3107_v18, %v3108_v16  ;;  %v1503_v42 = vsel %vm784_vm0, %v7413_v49, 0  ;;  %v3067_v40 = vsel %vm7441_vm7, %v3065_v62, %v3066_v24  ;;  %v5739_v49 = vld [vmem:[%s6965_s29 + $0x78] sm:$0xe] }
  0xb7   : > { %6225 = vmatmul.mubr.msk.bf16.gmra.mrb[8].mxu1 %vm735_vm4, %v5492_v14  ;;  %v3112_v14 = vrot.slane %v7363_v2, 5  ;;  %v5776_v2 = vcombine.low %v7614_v23, %v7623_v43  ;;  %v3077_v21 = vrot.slane %v7188_v7, 5  ;;  %v3121_v35 = vrot.slane %v3119_v8, 4  ;;  %v5740_v7 = vld [vmem:[%s6965_s29 + $0x84] sm:$0xe] }
  0xb8   : > { %6228 = vmatprep.mubr.msk.bf16.mxu1 %vm735_vm4, %v5493_v13  ;;  %v7630_v13 = vld [vmem:[%s9191_s1 + $0xc] sm:$0xf]  ;;  %6249 = vmatpush3.bf16.msra.mxu1 %v1503_v42  ;;  %v3071_v31 = vsel %vm7441_vm7, %v5754_v36, %v3070_v12  ;;  %v3074_v10 = vsel %vm7441_vm7, %v3072_v15, %v3073_v19  ;;  %v5770_v12 = vcombine.low %v7579_v51, %v3067_v40  ;;  %v3080_v59 = vrot.slane %v7196_v25, 5  ;;  %v1241_v40 = vld [vmem:[%s6965_s29] sm:$0xe] }
  0xb9   : > { %v7637_v48 = vsel %vm7441_vm7, %v5760_v3, %v3112_v14  ;;  %v3114_v58 = vrot.slane %v3112_v14, 4  ;;  %6779 = vmatprep.subr.msk.bf16.mxu1 %vm784_vm0, %v7630_v13  ;;  %v7666_v36 = vsel %vm7441_vm7, %v3121_v35, %v3122_v29  ;;  %v9264_v19 = vcombine.low %v7560_v11, %v7563_v44  ;;  %v6872_v11 = vld [vmem:[%s6965_s29 + $0x6c] sm:$0xf]  ;;  %v1243_v35 = vld [vmem:[%s6965_s29 + $0x18] sm:$0xe] }
  0xba   : > { %6395 = vmatmul.mubr.msk.bf16.gmra.mrb[8].mxu0 %vm735_vm4, %v5768_v1  ;;  %v7647_v1 = vsel %vm7441_vm7, %v5761_v47, %v3119_v8  ;;  %v5771_v16 = vcombine.low %v3071_v31, %v3074_v10  ;;  %v5755_v3 = vrot.slane %v5739_v49, 9  ;;  %v3079_v60 = vrot.slane %v3077_v21, 4  ;;  %v1244_v31 = vld [vmem:[%s6965_s29 + $0x24] sm:$0xe]  ;;  %v6877_v43 = vld [vmem:[%s6965_s29 + $0x2c] sm:$0x1] }
  0xbb   : > { %6398 = vmatprep.mubr.msk.bf16.mxu0 %vm735_vm4, %v5769_v57  ;;  %v3084_v57 = vrot.slane %v7222_v63, 5  ;;  %v7657_v24 = vsel %vm7441_vm7, %v3114_v58, %v3115_v54  ;;  %v5778_v63 = vcombine.low %v7647_v1, %v7666_v36  ;;  %v9265_v18 = vcombine.low %v7571_v61, %v7133_v46  ;;  %v7685_v54 = vld [vmem:[%s6965_s29 + $0x70] sm:$0xf]  ;;  %v6882_v1 = vld [vmem:[%s6965_s29 + $0x5c] sm:$0x1] }
  0xbc   : > { %v5777_v62 = vcombine.low %v7637_v48, %v7657_v24  ;;  %v5756_v15 = vrot.slane %v5740_v7, 9  ;;  %v3087_v14 = vrot.slane %v7225_v4, 5  ;;  %v5496_v47 = vcombine.low %v6872_v11, %v7685_v54  ;;  %v6876_v7 = vld [vmem:[%s6965_s29 + $0x20] sm:$0x1] }
  0xbd   : > { %v3086_v51 = vrot.slane %v3084_v57, 4  ;;  %v3078_v25 = vsel %vm7441_vm7, %v5755_v3, %v3077_v21  ;;  %v3081_v46 = vsel %vm7441_vm7, %v3079_v60, %v3080_v59  ;;  %v5497_v61 = vcombine.low %v7200_v28, %v7205_v34 }
  0xbe   : > { %v3085_v4 = vsel %vm7441_vm7, %v5756_v15, %v3084_v57  ;;  %v5772_v29 = vcombine.low %v3078_v25, %v3081_v46  ;;  %v5498_v28 = vcombine.low %v7228_v17, %v7234_v27  ;;  %v5499_v34 = vcombine.low %v7262_v26, %v7269_v39  ;;  %v6874_v39 = vld [vmem:[%s6965_s29 + $0x8] sm:$0x1] }
  0xbf   : > { %6229 = vmatmul.mubr.msk.bf16.gmra.mrb[12].mxu1 %vm735_vm4, %v9264_v19  ;;  %v3088_v8 = vsel %vm7441_vm7, %v3086_v51, %v3087_v14  ;;  %v1294_v42 = vrot.slane %v7437_v5, 5  ;;  %v5500_v17 = vcombine.low %v7298_v50, %v7301_v41  ;;  %v1301_v27 = vrot.slane %v7479_v0, 5  ;;  %v6875_v41 = vld [vmem:[%s6965_s29 + $0x14] sm:$0x1]  ;;  %v6878_v51 = vld [vmem:[%s6965_s29 + $0x38] sm:$0x1] }
  0xc0   : > { %6232 = vmatprep.mubr.msk.bf16.mxu1 %vm735_vm4, %v9265_v18  ;;  %v5773_v58 = vcombine.low %v3085_v4, %v3088_v8  ;;  %v5501_v26 = vcombine.low %v7332_v32, %v7336_v52  ;;  %v1297_v5 = vrot.slane %v6874_v39, 5  ;;  %v5519_v21 = vrot.slane %v1241_v40, 9  ;;  %v9266_v4 = vld [vmem:[#allocation22_spill] sm:$0xff] }
  0xc1   : > { %v1296_v53 = vrot.slane %v1294_v42, 4  ;;  %v1315_v50 = vrot.slane %v7513_v38, 5  ;;  %v1304_v0 = vrot.slane %v6875_v41, 5  ;;  %v1303_v32 = vrot.slane %v1301_v27, 4 }
  0xc2   : > { %6399 = vmatmul.mubr.msk.bf16.gmra.mrb[12].mxu0 %vm735_vm4, %v5770_v12  ;;  %v1295_v10 = vsel %vm7441_vm7, %v5519_v21, %v1294_v42  ;;  %v5521_v57 = vrot.slane %v1243_v35, 9  ;;  %v1311_v12 = vrot.slane %v6876_v7, 5  ;;  %v1322_v19 = vrot.slane %v7525_v9, 5  ;;  %v6879_v42 = vld [vmem:[%s6965_s29 + $0x64] sm:$0xf] }
  0xc3   : > { %6402 = vmatprep.mubr.msk.bf16.mxu0 %vm735_vm4, %v5771_v16  ;;  %v1298_v49 = vsel %vm7441_vm7, %v1296_v53, %v1297_v5  ;;  %v5502_v16 = vcombine.low %v7370_v56, %v7376_v37  ;;  %v5522_v3 = vrot.slane %v1244_v31, 9  ;;  %v1317_v23 = vrot.slane %v1315_v50, 4  ;;  %v1250_v5 = vld [vmem:[%s6965_s29 + $0x6c] sm:$0xe]  ;;  %v6881_v35 = vld [vmem:[%s6965_s29 + $0x50] sm:$0x1] }
  0xc4   : > { %v5536_v60 = vcombine.low %v1295_v10, %v1298_v49  ;;  %v7753_v9 = vsel %vm7441_vm7, %v1303_v32, %v1304_v0  ;;  %v7757_v56 = vsel %vm784_vm0, %v7508_v33, 0  ;;  %v1324_v15 = vrot.slane %v1322_v19, 4  ;;  %v6811_v33 = vld [vmem:[%s6965_s29 + $0x18] sm:$0xff]   ;;  %v6884_v49 = vld [vmem:[%s6965_s29 + $0x74] sm:$0x1] }
  0xc5   : > { %v1325_v14 = vrot.slane %v6878_v51, 5  ;;  %v1329_v11 = vrot.slane %v7538_v6, 5  ;;  %v7777_v46 = vsel %vm7441_vm7, %v5522_v3, %v1315_v50  ;;  %v1336_v8 = vrot.slane %v9266_v4, 5  ;;  %v1248_v6 = vld [vmem:[%s6965_s29 + $0x54] sm:$0xe] }
  0xc6   : > { %v1350_v40 = vrot.slane %v6879_v42, 5  ;;  %v1357_v21 = vrot.slane %v7685_v54, 5  ;;  %v5526_v50 = vrot.slane %v1248_v6, 9  ;;  %v1346_v36 = vrot.slane %v6882_v1, 5  ;;  %v5864_v1 = vld [vmem:[%s6965_s29 + $0x28] sm:$0xf] }
  0xc7   : > { %6233 = vmatmul.mubr.msk.bf16.gmra.mrb[16].mxu1 %vm735_vm4, %v5496_v47  ;;  %v1247_v47 = vld [vmem:[%s6965_s29 + $0x48] sm:$0xe]  ;;  %v7806_v53 = vsel %vm7441_vm7, %v1324_v15, %v1325_v14  ;;  %v1338_v54 = vrot.slane %v1336_v8, 4  ;;  %v5528_v31 = vrot.slane %v1250_v5, 9 }
  0xc8   : > { %6236 = vmatprep.mubr.msk.bf16.mxu1 %vm735_vm4, %v5497_v61  ;;  %v5525_v39 = vrot.slane %v1247_v47, 9  ;;  %v1352_v0 = vrot.slane %v1350_v40, 4  ;;  %v1359_v10 = vrot.slane %v1357_v21, 4 }
  0xc9   : > { %v7864_v51 = vsel %vm7441_vm7, %v5528_v31, %v1357_v21  ;;  %v5861_v21 = vld [vmem:[%s6965_s29 + $0x1c] sm:$0xf]  ;;  %v6815_v31 = vld [vmem:[%s6965_s29 + $0x48] sm:$0xff]  }
  0xca   : > { %6403 = vmatmul.mubr.msk.bf16.gmra.mrb[16].mxu0 %vm735_vm4, %v5772_v29 }
  0xcb   : > { %6406 = vmatprep.mubr.msk.bf16.mxu0 %vm735_vm4, %v5773_v58 }
  0xcf   : > { %6237 = vmatmul.mubr.msk.bf16.gmra.mrb[20].mxu1 %vm735_vm4, %v5498_v28  ;;  %v1343_v28 = vrot.slane %v7563_v44, 5 }
  0xd0   : > { %6240 = vmatprep.mubr.msk.bf16.mxu1 %vm735_vm4, %v5499_v34  ;;  %v1249_v34 = vld [vmem:[%s6965_s29 + $0x60] sm:$0xe] }
  0xd1   : > { %v1345_v41 = vrot.slane %v1343_v28, 4 }
  0xd2   : > { %6407 = vmatmul.mubr.msk.bf16.gmra.mrb[20].mxu0 %vm735_vm4, %v5774_v55  ;;  %v1308_v55 = vrot.slane %v7486_v30, 5  ;;  %v1245_v30 = vld [vmem:[%s6965_s29 + $0x30] sm:$0xe] }
  0xd3   : > { %6410 = vmatprep.mubr.msk.bf16.mxu0 %vm735_vm4, %v5775_v20  ;;  %v5520_v20 = vrot.slane %v1242_v45, 9  ;;  %v5523_v48 = vrot.slane %v1245_v30, 9  ;;  %v1331_v45 = vrot.slane %v1329_v11, 4  ;;  %v1251_v30 = vld [vmem:[%s6965_s29 + $0x78] sm:$0xe] }
  0xd4   : > { %v1310_v38 = vrot.slane %v1308_v55, 4  ;;  %v7761_v24 = vsel %vm7441_vm7, %v5521_v57, %v1308_v55  ;;  %v1339_v55 = vrot.slane %v6881_v35, 5  ;;  %v1360_v57 = vrot.slane %v6884_v49, 5 }
  0xd5   : > { %v7749_v59 = vsel %vm7441_vm7, %v5520_v20, %v1301_v27  ;;  %v7788_v29 = vsel %vm7441_vm7, %v5523_v48, %v1322_v19  ;;  %v6880_v27 = vld [vmem:[%s6965_s29 + $0x44] sm:$0x1]  ;;  %v6883_v20 = vld [vmem:[%s6965_s29 + $0x68] sm:$0x1]  ;;  %v7846_v48 = vsel %vm7441_vm7, %v5526_v50, %v1343_v28  ;;  %v5529_v14 = vrot.slane %v1251_v30, 9 }
  0xd6   : > { %v7766_v18 = vsel %vm7441_vm7, %v1310_v38, %v1311_v12  ;;  %v5537_v25 = vcombine.low %v7749_v59, %v7753_v9  ;;  %v1353_v32 = vrot.slane %v6883_v20, 5  ;;  %v6885_v38 = vld [vmem:[%s6965_s29 + $0x7c] sm:$0xf]  ;;  %v1862_v12 = vsel %vm784_vm0, %v7630_v13, 0  ;;  %v6812_v19 = vld [vmem:[%s6965_s29 + $0x24] sm:$0xff]   ;;  %v6813_v13 = vld [vmem:[%s6965_s29 + $0x30] sm:$0xff]  }
  0xd7   : > { %6241 = vmatmul.mubr.msk.bf16.gmra.mrb[24].mxu1 %vm735_vm4, %v5500_v17  ;;  %v5538_v17 = vcombine.low %v7761_v24, %v7766_v18  ;;  %v1364_v7 = vrot.slane %v6885_v38, 5  ;;  %v7838_v59 = vsel %vm7441_vm7, %v5525_v39, %v1336_v8  ;;  %v7842_v9 = vsel %vm7441_vm7, %v1338_v54, %v1339_v55  ;;  %v6888_v8 = vld [vmem:[%s6965_s29 + $0x94] sm:$0xf]  ;;  %v6890_v55 = vld [vmem:[%s6965_s29 + $0x98] sm:$0x1] }
  0xd8   : > { %6244 = vmatprep.mubr.msk.bf16.mxu1 %vm735_vm4, %v5501_v26  ;;  %v1332_v26 = vrot.slane %v6880_v27, 5  ;;  %v7856_v18 = vsel %vm7441_vm7, %v1345_v41, %v1346_v36  ;;  %v7860_v15 = vsel %vm7441_vm7, %v1352_v0, %v1353_v32  ;;  %v7869_v47 = vsel %vm7441_vm7, %v1359_v10, %v1360_v57  ;;  %v5860_v27 = vld [vmem:[%s6965_s29 + $0x18] sm:$0xf]  ;;  %v5863_v50 = vld [vmem:[%s6965_s29 + $0x24] sm:$0xf]  ;;  %v6814_v32 = vld [vmem:[%s6965_s29 + $0x3c] sm:$0xff]  }
  0xd9   : > { %v1378_v6 = vrot.slane %v6888_v8, 5  ;;  %v5543_v39 = vcombine.low %v7846_v48, %v7856_v18  ;;  %v1381_v54 = vrot.slane %v6890_v55, 5  ;;  %v1254_v41 = vld [vmem:[%s6965_s29 + $0x9c] sm:$0xe]  ;;  %v3826_v0 = vshrl.u32 %v5860_v27, 16 }
  0xda   : > { %6411 = vmatmul.mubr.msk.bf16.gmra.mrb[24].mxu0 %vm735_vm4, %v5776_v2  ;;  %v1318_v2 = vrot.slane %v6877_v43, 5  ;;  %v6886_v43 = vld [vmem:[%s6965_s29 + $0x88] sm:$0xf]  ;;  %v3829_v20 = vshll.u32 %v5860_v27, 16  ;;  %v3835_v57 = vshll.u32 %v5861_v21, 16  ;;  %v3839_v30 = vshrl.u32 %v5861_v21, 16 }
  0xdb   : > { %6414 = vmatprep.mubr.msk.bf16.mxu0 %vm735_vm4, %v5777_v62  ;;  %v1246_v62 = vld [vmem:[%s6965_s29 + $0x3c] sm:$0xe]  ;;  %v7925_v38 = vld [vmem:[%s6965_s29 + $0xa8] sm:$0xe]  ;;  %v5866_v27 = vld [vmem:[%s6965_s29 + $0x30] sm:$0xf] }
  0xdc   : > { %v7781_v61 = vsel %vm7441_vm7, %v1317_v23, %v1318_v2  ;;  %v5524_v58 = vrot.slane %v1246_v62, 9  ;;  %v7826_v23 = vsel %vm7441_vm7, %v1331_v45, %v1332_v26  ;;  %v1371_v2 = vrot.slane %v6886_v43, 5  ;;  %v1252_v62 = vld [vmem:[%s6965_s29 + $0x84] sm:$0xe] }
  0xdd   : > { %v5539_v44 = vcombine.low %v7777_v46, %v7781_v61  ;;  %v5542_v26 = vcombine.low %v7838_v59, %v7842_v9  ;;  %v5545_v45 = vcombine.low %v7864_v51, %v7869_v47  ;;  %v3863_v43 = vshrl.u32 %v5864_v1, 16  ;;  %v5884_v51 = vld [vmem:[%s6965_s29 + $0x78] sm:$0xf] }
  0xde   : > { %v7822_v3 = vsel %vm7441_vm7, %v5524_v58, %v1329_v11  ;;  %v1253_v11 = vld [vmem:[%s6965_s29 + $0x90] sm:$0xe]  ;;  %v7876_v58 = vld [vmem:[%s9191_s1 + $0x20] sm:$0xf]  ;;  %v1373_v42 = vrot.slane %v1371_v2, 4  ;;  %v5532_v61 = vrot.slane %v1254_v41, 9 }
  0xdf   : > { %6245 = vmatmul.mubr.msk.bf16.gmra.mrb[28].mxu1 %vm735_vm4, %v5502_v16  ;;  %v5540_v16 = vcombine.low %v7788_v29, %v7806_v53  ;;  %v5541_v28 = vcombine.low %v7822_v3, %v7826_v23  ;;  %v5531_v35 = vrot.slane %v1253_v11, 9  ;;  %v5862_v53 = vld [vmem:[%s6965_s29 + $0x20] sm:$0x1]  ;;  %v3831_v11 = vrot.slane %v3829_v20, 5 }
  0xe0   : > { %6250 = vmatprep.mubr.msk.bf16.mxu1 %vm735_vm4, %v5536_v60  ;;  %v7832_v60 = vld [vmem:[%s9192_s2] sm:$0xf]  ;;  %v3841_v8 = vrot.slane %v3839_v30, 4 }
  0xe1   : > { %v7935_v46 = vsel %vm7441_vm7, %v5531_v35, %v1378_v6 }
  0xe2   : > { %6415 = vmatmul.mubr.msk.bf16.gmra.mrb[28].mxu0 %vm735_vm4, %v5778_v63  ;;  %v5527_v63 = vrot.slane %v1249_v34, 9  ;;  %v5530_v34 = vrot.slane %v1252_v62, 9 }
  0xe3   : > { %6420 = vmatprep.mubr.msk.bf16.mxu0 %vm735_vm4, %v6811_v33  ;;  %v1366_v33 = vrot.slane %v1364_v7, 4 }
  0xe4   : > { %v7850_v24 = vsel %vm7441_vm7, %v5527_v63, %v1350_v40  ;;  %v6889_v40 = vld [vmem:[%s6965_s29 + $0x8c] sm:$0x1]  ;;  %v1380_v63 = vrot.slane %v1378_v6, 4  ;;  %v7914_v10 = vsel %vm7441_vm7, %v5530_v34, %v1371_v2 }
  0xe5   : > { %v5544_v5 = vcombine.low %v7850_v24, %v7860_v15  ;;  %v5865_v6 = vld [vmem:[%s6965_s29 + $0x2c] sm:$0x1] }
  0xe6   : > { %v7940_v62 = vsel %vm7441_vm7, %v1380_v63, %v1381_v54  ;;  %v1392_v54 = vrot.slane %v7336_v52, 5  ;;  %v9268_v63 = vld [vmem:[#allocation17_spill] sm:$0xff]  ;;  %v6817_v52 = vld [vmem:[%s6965_s29 + $0x60] sm:$0xff]  }
  0xe7   : > { %6251 = vmatmul.mubr.msk.bf16.vlgmr.msra.gmra.mrb[0].mxu1 %vm735_vm4, %v5537_v25  ;;  %v6887_v25 = vld [vmem:[%s6965_s29 + $0x80] sm:$0x1]  ;;  %v1395_v41 = vrot.slane %v9268_v63, 5  ;;  %v7992_v63 = vld [vmem:[%s6965_s29 + $0x38] sm:$0x1] }
  0xe8   : > { %6254 = vmatprep.mubr.msk.bf16.mxu1 %vm735_vm4, %v5538_v17  ;;  %6283 = vmatpush3.bf16.msra.mxu1 %v1862_v12  ;;  %v1367_v4 = vrot.slane %v6887_v25, 5  ;;  %v1374_v17 = vrot.slane %v6889_v40, 5  ;;  %v3853_v12 = vshll.u32 %v5863_v50, 16  ;;  %v5533_v25 = vrot.slane %v7925_v38, 9 }
  0xe9   : > { %6781 = vmatprep.subr.msk.bf16.mxu1 %vm784_vm0, %v7832_v60  ;;  %v3869_v38 = vshll.u32 %v5865_v6, 16 }
  0xea   : > { %6421 = vmatmul.mubr.msk.bf16.vlgmr.msra.gmra.mrb[0].mxu0 %vm735_vm4, %v6812_v19  ;;  %v7907_v36 = vsel %vm7441_vm7, %v1366_v33, %v1367_v4  ;;  %v7918_v49 = vsel %vm7441_vm7, %v1373_v42, %v1374_v17  ;;  %v3859_v19 = vshll.u32 %v5864_v1, 16  ;;  %v7948_v4 = vrot.slane %v3835_v57, 5  ;;  %v7964_v1 = vld [vmem:[%s6965_s29 + $0x34] sm:$0xf] }
  0xeb   : > { %6453 = vmatpush3.bf16.msra.mxu0 %v7757_v56  ;;  %6424 = vmatprep.mubr.msk.bf16.mxu0 %vm735_vm4, %v6813_v13  ;;  %v7898_v56 = vsel %vm7441_vm7, %v5529_v14, %v1364_v7  ;;  %v3850_v7 = vshrl.u32 %v5863_v50, 16  ;;  %v9267_v14 = vld [vmem:[#allocation15_spill] sm:$0xff]  ;;  %v5547_v33 = vcombine.low %v7914_v10, %v7918_v49  ;;  %v3855_v42 = vrot.slane %v3853_v12, 5  ;;  %v1256_v50 = vld [vmem:[%s6965_s29 + $0xb4] sm:$0xe] }
  0xec   : > { %6785 = vmatprep.subr.msk.bf16.mxu0 %vm784_vm0, %v7876_v58  ;;  %v5546_v2 = vcombine.low %v7898_v56, %v7907_v36  ;;  %v1388_v29 = vrot.slane %v9267_v14, 5  ;;  %v7952_v40 = vrot.slane %v3859_v19, 5  ;;  %v3865_v17 = vrot.slane %v3863_v43, 4  ;;  %v6816_v57 = vld [vmem:[%s6965_s29 + $0x54] sm:$0xff]   ;;  %v9269_v43 = vld [vmem:[#allocation18_spill] sm:$0xff] }
  0xed   : > { %v3852_v34 = vrot.slane %v3850_v7, 4  ;;  %v3842_v30 = vor.u32 %v3841_v8, %v7948_v4  ;;  %v3874_v7 = vshrl.u32 %v5866_v27, 16  ;;  %v3877_v12 = vshll.u32 %v5866_v27, 16  ;;  %v8142_v56 = vld [vmem:[%s6965_s29 + $0x7c] sm:$0xf] }
  0xee   : > { %v5534_v19 = vrot.slane %v1256_v50, 9  ;;  %9275 = vst [vmem:[#allocation2_spill] sm:$0xff] %v8142_v56  ;;  %v4027_v21 = vshll.u32 %v8142_v56, 16 }
  0xef   : > { %6255 = vmatmul.mubr.msk.bf16.gmra.mrb[4].mxu1 %vm735_vm4, %v5539_v44  ;;  %v6891_v44 = vld [vmem:[%s6965_s29 + $0xa0] sm:$0xf]  ;;  %v3876_v59 = vrot.slane %v3874_v7, 4  ;;  %v3879_v9 = vrot.slane %v3877_v12, 5 }
  0xf0   : > { %6258 = vmatprep.mubr.msk.bf16.mxu1 %vm735_vm4, %v5540_v16  ;;  %v1385_v13 = vrot.slane %v6891_v44, 5  ;;  %v3828_v16 = vrot.slane %v3826_v0, 4  ;;  %v1399_v0 = vrot.slane %v7376_v37, 5  ;;  %v3856_v37 = vor.u32 %v3855_v42, %v3852_v34 }
  0xf1   : > { %v3866_v44 = vor.u32 %v3865_v17, %v7952_v40  ;;  %v3843_v34 = vrot.slane %v3842_v30, 4  ;;  %v3871_v42 = vrot.slane %v3869_v38, 5  ;;  %v8004_v38 = vsel %vm7441_vm7, %v5533_v25, %v1392_v54 }
  0xf2   : > { %6425 = vmatmul.mubr.msk.bf16.gmra.mrb[4].mxu0 %vm735_vm4, %v6814_v32  ;;  %v7959_v35 = vsel %vm7441_vm7, %v5532_v61, %v1385_v13  ;;  %v1387_v55 = vrot.slane %v1385_v13, 4  ;;  %v3832_v20 = vor.u32 %v3831_v11, %v3828_v16  ;;  %v3845_v32 = vshll.u32 %v5862_v53, 16  ;;  %v7985_v16 = vld [vmem:[%s6965_s29 + $0x40] sm:$0xf] }
  0xf3   : > { %6428 = vmatprep.mubr.msk.bf16.mxu0 %vm735_vm4, %v6815_v31  ;;  %v5869_v31 = vld [vmem:[%s6965_s29 + $0x3c] sm:$0xf]  ;;  %v1402_v61 = vrot.slane %v9269_v43, 5  ;;  %v3883_v13 = vshll.u32 %v7964_v1, 16  ;;  %v3887_v53 = vshrl.u32 %v7964_v1, 16  ;;  %v1401_v11 = vrot.slane %v1399_v0, 4 }
  0xf4   : > { %v3898_v3 = vshrl.u32 %v5869_v31, 16  ;;  %v3901_v23 = vshll.u32 %v5869_v31, 16  ;;  %v3833_v8 = vrot.slane %v3832_v20, 4  ;;  %v3847_v6 = vrot.slane %v3845_v32, 5  ;;  %v6818_v43 = vld [vmem:[%s6965_s29 + $0x6c] sm:$0xff]  }
  0xf5   : > { %v3867_v17 = vrot.slane %v3866_v44, 4  ;;  %v3907_v27 = vshll.u32 %v7985_v16, 16  ;;  %v3911_v50 = vshrl.u32 %v7985_v16, 16  ;;  %v7994_v20 = vrot.slane %v3883_v13, 5  ;;  %v6822_v13 = vld [vmem:[%s6965_s29 + $0x9c] sm:$0xff]  }
  0xf6   : > { %v3889_v32 = vrot.slane %v3887_v53, 4  ;;  %v3900_v31 = vrot.slane %v3898_v3, 4  ;;  %v8000_v30 = vsel %vm7441_vm7, %v1387_v55, %v1388_v29  ;;  %v8012_v12 = vsel %vm7441_vm7, %v5534_v19, %v1399_v0  ;;  %v6819_v0 = vld [vmem:[%s6965_s29 + $0x78] sm:$0xff]  }
  0xf7   : > { %6259 = vmatmul.mubr.msk.bf16.gmra.mrb[8].mxu1 %vm735_vm4, %v5541_v28  ;;  %v1394_v28 = vrot.slane %v1392_v54, 4  ;;  %v8018_v14 = vsel %vm7441_vm7, %v1401_v11, %v1402_v61  ;;  %v3838_v25 = vsel %vm6983_vm3, %v3833_v8, %v7948_v4  ;;  %v3848_v55 = vsel %vm6983_vm3, %v3843_v34, %v3847_v6  ;;  %v8065_v11 = vld [vmem:[%s6965_s29 + $0x50] sm:$0x1] }
  0xf8   : > { %6262 = vmatprep.mubr.msk.bf16.mxu1 %vm735_vm4, %v5542_v26  ;;  %v3857_v26 = vrot.slane %v3856_v37, 4  ;;  %v3880_v54 = vor.u32 %v3879_v9, %v3876_v59  ;;  %v3893_v61 = vshll.u32 %v7992_v63, 16  ;;  %v8037_v37 = vrot.slane %v3907_v27, 5  ;;  %v5875_v59 = vld [vmem:[%s6965_s29 + $0x54] sm:$0xf] }
  0xf9   : > { %v8008_v7 = vsel %vm7441_vm7, %v1394_v28, %v1395_v41  ;;  %v8026_v41 = vld [vmem:[%s6965_s29 + $0x4c] sm:$0xf]  ;;  %v3913_v4 = vrot.slane %v3911_v50, 4  ;;  %v3872_v48 = vsel %vm6983_vm3, %v3867_v17, %v3871_v42  ;;  %v3890_v18 = vor.u32 %v3889_v32, %v7994_v20  ;;  %v8076_v9 = vld [vmem:[%s6965_s29 + $0x58] sm:$0xf] }
  0xfa   : > { %6429 = vmatmul.mubr.msk.bf16.gmra.mrb[8].mxu0 %vm735_vm4, %v6816_v57  ;;  %v3903_v57 = vrot.slane %v3901_v23, 5  ;;  %v3862_v19 = vsel %vm6983_vm3, %v3857_v26, %v7952_v40  ;;  %v3931_v24 = vshll.u32 %v8026_v41, 16  ;;  %v3935_v15 = vshrl.u32 %v8026_v41, 16  ;;  %v5878_v50 = vld [vmem:[%s6965_s29 + $0x60] sm:$0xf] }
  0xfb   : > { %6432 = vmatprep.mubr.msk.bf16.mxu0 %vm735_vm4, %v6817_v52  ;;  %v5872_v52 = vld [vmem:[%s6965_s29 + $0x48] sm:$0xf]  ;;  %v8058_v23 = vcombine.low %v3838_v25, %v3848_v55  ;;  %v8062_v28 = vsel %vm784_vm0, %v7876_v58, 0  ;;  %v8068_v8 = vcombine.low %v3862_v19, %v3872_v48  ;;  %v8070_v6 = vrot.slane %v3880_v54, 4 }
  0xfc   : > { %v3904_v44 = vor.u32 %v3903_v57, %v3900_v31  ;;  %v3922_v40 = vshrl.u32 %v5872_v52, 16  ;;  %v3925_v53 = vshll.u32 %v5872_v52, 16  ;;  %9271 = vst [vmem:[#allocation22_spill] sm:$0xff] %v8062_v28  ;;  %v3914_v34 = vor.u32 %v3913_v4, %v8037_v37  ;;  %v6820_v25 = vld [vmem:[%s6965_s29 + $0x84] sm:$0xff]  }
  0xfd   : > { %9272 = vst [vmem:[#allocation15_spill] sm:$0xff] %v8068_v8  ;;  %v8078_v26 = vrot.slane %v3890_v18, 4  ;;  %v8080_v58 = vrot.slane %v3893_v61, 5  ;;  %v8085_v31 = vrot.slane %v3931_v24, 5  ;;  %v3937_v57 = vrot.slane %v3935_v15, 4  ;;  %v6821_v61 = vld [vmem:[%s6965_s29 + $0x90] sm:$0xff]  }
  0xfe   : > { %v8082_v17 = vrot.slane %v3904_v44, 4  ;;  %v3924_v27 = vrot.slane %v3922_v40, 4  ;;  %v3927_v32 = vrot.slane %v3925_v53, 5  ;;  %v3941_v52 = vshll.u32 %v8065_v11, 16  ;;  %v5881_v15 = vld [vmem:[%s6965_s29 + $0x6c] sm:$0xf] }
  0xff   : > { %6263 = vmatmul.mubr.msk.bf16.gmra.mrb[12].mxu1 %vm735_vm4, %v5543_v39  ;;  %v8047_v39 = vld [vmem:[%s6965_s29 + $0x44] sm:$0x1]  ;;  %v3946_v55 = vshrl.u32 %v5875_v59, 16  ;;  %v3949_v54 = vshll.u32 %v5875_v59, 16  ;;  %v3959_v19 = vshrl.u32 %v8076_v9, 16  ;;  %v8099_v4 = vrot.slane %v3914_v34, 4 }
 0x100   : > { %6266 = vmatprep.mubr.msk.bf16.mxu1 %vm735_vm4, %v5544_v5  ;;  %v3917_v42 = vshll.u32 %v8047_v39, 16  ;;  %v3970_v18 = vshrl.u32 %v5878_v50, 16  ;;  %v3973_v44 = vshll.u32 %v5878_v50, 16  ;;  %v3928_v36 = vor.u32 %v3927_v32, %v3924_v27  ;;  %v8129_v34 = vld [vmem:[%s6965_s29 + $0x70] sm:$0xf] }
 0x101   : > { %v8125_v24 = vrot.slane %v3941_v52, 5  ;;  %9274 = vst [vmem:[#allocation18_spill] sm:$0xff] %v8129_v34  ;;  %v3951_v59 = vrot.slane %v3949_v54, 5  ;;  %v3961_v3 = vrot.slane %v3959_v19, 4  ;;  %v3997_v19 = vshll.u32 %v5881_v15, 16 }
 0x102   : > { %6433 = vmatmul.mubr.msk.bf16.gmra.mrb[12].mxu0 %vm735_vm4, %v6818_v43  ;;  %v8089_v43 = vld [vmem:[%s6965_s29 + $0x64] sm:$0xf]  ;;  %v8101_v48 = vrot.slane %v3917_v42, 5  ;;  %v3948_v42 = vrot.slane %v3946_v55, 4  ;;  %v3975_v52 = vrot.slane %v3973_v44, 5  ;;  %v4007_v47 = vshrl.u32 %v8129_v34, 16 }
 0x103   : > { %6436 = vmatprep.mubr.msk.bf16.mxu0 %vm735_vm4, %v6819_v0  ;;  %9273 = vst [vmem:[#allocation17_spill] sm:$0xff] %v8089_v43  ;;  %v3955_v0 = vshll.u32 %v8076_v9, 16  ;;  %v3979_v40 = vshll.u32 %v8089_v43, 16  ;;  %v3983_v53 = vshrl.u32 %v8089_v43, 16  ;;  %v4018_v5 = vshrl.u32 %v5884_v51, 16  ;;  %v6825_v43 = vld [vmem:[%s6965_s29 + $0xc0] sm:$0xff]  }
 0x104   : > { %v4021_v27 = vshll.u32 %v5884_v51, 16  ;;  %v5887_v8 = vld [vmem:[%s6965_s29 + $0x84] sm:$0xf] }
 0x105   : > { %v8132_v50 = vrot.slane %v3955_v0, 5  ;;  %v8147_v55 = vrot.slane %v3979_v40, 5  ;;  %v3985_v54 = vrot.slane %v3983_v53, 4  ;;  %v3994_v0 = vshrl.u32 %v5881_v15, 16  ;;  %v6823_v53 = vld [vmem:[%s6965_s29 + $0xa8] sm:$0xff]  }
 0x106   : > { %v4031_v40 = vshrl.u32 %v8142_v56, 16  ;;  %v8160_v15 = vrot.slane %v3928_v36, 4  ;;  %v8174_v36 = vld [vmem:[%s6965_s29 + $0x88] sm:$0xf]  ;;  %v4009_v56 = vrot.slane %v4007_v47, 4 }
 0x107   : > { %6267 = vmatmul.mubr.msk.bf16.gmra.mrb[16].mxu1 %vm735_vm4, %v5545_v45  ;;  %v8116_v45 = vld [vmem:[%s6965_s29 + $0x5c] sm:$0x1]  ;;  %v3962_v44 = vor.u32 %v3961_v3, %v8132_v50  ;;  %v9277_v3 = vcombine.low %v7935_v46, %v7940_v62  ;;  %v3986_v10 = vor.u32 %v3985_v54, %v8147_v55  ;;  %v3996_v49 = vrot.slane %v3994_v0, 4 }
 0x108   : > { %6270 = vmatprep.mubr.msk.bf16.mxu1 %vm735_vm4, %v5546_v2  ;;  %v3938_v2 = vor.u32 %v3937_v57, %v8085_v31  ;;  %v3965_v32 = vshll.u32 %v8116_v45, 16  ;;  %v3972_v57 = vrot.slane %v3970_v18, 4  ;;  %v3952_v18 = vor.u32 %v3951_v59, %v3948_v42 }
 0x109   : > { %v3963_v62 = vrot.slane %v3962_v44, 4  ;;  %v4042_v54 = vshrl.u32 %v5887_v8, 16  ;;  %v4045_v0 = vshll.u32 %v5887_v8, 16  ;;  %v3934_v8 = vsel %vm6983_vm3, %v8160_v15, %v8085_v31 }
 0x10a   : > { %6437 = vmatmul.mubr.msk.bf16.gmra.mrb[16].mxu0 %vm735_vm4, %v6820_v25  ;;  %v8145_v25 = vld [vmem:[%s6965_s29 + $0x68] sm:$0x1]  ;;  %v8162_v51 = vrot.slane %v3938_v2, 4  ;;  %v8164_v28 = vrot.slane %v3965_v32, 5  ;;  %v3976_v59 = vor.u32 %v3975_v52, %v3972_v57  ;;  %v8177_v2 = vld [vmem:[%s6965_s29 + $0x74] sm:$0x1] }
 0x10b   : > { %6440 = vmatprep.mubr.msk.bf16.mxu0 %vm735_vm4, %v6821_v61  ;;  %9276 = vst [vmem:[#allocation23_spill] sm:$0xff] %v8145_v25  ;;  %v4003_v61 = vshll.u32 %v8129_v34, 16  ;;  %v3989_v42 = vshll.u32 %v8145_v25, 16  ;;  %v4020_v34 = vrot.slane %v4018_v5, 4  ;;  %v4023_v25 = vrot.slane %v4021_v27, 5 }
 0x10c   : > { %v3953_v46 = vrot.slane %v3952_v18, 4  ;;  %v8185_v57 = vrot.slane %v4027_v21, 5  ;;  %v4033_v52 = vrot.slane %v4031_v40, 4  ;;  %v4055_v5 = vshrl.u32 %v8174_v36, 16 }
 0x10d   : > { %v8179_v32 = vrot.slane %v4003_v61, 5  ;;  %v3977_v47 = vrot.slane %v3976_v59, 4  ;;  %v4013_v61 = vshll.u32 %v8177_v2, 16  ;;  %v3987_v18 = vrot.slane %v3986_v10, 4 }
 0x10e   : > { %v4024_v44 = vor.u32 %v4023_v25, %v4020_v34  ;;  %v3958_v59 = vsel %vm6983_vm3, %v3953_v46, %v8132_v50  ;;  %v8208_v34 = vld [vmem:[%s6965_s29 + $0x8c] sm:$0x1]  ;;  %v9278_v25 = vcombine.low %v7959_v35, %v8000_v30  ;;  %v4044_v31 = vrot.slane %v4042_v54, 4  ;;  %v8240_v54 = vld [vmem:[%s6965_s29 + $0x94] sm:$0xf] }
 0x10f   : > { %6271 = vmatmul.mubr.msk.bf16.gmra.mrb[20].mxu1 %vm735_vm4, %v5547_v33  ;;  %v3999_v33 = vrot.slane %v3997_v19, 5  ;;  %v4051_v19 = vshll.u32 %v8174_v36, 16  ;;  %v4010_v21 = vor.u32 %v4009_v56, %v8179_v32  ;;  %v4034_v56 = vor.u32 %v4033_v52, %v8185_v57 }
 0x110   : > { %6274 = vmatprep.mubr.msk.bf16.mxu1 %vm735_vm4, %v9277_v3  ;;  %v8183_v3 = vld [vmem:[%s6965_s29 + $0x80] sm:$0x1]  ;;  %v4047_v15 = vrot.slane %v4045_v0, 5  ;;  %v3968_v50 = vsel %vm6983_vm3, %v3963_v62, %v8164_v28  ;;  %v3982_v35 = vsel %vm6983_vm3, %v3977_v47, %v8147_v55  ;;  %v4061_v55 = vshll.u32 %v8208_v34, 16 }
 0x111   : > { %v4000_v27 = vor.u32 %v3999_v33, %v3996_v49  ;;  %v4037_v40 = vshll.u32 %v8183_v3, 16  ;;  %v8214_v10 = vrot.slane %v4051_v19, 5  ;;  %v4057_v49 = vrot.slane %v4055_v5, 4 }
 0x112   : > { %6441 = vmatmul.mubr.msk.bf16.gmra.mrb[20].mxu0 %vm735_vm4, %v6822_v13  ;;  %v3991_v13 = vrot.slane %v3989_v42, 5  ;;  %v3944_v42 = vsel %vm6983_vm3, %v8162_v51, %v8125_v24  ;;  %v5890_v24 = vld [vmem:[%s6965_s29 + $0x90] sm:$0xf]  ;;  %v9279_v51 = vcombine.low %v8004_v38, %v8008_v7  ;;  %v8229_v33 = vrot.slane %v4013_v61, 5 }
 0x113   : > { %6444 = vmatprep.mubr.msk.bf16.mxu0 %vm735_vm4, %v6823_v53  ;;  %v6824_v53 = vld [vmem:[%s6965_s29 + $0xb4] sm:$0xff]   ;;  %v8227_v30 = vrot.slane %v4000_v27, 4  ;;  %v8233_v52 = vrot.slane %v4010_v21, 4  ;;  %v8235_v38 = vrot.slane %v4024_v44, 4  ;;  %v8237_v7 = vrot.slane %v4037_v40, 5  ;;  %v6827_v61 = vld [vmem:[%s6965_s29 + $0xc] sm:$0xff]  }
 0x114   : > { %v3992_v46 = vsel %vm6983_vm3, %v3987_v18, %v3991_v13  ;;  %v8243_v28 = vrot.slane %v4034_v56, 4  ;;  %v4066_v62 = vshrl.u32 %v5890_v24, 16  ;;  %v4069_v0 = vshll.u32 %v5890_v24, 16  ;;  %v5944_v40 = vld [vmem:[%s6965_s29 + $0x3c] sm:$0xe] }
 0x115   : > { %v9280_v19 = vsel %vm6983_vm3, %v8078_v26, %v8080_v58  ;;  %v9281_v5 = vsel %vm6983_vm3, %v8070_v6, %v7994_v20  ;;  %v9282_v13 = vsel %vm6983_vm3, %v8099_v4, %v8101_v48  ;;  %v4048_v26 = vor.u32 %v4047_v15, %v4044_v31  ;;  %v5943_v4 = vld [vmem:[%s6965_s29 + $0x30] sm:$0xe] }
 0x116   : > { %v8257_v47 = vcombine.low %v9281_v5, %v9280_v19  ;;  %v4058_v58 = vor.u32 %v4057_v49, %v8214_v10  ;;  %v8273_v20 = vcombine.low %v3934_v8, %v3944_v42  ;;  %v8275_v6 = vcombine.low %v3958_v59, %v3968_v50 }
 0x117   : > { %6275 = vmatmul.mubr.msk.bf16.gmra.mrb[24].mxu1 %vm735_vm4, %v9278_v25  ;;  %v4075_v18 = vshll.u32 %v8240_v54, 16  ;;  %v4079_v21 = vshrl.u32 %v8240_v54, 16  ;;  %v8280_v48 = vcombine.low %v3982_v35, %v3992_v46  ;;  %v8300_v42 = vrot.slane %v4061_v55, 5  ;;  %v5946_v46 = vld [vmem:[%s6965_s29 + $0x54] sm:$0xe] }
 0x118   : > { %6278 = vmatprep.mubr.msk.bf16.mxu1 %vm735_vm4, %v9279_v51  ;;  %v8302_v59 = vrot.slane %v4066_v62, 4  ;;  %v8304_v56 = vrot.slane %v4069_v0, 5  ;;  %v9284_v25 = vcombine.low %v8012_v12, %v8018_v14  ;;  %v8310_v31 = vrot.slane %v4048_v26, 4  ;;  %v5945_v51 = vld [vmem:[%s6965_s29 + $0x48] sm:$0xe] }
 0x119   : > { %v8312_v15 = vrot.slane %v4058_v58, 4  ;;  %v5959_v49 = vrot.slane %v5943_v4, 9  ;;  %v4583_v24 = vrot.slane %v7964_v1, 5  ;;  %v8317_v50 = vrot.slane %v4075_v18, 5 }
 0x11a   : > { %6445 = vmatmul.mubr.msk.bf16.gmra.mrb[24].mxu0 %vm735_vm4, %v6824_v53  ;;  %v6826_v53 = vld [vmem:[%s6965_s29 + $0xcc] sm:$0xff]   ;;  %v8319_v35 = vrot.slane %v4079_v21, 4  ;;  %v4586_v12 = vrot.slane %v7992_v63, 5  ;;  %v5960_v14 = vrot.slane %v5944_v40, 9  ;;  %v2785_v55 = vsel %vm784_vm0, %v7832_v60, 0  ;;  %v6828_v60 = vld [vmem:[%s6965_s29 + $0x18] sm:$0xff]  }
 0x11b   : > { %6448 = vmatprep.mubr.msk.bf16.mxu0 %vm735_vm4, %v6825_v43  ;;  %v9283_v43 = vsel %vm6983_vm3, %v8082_v17, %v8037_v37  ;;  %v8327_v1 = vsel %vm7441_vm7, %v5959_v49, %v4583_v24  ;;  %v4585_v62 = vrot.slane %v4583_v24, 4  ;;  %v4590_v0 = vrot.slane %v7985_v16, 5  ;;  %v5948_v49 = vld [vmem:[%s6965_s29 + $0x6c] sm:$0xe]  ;;  %v8476_v24 = vld [vmem:[%s6965_s29 + $0xbc] sm:$0x1] }
 0x11c   : > { %v8269_v27 = vcombine.low %v9283_v43, %v9282_v13  ;;  %v4593_v19 = vrot.slane %v8047_v39, 5  ;;  %v5961_v5 = vrot.slane %v5945_v51, 9  ;;  %v4597_v63 = vrot.slane %v8026_v41, 5  ;;  %v5947_v43 = vld [vmem:[%s6965_s29 + $0x60] sm:$0xe]  ;;  %v6829_v41 = vld [vmem:[%s6965_s29 + $0x24] sm:$0xff]  }
 0x11d   : > { %v4600_v13 = vrot.slane %v8065_v11, 5  ;;  %v8340_v26 = vsel %vm7441_vm7, %v4585_v62, %v4586_v12  ;;  %v8344_v16 = vsel %vm7441_vm7, %v5960_v14, %v4590_v0  ;;  %v4592_v39 = vrot.slane %v4590_v0, 4  ;;  %v5949_v14 = vld [vmem:[%s6965_s29 + $0x78] sm:$0xe]  ;;  %v9286_v0 = vld [vmem:[#allocation23_spill] sm:$0xff] }
 0x11e   : > { %v5962_v58 = vrot.slane %v5946_v46, 9  ;;  %v4604_v18 = vrot.slane %v8076_v9, 5  ;;  %v4607_v4 = vrot.slane %v8116_v45, 5  ;;  %v5963_v40 = vrot.slane %v5947_v43, 9  ;;  %v8473_v45 = vld [vmem:[%s6965_s29 + $0xb8] sm:$0xf] }
 0x11f   : > { %6279 = vmatmul.mubr.msk.bf16.gmra.mrb[28].mxu1 %vm735_vm4, %v9284_v25  ;;  %v8356_v21 = vsel %vm7441_vm7, %v4592_v39, %v4593_v19  ;;  %v4614_v19 = vrot.slane %v9286_v0, 5  ;;  %v5950_v39 = vld [vmem:[%s6965_s29 + $0x84] sm:$0xe]  ;;  %v5893_v17 = vld [vmem:[%s6965_s29 + $0x9c] sm:$0xf] }
 0x120   : > { %6284 = vmatprep.mubr.msk.bf16.mxu1 %vm735_vm4, %v6827_v61  ;;  %v8351_v61 = vsel %vm7441_vm7, %v5961_v5, %v4597_v63  ;;  %v8369_v9 = vsel %vm7441_vm7, %v5962_v58, %v4604_v18  ;;  %v4606_v12 = vrot.slane %v4604_v18, 4  ;;  %v5954_v58 = vld [vmem:[%s6965_s29 + $0xb4] sm:$0xe]  ;;  %v9309_v22 = vcombine.low %v8344_v16, %v8356_v21  ;;  %v9315_v21 = vld [vmem:[#allocation10_spill] sm:$0xff] }
 0x121   : > { %v5970_v44 = vrot.slane %v5954_v58, 9  ;;  %v6833_v58 = vld [vmem:[%s6965_s29 + $0x54] sm:$0xff]  }
 0x122   : > { %6449 = vmatmul.mubr.msk.bf16.gmra.mrb[28].mxu0 %vm735_vm4, %v6826_v53  ;;  %v9285_v53 = vld [vmem:[#allocation17_spill] sm:$0xff]  ;;  %v8383_v5 = vsel %vm7441_vm7, %v4606_v12, %v4607_v4  ;;  %v5951_v4 = vld [vmem:[%s6965_s29 + $0x90] sm:$0xe]  ;;  %v9290_v12 = vld [vmem:[#allocation22_spill] sm:$0xff] }
 0x123   : > { %6454 = vmatprep.mubr.msk.bf16.mxu0 %vm735_vm4, %v8058_v23  ;;  %v4599_v23 = vrot.slane %v4597_v63, 4  ;;  %v4611_v25 = vrot.slane %v9285_v53, 5  ;;  %v5964_v63 = vrot.slane %v5948_v49, 9  ;;  %v4628_v49 = vrot.slane %v8183_v3, 5 }
 0x125   : > { %v8365_v51 = vsel %vm7441_vm7, %v4599_v23, %v4600_v13  ;;  %v8377_v46 = vsel %vm7441_vm7, %v5963_v40, %v4611_v25  ;;  %v4613_v62 = vrot.slane %v4611_v25, 4  ;;  %v9287_v13 = vld [vmem:[#allocation18_spill] sm:$0xff]  ;;  %v9289_v40 = vld [vmem:[#allocation15_spill] sm:$0xff] }
 0x126   : > { %v4618_v43 = vrot.slane %v9287_v13, 5  ;;  %v6831_v13 = vld [vmem:[%s6965_s29 + $0x3c] sm:$0xff]  }
 0x127   : > { %6285 = vmatmul.mubr.msk.bf16.vlgmr.msra.gmra.mrb[0].mxu1 %vm735_vm4, %v6828_v60  ;;  %v4621_v60 = vrot.slane %v8177_v2, 5  ;;  %v8392_v23 = vsel %vm7441_vm7, %v4613_v62, %v4614_v19  ;;  %v5966_v19 = vrot.slane %v5950_v39, 9 }
 0x128   : > { %6288 = vmatprep.mubr.msk.bf16.mxu1 %vm735_vm4, %v6829_v41  ;;  %6351 = vmatpush3.bf16.msra.mxu1 %v2785_v55  ;;  %v5965_v55 = vrot.slane %v5949_v14, 9  ;;  %v9288_v41 = vld [vmem:[#allocation2_spill] sm:$0xff]  ;;  %v8402_v53 = vsel %vm7441_vm7, %v5964_v63, %v4618_v43  ;;  %v4620_v25 = vrot.slane %v4618_v43, 4  ;;  %v6830_v14 = vld [vmem:[%s6965_s29 + $0x30] sm:$0xff]   ;;  %v4632_v63 = vrot.slane %v8174_v36, 5 }
 0x129   : > { %v4625_v18 = vrot.slane %v9288_v41, 5  ;;  %v8416_v43 = vld [vmem:[%s6965_s29 + $0xa0] sm:$0xf]  ;;  %v5967_v41 = vrot.slane %v5951_v4, 9  ;;  %v8440_v4 = vld [vmem:[%s6965_s29 + $0xa4] sm:$0x1]  ;;  %v9314_v16 = vcombine.low %v8377_v46, %v8392_v23 }
 0x12a   : > { %6455 = vmatmul.mubr.msk.bf16.vlgmr.msra.gmra.mrb[0].mxu0 %vm735_vm4, %v9289_v40  ;;  %v8420_v3 = vsel %vm7441_vm7, %v4620_v25, %v4621_v60  ;;  %v5952_v40 = vld [vmem:[%s6965_s29 + $0x9c] sm:$0xe]  ;;  %v8436_v60 = vsel %vm7441_vm7, %v5966_v19, %v4632_v63  ;;  %v4646_v2 = vrot.slane %v8416_v43, 5  ;;  %v4649_v25 = vrot.slane %v8440_v4, 5 }
 0x12b   : > { %6487 = vmatpush3.bf16.msra.mxu0 %v9290_v12  ;;  %6458 = vmatprep.mubr.msk.bf16.mxu0 %vm735_vm4, %v8257_v47  ;;  %v8411_v62 = vsel %vm7441_vm7, %v5965_v55, %v4625_v18  ;;  %v4627_v0 = vrot.slane %v4625_v18, 4  ;;  %v4635_v47 = vrot.slane %v8208_v34, 5  ;;  %v4639_v55 = vrot.slane %v8240_v54, 5  ;;  %v8426_v12 = vld [vmem:[%s6965_s29 + $0x98] sm:$0x1]  ;;  %9292 = vst [vmem:[#allocation23_spill] sm:$0xff] %v8436_v60 }
 0x12c   : > { %v4634_v34 = vrot.slane %v4632_v63, 4  ;;  %v5953_v18 = vld [vmem:[%s6965_s29 + $0xa8] sm:$0xe]  ;;  %v8443_v54 = vld [vmem:[%s6965_s29 + $0xac] sm:$0xf]  ;;  %v5968_v63 = vrot.slane %v5952_v40, 9 }
 0x12d   : > { %v8432_v36 = vsel %vm7441_vm7, %v4627_v0, %v4628_v49  ;;  %v8449_v39 = vsel %vm7441_vm7, %v5967_v41, %v4639_v55  ;;  %v4641_v49 = vrot.slane %v4639_v55, 4  ;;  %v4642_v0 = vrot.slane %v8426_v12, 5  ;;  %v8462_v41 = vld [vmem:[%s6965_s29 + $0xb0] sm:$0x1]  ;;  %v9321_v46 = vld [vmem:[#allocation13_spill] sm:$0xff] }
 0x12e   : > { %9291 = vst [vmem:[#allocation17_spill] sm:$0xff] %v8432_v36  ;;  %9293 = vst [vmem:[#allocation18_spill] sm:$0xff] %v8449_v39  ;;  %v8455_v19 = vsel %vm7441_vm7, %v4634_v34, %v4635_v47  ;;  %v5969_v47 = vrot.slane %v5953_v18, 9  ;;  %v4653_v40 = vrot.slane %v8443_v54, 5  ;;  %v5955_v34 = vld [vmem:[%s6965_s29 + $0xc0] sm:$0xe]  ;;  %v8482_v55 = vsel %vm7441_vm7, %v5968_v63, %v4646_v2 }
 0x12f   : > { %6289 = vmatmul.mubr.msk.bf16.gmra.mrb[4].mxu1 %vm735_vm4, %v6830_v14  ;;  %9294 = vst [vmem:[#allocation2_spill] sm:$0xff] %v8455_v19  ;;  %v8468_v14 = vsel %vm7441_vm7, %v4641_v49, %v4642_v0  ;;  %9296 = vst [vmem:[#allocation22_spill] sm:$0xff] %v8482_v55  ;;  %v4648_v49 = vrot.slane %v4646_v2, 4  ;;  %v4656_v18 = vrot.slane %v8462_v41, 5  ;;  %v8488_v0 = vld [vmem:[%s6965_s29 + $0xc4] sm:$0xf] }
 0x130   : > { %6292 = vmatprep.mubr.msk.bf16.mxu1 %vm735_vm4, %v6831_v13  ;;  %9295 = vst [vmem:[#allocation15_spill] sm:$0xff] %v8468_v14  ;;  %v8492_v11 = vsel %vm7441_vm7, %v5969_v47, %v4653_v40  ;;  %v4655_v13 = vrot.slane %v4653_v40, 4  ;;  %v4660_v63 = vrot.slane %v8473_v45, 5  ;;  %v6832_v2 = vld [vmem:[%s6965_s29 + $0x48] sm:$0xff]   ;;  %v5971_v37 = vrot.slane %v5955_v34, 9 }
 0x131   : > { %v8500_v8 = vsel %vm7441_vm7, %v4648_v49, %v4649_v25  ;;  %v4667_v47 = vrot.slane %v8488_v0, 5  ;;  %v5956_v40 = vld [vmem:[%s6965_s29 + $0xcc] sm:$0xe]  ;;  %v8508_v14 = vld [vmem:[%s6965_s29 + $0xc8] sm:$0x1]  ;;  %v4090_v60 = vshrl.u32 %v5893_v17, 16 }
 0x132   : > { %6459 = vmatmul.mubr.msk.bf16.gmra.mrb[4].mxu0 %vm735_vm4, %v8269_v27  ;;  %9297 = vst [vmem:[#allocation24_spill] sm:$0xff] %v8500_v8  ;;  %v4663_v27 = vrot.slane %v8476_v24, 5  ;;  %v8518_v25 = vsel %vm7441_vm7, %v5970_v44, %v4660_v63  ;;  %v4662_v34 = vrot.slane %v4660_v63, 4  ;;  %v8521_v49 = vld [vmem:[%s6965_s29 + $0xd0] sm:$0xf]  ;;  %v5972_v63 = vrot.slane %v5956_v40, 9 }
 0x133   : > { %6462 = vmatprep.mubr.msk.bf16.mxu0 %vm735_vm4, %v8273_v20  ;;  %v8514_v20 = vsel %vm7441_vm7, %v4655_v13, %v4656_v18  ;;  %v8524_v19 = vld [vmem:[%s6965_s29 + $0xd4] sm:$0x1]  ;;  %v8530_v36 = vsel %vm7441_vm7, %v5971_v37, %v4667_v47  ;;  %v4669_v39 = vrot.slane %v4667_v47, 4  ;;  %v4670_v13 = vrot.slane %v8508_v14, 5  ;;  %v5896_v18 = vld [vmem:[%s6965_s29 + $0xa8] sm:$0xf] }
 0x134   : > { %9298 = vst [vmem:[#allocation25_spill] sm:$0xff] %v8514_v20  ;;  %v8536_v44 = vsel %vm7441_vm7, %v4662_v34, %v4663_v27  ;;  %v4674_v8 = vrot.slane %v8521_v49, 5  ;;  %v4677_v55 = vrot.slane %v8524_v19, 5  ;;  %v4093_v20 = vshll.u32 %v5893_v17, 16  ;;  %v9322_v23 = vld [vmem:[#allocation23_spill] sm:$0xff] }
 0x135   : > { %v8545_v47 = vsel %vm7441_vm7, %v4669_v39, %v4670_v13  ;;  %v4072_v27 = vor.u32 %v8304_v56, %v8302_v59  ;;  %v4099_v34 = vshll.u32 %v8416_v43, 16  ;;  %v4103_v39 = vshrl.u32 %v8416_v43, 16 }
 0x136   : > { %v5988_v40 = vcombine.low %v8530_v36, %v8545_v47  ;;  %v4676_v17 = vrot.slane %v4674_v8, 4  ;;  %v4114_v13 = vshrl.u32 %v5896_v18, 16  ;;  %v4117_v37 = vshll.u32 %v5896_v18, 16 }
 0x137   : > { %6293 = vmatmul.mubr.msk.bf16.gmra.mrb[8].mxu1 %vm735_vm4, %v6832_v2  ;;  %v8554_v2 = vsel %vm7441_vm7, %v5972_v63, %v4674_v8  ;;  %v4085_v59 = vshll.u32 %v8426_v12, 16  ;;  %v4123_v56 = vshll.u32 %v8443_v54, 16  ;;  %v6834_v8 = vld [vmem:[%s6965_s29 + $0x60] sm:$0xff]   ;;  %v4082_v43 = vor.u32 %v8319_v35, %v8317_v50 }
 0x138   : > { %6296 = vmatprep.mubr.msk.bf16.mxu1 %vm735_vm4, %v6833_v58  ;;  %v4127_v58 = vshrl.u32 %v8443_v54, 16  ;;  %v8565_v63 = vsel %vm7441_vm7, %v4676_v17, %v4677_v55  ;;  %v4092_v18 = vrot.slane %v4090_v60, 4  ;;  %v9299_v54 = vsel %vm6983_vm3, %v8233_v52, %v8229_v33  ;;  %v6835_v17 = vld [vmem:[%s6965_s29 + $0x6c] sm:$0xff]  }
 0x139   : > { %v4054_v35 = vsel %vm6983_vm3, %v8310_v31, %v8214_v10  ;;  %v4064_v60 = vsel %vm6983_vm3, %v8312_v15, %v8300_v42  ;;  %v4105_v33 = vrot.slane %v4103_v39, 4  ;;  %v4116_v52 = vrot.slane %v4114_v13, 4  ;;  %v5899_v15 = vld [vmem:[%s6965_s29 + $0xb4] sm:$0xf] }
 0x13a   : > { %6463 = vmatmul.mubr.msk.bf16.gmra.mrb[8].mxu0 %vm735_vm4, %v8275_v6  ;;  %v4095_v6 = vrot.slane %v4093_v20, 5  ;;  %v8593_v20 = vrot.slane %v4099_v34, 5  ;;  %v4119_v12 = vrot.slane %v4117_v37, 5  ;;  %v9302_v10 = vsel %vm6983_vm3, %v8235_v38, %v8185_v57 }
 0x13b   : > { %6466 = vmatprep.mubr.msk.bf16.mxu0 %vm735_vm4, %v8280_v48  ;;  %v9300_v48 = vsel %vm6983_vm3, %v8227_v30, %v8179_v32  ;;  %v9301_v32 = vsel %vm6983_vm3, %v8243_v28, %v8237_v7  ;;  %v4073_v31 = vrot.slane %v4072_v27, 4  ;;  %v4129_v42 = vrot.slane %v4127_v58, 4 }
 0x13c   : > { %v5916_v55 = vcombine.low %v9300_v48, %v9299_v54  ;;  %v5917_v30 = vcombine.low %v9302_v10, %v9301_v32  ;;  %v8605_v54 = vrot.slane %v4123_v56, 5  ;;  %v4083_v37 = vrot.slane %v4082_v43, 4  ;;  %v5902_v56 = vld [vmem:[%s6965_s29 + $0xc0] sm:$0xf]  ;;  %v6836_v43 = vld [vmem:[%s6965_s29 + $0x78] sm:$0xff]   ;;  %v6837_v48 = vld [vmem:[%s6965_s29 + $0x84] sm:$0xff]  }
 0x13d   : > { %v4087_v34 = vrot.slane %v4085_v59, 5  ;;  %v4096_v39 = vor.u32 %v4095_v6, %v4092_v18  ;;  %v4109_v7 = vshll.u32 %v8440_v4, 16  ;;  %v5918_v28 = vcombine.low %v4054_v35, %v4064_v60 }
 0x13e   : > { %v4106_v57 = vor.u32 %v4105_v33, %v8593_v20  ;;  %v4120_v38 = vor.u32 %v4119_v12, %v4116_v52  ;;  %v4133_v27 = vshll.u32 %v8462_v41, 16  ;;  %v4138_v13 = vshrl.u32 %v5899_v15, 16 }
 0x13f   : > { %6297 = vmatmul.mubr.msk.bf16.gmra.mrb[12].mxu1 %vm735_vm4, %v6834_v8  ;;  %v4130_v58 = vor.u32 %v4129_v42, %v8605_v54  ;;  %v4141_v59 = vshll.u32 %v5899_v15, 16  ;;  %v4147_v8 = vshll.u32 %v8473_v45, 16  ;;  %v4151_v4 = vshrl.u32 %v8473_v45, 16 }
 0x140   : > { %6300 = vmatprep.mubr.msk.bf16.mxu1 %vm735_vm4, %v6835_v17  ;;  %v4078_v18 = vsel %vm6983_vm3, %v4073_v31, %v8317_v50  ;;  %v4088_v41 = vsel %vm6983_vm3, %v4083_v37, %v4087_v34  ;;  %v4097_v6 = vrot.slane %v4096_v39, 4  ;;  %v4111_v12 = vrot.slane %v4109_v7, 5 }
 0x141   : > { %v4165_v17 = vshll.u32 %v5902_v56, 16  ;;  %v4171_v35 = vshll.u32 %v8488_v0, 16  ;;  %v4175_v60 = vshrl.u32 %v8488_v0, 16  ;;  %v4107_v45 = vrot.slane %v4106_v57, 4  ;;  %v5905_v0 = vld [vmem:[%s6965_s29 + $0xcc] sm:$0xf] }
 0x142   : > { %6467 = vmatmul.mubr.msk.bf16.gmra.mrb[12].mxu0 %vm735_vm4, %v5916_v55  ;;  %v4162_v55 = vshrl.u32 %v5902_v56, 16  ;;  %v4121_v33 = vrot.slane %v4120_v38, 4  ;;  %v4135_v52 = vrot.slane %v4133_v27, 5  ;;  %v4140_v32 = vrot.slane %v4138_v13, 4 }
 0x143   : > { %6470 = vmatprep.mubr.msk.bf16.mxu0 %vm735_vm4, %v5917_v30  ;;  %v4131_v10 = vrot.slane %v4130_v58, 4  ;;  %v4143_v30 = vrot.slane %v4141_v59, 5  ;;  %v4149_v50 = vrot.slane %v4147_v8, 5  ;;  %v4153_v31 = vrot.slane %v4151_v4, 4  ;;  %v6838_v59 = vld [vmem:[%s6965_s29 + $0x90] sm:$0xff]  }
 0x144   : > { %v5919_v42 = vcombine.low %v4078_v18, %v4088_v41  ;;  %v4164_v15 = vrot.slane %v4162_v55, 4  ;;  %v4167_v37 = vrot.slane %v4165_v17, 5  ;;  %v4173_v34 = vrot.slane %v4171_v35, 5 }
 0x145   : > { %v4177_v39 = vrot.slane %v4175_v60, 4  ;;  %v4102_v7 = vsel %vm6983_vm3, %v4097_v6, %v8593_v20  ;;  %v4112_v57 = vsel %vm6983_vm3, %v4107_v45, %v4111_v12  ;;  %v4157_v38 = vshll.u32 %v8476_v24, 16 }
 0x146   : > { %v4126_v27 = vsel %vm6983_vm3, %v4121_v33, %v8605_v54  ;;  %v4136_v13 = vsel %vm6983_vm3, %v4131_v10, %v4135_v52  ;;  %v4144_v56 = vor.u32 %v4143_v30, %v4140_v32  ;;  %v4154_v58 = vor.u32 %v4153_v31, %v4149_v50  ;;  %v6840_v32 = vld [vmem:[%s6965_s29 + $0xa8] sm:$0xff]  }
 0x147   : > { %6301 = vmatmul.mubr.msk.bf16.gmra.mrb[16].mxu1 %vm735_vm4, %v6836_v43  ;;  %v4186_v20 = vshrl.u32 %v5905_v0, 16  ;;  %v4189_v8 = vshll.u32 %v5905_v0, 16  ;;  %v4195_v4 = vshll.u32 %v8521_v49, 16  ;;  %v4199_v24 = vshrl.u32 %v8521_v49, 16  ;;  %v6839_v43 = vld [vmem:[%s6965_s29 + $0x9c] sm:$0xff]  }
 0x148   : > { %6304 = vmatprep.mubr.msk.bf16.mxu1 %vm735_vm4, %v6837_v48  ;;  %v4178_v18 = vor.u32 %v4177_v39, %v4173_v34  ;;  %v4181_v41 = vshll.u32 %v8508_v14, 16  ;;  %v5920_v54 = vcombine.low %v4102_v7, %v4112_v57  ;;  %v5921_v6 = vcombine.low %v4126_v27, %v4136_v13  ;;  %v6892_v0 = vld [vmem:[%s6965_s29 + $0x1c] sm:$0xf]  ;;  %v5941_v7 = vld [vmem:[%s6965_s29 + $0x18] sm:$0xe] }
 0x149   : > { %v4145_v12 = vrot.slane %v4144_v56, 4  ;;  %v4155_v48 = vrot.slane %v4154_v58, 4  ;;  %v4159_v55 = vrot.slane %v4157_v38, 5  ;;  %v4188_v17 = vrot.slane %v4186_v20, 4  ;;  %v6893_v58 = vld [vmem:[%s6965_s29 + $0x20] sm:$0x1] }
 0x14a   : > { %6471 = vmatmul.mubr.msk.bf16.gmra.mrb[16].mxu0 %vm735_vm4, %v5918_v28  ;;  %v4168_v28 = vor.u32 %v4167_v37, %v4164_v15  ;;  %v4191_v35 = vrot.slane %v4189_v8, 5  ;;  %v4197_v60 = vrot.slane %v4195_v4, 5  ;;  %v4201_v45 = vrot.slane %v4199_v24, 4  ;;  %v6841_v15 = vld [vmem:[%s6965_s29 + $0xb4] sm:$0xff]   ;;  %v6842_v20 = vld [vmem:[%s6965_s29 + $0xc0] sm:$0xff]  }
 0x14b   : > { %6474 = vmatprep.mubr.msk.bf16.mxu0 %vm735_vm4, %v5919_v42  ;;  %v4179_v33 = vrot.slane %v4178_v18, 4  ;;  %v4183_v14 = vrot.slane %v4181_v41, 5  ;;  %v4150_v52 = vsel %vm6983_vm3, %v4145_v12, %v4149_v50  ;;  %v4160_v10 = vsel %vm6983_vm3, %v4155_v48, %v4159_v55  ;;  %v6894_v24 = vld [vmem:[%s6965_s29 + $0x28] sm:$0xf]  ;;  %v5942_v41 = vld [vmem:[%s6965_s29 + $0x24] sm:$0xe] }
 0x14c   : > { %v4169_v49 = vrot.slane %v4168_v28, 4  ;;  %v4192_v30 = vor.u32 %v4191_v35, %v4188_v17  ;;  %v4202_v31 = vor.u32 %v4201_v45, %v4197_v60  ;;  %v4205_v42 = vshll.u32 %v8524_v19, 16  ;;  %v6895_v55 = vld [vmem:[%s6965_s29 + $0x2c] sm:$0x1] }
 0x14d   : > { %v4184_v39 = vsel %vm6983_vm3, %v4179_v33, %v4183_v14  ;;  %v4569_v50 = vrot.slane %v6892_v0, 5  ;;  %v5922_v57 = vcombine.low %v4150_v52, %v4160_v10  ;;  %v5957_v56 = vrot.slane %v5941_v7, 9  ;;  %v9303_v35 = vld [vmem:[#allocation3_spill] sm:$0xff]  ;;  %v9305_v33 = vld [vmem:[#allocation5_spill] sm:$0xff]  ;;  %v9307_v52 = vld [vmem:[#allocation6_spill] sm:$0xff] }
 0x14e   : > { %v4174_v37 = vsel %vm6983_vm3, %v4169_v49, %v4173_v34  ;;  %v4193_v27 = vrot.slane %v4192_v30, 4  ;;  %v4203_v13 = vrot.slane %v4202_v31, 4  ;;  %v4207_v19 = vrot.slane %v4205_v42, 5  ;;  %v9304_v49 = vld [vmem:[#allocation4_spill] sm:$0xff]  ;;  %v9323_v42 = vld [vmem:[#allocation2_spill] sm:$0xff] }
 0x14f   : > { %6305 = vmatmul.mubr.msk.bf16.gmra.mrb[20].mxu1 %vm735_vm4, %v6838_v59  ;;  %v5923_v38 = vcombine.low %v4174_v37, %v4184_v39  ;;  %v4571_v34 = vrot.slane %v4569_v50, 4  ;;  %v4572_v59 = vrot.slane %v6893_v58, 5  ;;  %v4570_v28 = vsel %vm7441_vm7, %v5957_v56, %v4569_v50  ;;  %v9311_v30 = vld [vmem:[#allocation8_spill] sm:$0xff]  ;;  %v9325_v37 = vld [vmem:[#allocation18_spill] sm:$0xff]  ;;  %v9338_v56 = vld [vmem:[#allocation21_spill] sm:$0xff] }
 0x150   : > { %6308 = vmatprep.mubr.msk.bf16.mxu1 %vm735_vm4, %v6839_v43  ;;  %v4198_v8 = vsel %vm6983_vm3, %v4193_v27, %v4197_v60  ;;  %v4208_v4 = vsel %vm6983_vm3, %v4203_v13, %v4207_v19  ;;  %v4576_v43 = vrot.slane %v6894_v24, 5  ;;  %v5958_v12 = vrot.slane %v5942_v41, 9  ;;  %v9320_v31 = vld [vmem:[#allocation12_spill] sm:$0xff]  ;;  %v9328_v39 = vld [vmem:[#allocation14_spill] sm:$0xff]  ;;  %v9335_v27 = vld [vmem:[#allocation19_spill] sm:$0xff] }
 0x151   : > { %v4573_v18 = vsel %vm7441_vm7, %v4571_v34, %v4572_v59  ;;  %v4579_v17 = vrot.slane %v6895_v55, 5  ;;  %v9306_v14 = vcombine.low %v8327_v1, %v8340_v26  ;;  %v9310_v10 = vcombine.low %v8351_v61, %v8365_v51  ;;  %v9312_v1 = vld [vmem:[#allocation9_spill] sm:$0xff]  ;;  %v9316_v61 = vld [vmem:[#allocation11_spill] sm:$0xff]  ;;  %v9330_v0 = vld [vmem:[#allocation22_spill] sm:$0xff] }
 0x152   : > { %6475 = vmatmul.mubr.msk.bf16.gmra.mrb[20].mxu0 %vm735_vm4, %v5920_v54  ;;  %v5924_v54 = vcombine.low %v4198_v8, %v4208_v4  ;;  %v4578_v48 = vrot.slane %v4576_v43, 4  ;;  %v4577_v29 = vsel %vm7441_vm7, %v5958_v12, %v4576_v43  ;;  %v9313_v26 = vcombine.low %v8369_v9, %v8383_v5  ;;  %v9318_v9 = vld [vmem:[#allocation17_spill] sm:$0xff]  ;;  %v9331_v50 = vld [vmem:[#allocation24_spill] sm:$0xff] }
 0x153   : > { %6478 = vmatprep.mubr.msk.bf16.mxu0 %vm735_vm4, %v5921_v6  ;;  %v5974_v6 = vcombine.low %v4570_v28, %v4573_v18  ;;  %v9317_v51 = vcombine.low %v8402_v53, %v8420_v3  ;;  %v9319_v5 = vcombine.low %v8411_v62, %v9318_v9  ;;  %v9326_v53 = vld [vmem:[#allocation15_spill] sm:$0xff]  ;;  %v9329_v62 = vld [vmem:[#allocation16_spill] sm:$0xff]  ;;  %v9332_v7 = vcombine.low %v9330_v0, %v9331_v50 }
 0x154   : > { %v4580_v60 = vsel %vm7441_vm7, %v4578_v48, %v4579_v17  ;;  %v9327_v3 = vcombine.low %v9325_v37, %v9326_v53  ;;  %v9336_v13 = vld [vmem:[#allocation20_spill] sm:$0xff]  ;;  %v9337_v19 = vcombine.low %v8518_v25, %v8536_v44 }
 0x155   : > { %v5975_v45 = vcombine.low %v4577_v29, %v4580_v60 }
 0x157   : > { %6309 = vmatmul.mubr.msk.bf16.gmra.mrb[24].mxu1 %vm735_vm4, %v6840_v32  ;;  %v9308_v32 = vld [vmem:[#allocation7_spill] sm:$0xff] }
 0x158   : > { %6312 = vmatprep.mubr.msk.bf16.mxu1 %vm735_vm4, %v6841_v15  ;;  %v9324_v15 = vcombine.low %v9322_v23, %v9323_v42 }
 0x15a   : > { %6479 = vmatmul.mubr.msk.bf16.gmra.mrb[24].mxu0 %vm735_vm4, %v5922_v57  ;;  %v9333_v57 = vld [vmem:[#allocation25_spill] sm:$0xff] }
 0x15b   : > { %6482 = vmatprep.mubr.msk.bf16.mxu0 %vm735_vm4, %v5923_v38  ;;  %v9334_v38 = vcombine.low %v8492_v11, %v9333_v57  ;;  %v9339_v11 = vcombine.low %v8554_v2, %v8565_v63 }
 0x15f   : > { %6313 = vmatmul.mubr.msk.bf16.gmra.mrb[28].mxu1 %vm735_vm4, %v6842_v20 }
 0x160   : > { %6352 = vmatprep.mubr.msk.bf16.mxu1 %vm735_vm4, %v9303_v35 }
 0x162   : > { %6483 = vmatmul.mubr.msk.bf16.gmra.mrb[28].mxu0 %vm735_vm4, %v5924_v54 }
 0x163   : > { %6488 = vmatprep.mubr.msk.bf16.mxu0 %vm735_vm4, %v5974_v6 }
 0x167   : > { %6353 = vmatmul.mubr.msk.bf16.vlgmr.msra.gmra.mrb[32].mxu1 %vm735_vm4, %v9304_v49 }
 0x168   : > { %6356 = vmatprep.mubr.msk.bf16.mxu1 %vm735_vm4, %v9305_v33 }
 0x16a   : > { %6489 = vmatmul.mubr.msk.bf16.vlgmr.msra.gmra.mrb[0].mxu0 %vm735_vm4, %v5975_v45 }
 0x16b   : > { %6492 = vmatprep.mubr.msk.bf16.mxu0 %vm735_vm4, %v9306_v14 }
 0x16f   : > { %6357 = vmatmul.mubr.msk.bf16.gmra.mrb[36].mxu1 %vm735_vm4, %v9307_v52 }
 0x170   : > { %6360 = vmatprep.mubr.msk.bf16.mxu1 %vm735_vm4, %v9308_v32 }
 0x172   : > { %6493 = vmatmul.mubr.msk.bf16.gmra.mrb[4].mxu0 %vm735_vm4, %v9309_v22 }
 0x173   : > { %6496 = vmatprep.mubr.msk.bf16.mxu0 %vm735_vm4, %v9310_v10 }
 0x177   : > { %6361 = vmatmul.mubr.msk.bf16.gmra.mrb[40].mxu1 %vm735_vm4, %v9311_v30 }
 0x178   : > { %6364 = vmatprep.mubr.msk.bf16.mxu1 %vm735_vm4, %v9312_v1 }
 0x17a   : > { %6497 = vmatmul.mubr.msk.bf16.gmra.mrb[8].mxu0 %vm735_vm4, %v9313_v26 }
 0x17b   : > { %6500 = vmatprep.mubr.msk.bf16.mxu0 %vm735_vm4, %v9314_v16 }
 0x17f   : > { %6365 = vmatmul.mubr.msk.bf16.gmra.mrb[44].mxu1 %vm735_vm4, %v9315_v21 }
 0x180   : > { %6368 = vmatprep.mubr.msk.bf16.mxu1 %vm735_vm4, %v9316_v61 }
 0x182   : > { %6501 = vmatmul.mubr.msk.bf16.gmra.mrb[12].mxu0 %vm735_vm4, %v9317_v51 }
 0x183   : > { %6504 = vmatprep.mubr.msk.bf16.mxu0 %vm735_vm4, %v9319_v5 }
 0x187   : > { %6369 = vmatmul.mubr.msk.bf16.gmra.mrb[48].mxu1 %vm735_vm4, %v9320_v31 }
 0x188   : > { %6372 = vmatprep.mubr.msk.bf16.mxu1 %vm735_vm4, %v9321_v46 }
 0x18a   : > { %6505 = vmatmul.mubr.msk.bf16.gmra.mrb[16].mxu0 %vm735_vm4, %v9324_v15 }
 0x18b   : > { %6508 = vmatprep.mubr.msk.bf16.mxu0 %vm735_vm4, %v9327_v3 }
 0x18f   : > { %6373 = vmatmul.mubr.msk.bf16.gmra.mrb[52].mxu1 %vm735_vm4, %v9328_v39 }
 0x190   : > { %6376 = vmatprep.mubr.msk.bf16.mxu1 %vm735_vm4, %v9329_v62 }
 0x192   : > { %6509 = vmatmul.mubr.msk.bf16.gmra.mrb[20].mxu0 %vm735_vm4, %v9332_v7 }
 0x193   : > { %6512 = vmatprep.mubr.msk.bf16.mxu0 %vm735_vm4, %v9334_v38 }
 0x197   : > { %6377 = vmatmul.mubr.msk.bf16.gmra.mrb[56].mxu1 %vm735_vm4, %v9335_v27 }
 0x198   : > { %6380 = vmatprep.mubr.msk.bf16.mxu1 %vm735_vm4, %v9336_v13 }
 0x19a   : > { %6513 = vmatmul.mubr.msk.bf16.gmra.mrb[24].mxu0 %vm735_vm4, %v9337_v19 }
 0x19b   : > { %6516 = vmatprep.mubr.msk.bf16.mxu0 %vm735_vm4, %v5988_v40 }
 0x19f   : > { %6381 = vmatmul.mubr.msk.bf16.gmra.mrb[60].mxu1 %vm735_vm4, %v9338_v56 }
 0x1a2   : > { %6517 = vmatmul.mubr.msk.bf16.gmra.mrb[28].mxu0 %vm735_vm4, %v9339_v11 }
 0x1fa   : > { %v6286_v34 = vpop.f32.mrb[0].mxu1 }
 0x1fb   : > { %v1898_v58 = vpop.f32.mrb[1].mxu1 }
 0x1fc   : > { %v6287_v59 = vpop.f32.mrb[2].mxu1 }
 0x1fd   : > { %v1901_v20 = vpop.f32.mrb[3].mxu1 }
 0x202   : > { %v8779_v25 = vpop.f32.mrb[4].mxu1 }
 0x203   : > { %v8781_v44 = vpop.f32.mrb[5].mxu1 }
 0x204   : > { %v8783_v8 = vpop.f32.mrb[6].mxu1 }
 0x205   : > { %v8785_v36 = vpop.f32.mrb[7].mxu1 }
 0x20a   : > { %v8787_v47 = vpop.f32.mrb[8].mxu1 }
 0x20b   : > { %v8789_v40 = vpop.f32.mrb[9].mxu1 }
 0x20c   : > { %v8791_v4 = vpop.f32.mrb[10].mxu1 }
 0x20d   : > { %v8793_v2 = vpop.f32.mrb[11].mxu1 }
 0x212   : > { %v8795_v63 = vpop.f32.mrb[12].mxu1 }
 0x213   : > { %v8797_v24 = vpop.f32.mrb[13].mxu1 }
 0x214   : > { %v8799_v43 = vpop.f32.mrb[14].mxu1 }
 0x215   : > { %v8801_v28 = vpop.f32.mrb[15].mxu1 }
 0x21a   : > { %v8803_v18 = vpop.f32.mrb[16].mxu1 }
 0x21b   : > { %v8805_v41 = vpop.f32.mrb[17].mxu1 }
 0x21c   : > { %v8807_v54 = vpop.f32.mrb[18].mxu1 }
 0x21d   : > { %v8809_v6 = vpop.f32.mrb[19].mxu1 }
 0x222   : > { %v8811_v12 = vpop.f32.mrb[20].mxu1 }
 0x223   : > { %v8813_v48 = vpop.f32.mrb[21].mxu1 }
 0x224   : > { %v8815_v55 = vpop.f32.mrb[22].mxu1 }
 0x225   : > { %v8817_v17 = vpop.f32.mrb[23].mxu1 }
 0x22a   : > { %v8819_v35 = vpop.f32.mrb[24].mxu1 }
 0x22b   : > { %v8821_v29 = vpop.f32.mrb[25].mxu1 }
 0x22c   : > { %v8823_v60 = vpop.f32.mrb[26].mxu1 }
 0x22d   : > { %v8825_v45 = vpop.f32.mrb[27].mxu1 }
 0x232   : > { %v8827_v49 = vpop.f32.mrb[28].mxu1 }
 0x233   : > { %v8829_v33 = vpop.f32.mrb[29].mxu1 }
 0x234   : > { %v8831_v14 = vpop.f32.mrb[30].mxu1 }
 0x235   : > { %v8833_v52 = vpop.f32.mrb[31].mxu1 }
 0x23a   : > { %v8835_v32 = vpop.f32.mrb[32].mxu1 }
 0x23b   : > { %v8837_v22 = vpop.f32.mrb[33].mxu1  ;;  %v5118_v61 = vmul.f32 %v8835_v32, %v8835_v32 }
 0x23c   : > { %v5116_v10 = vmul.f32 %v8837_v22, %v8837_v22  ;;  %v8841_v30 = vpop.f32.mrb[34].mxu1 }
 0x23d   : > { %v6490_v1 = vpop.f32.mrb[0].mxu0  ;;  %v8843_v26 = vpop.f32.mrb[35].mxu1  ;;  %v5119_v42 = vmul.f32 %v8841_v30, %v8841_v30 }
 0x23e   : > { %v6520_v16 = vadd.f32 %v6490_v1, %v6286_v34  ;;  %v4814_v21 = vpop.f32.mrb[1].mxu0  ;;  %v5079_v51 = vadd.f32 %v8843_v26, %v8837_v22  ;;  %v5117_v9 = vmul.f32 %v8843_v26, %v8843_v26 }
 0x23f   : > { %v6521_v5 = vadd.f32 %v4814_v21, %v1898_v58  ;;  %v6491_v31 = vpop.f32.mrb[2].mxu0 }
 0x240   : > { %v6522_v46 = vadd.f32 %v6491_v31, %v6287_v59  ;;  %v4817_v23 = vpop.f32.mrb[3].mxu0  ;;  %v5080_v15 = vadd.f32 %v8835_v32, %v5079_v51  ;;  %v5148_v37 = vadd.f32 %v5117_v9, %v5116_v10  ;;  %v5012_v56 = vmul.f32 %v6520_v16, %v6520_v16 }
 0x241   : > { %v6523_v53 = vadd.f32 %v4817_v23, %v1901_v20  ;;  %5192 = vxpose.xlu0.b32.start [1/16] (narrow) %v6521_v5, 8  ;;  %v5010_v0 = vmul.f32 %v6521_v5, %v6521_v5 }
 0x242   : > { %v5149_v3 = vadd.f32 %v5148_v37, %v5118_v61  ;;  %v8854_v39 = vpop.f32.mrb[36].mxu1  ;;  %v5081_v62 = vadd.f32 %v8841_v30, %v5080_v15  ;;  %v5013_v9 = vmul.f32 %v6522_v46, %v6522_v46 }
 0x243   : > { %v4973_v50 = vadd.f32 %v6523_v53, %v6521_v5  ;;  %v5011_v7 = vmul.f32 %v6523_v53, %v6523_v53  ;;  %v8857_v57 = vpop.f32.mrb[37].mxu1  ;;  %v5122_v59 = vmul.f32 %v8854_v39, %v8854_v39 }
 0x244   : > { %v5082_v38 = vadd.f32 %v5081_v62, %v8857_v57  ;;  %v5120_v27 = vmul.f32 %v8857_v57, %v8857_v57  ;;  %v5150_v13 = vadd.f32 %v5149_v3, %v5119_v42  ;;  %v8862_v19 = vpop.f32.mrb[38].mxu1 }
 0x245   : > { %v4974_v11 = vadd.f32 %v6520_v16, %v4973_v50  ;;  %v5042_v34 = vadd.f32 %v5011_v7, %v5010_v0  ;;  %v6494_v58 = vpop.f32.mrb[4].mxu0  ;;  %5193 = vxpose.xlu0.b32.cont [2/16] (narrow) %v6523_v53, 8  ;;  %v8866_v20 = vpop.f32.mrb[39].mxu1 }
 0x246   : > { %v8869_v10 = vadd.f32 %v6494_v58, %v8779_v25  ;;  %v4830_v1 = vpop.f32.mrb[5].mxu0  ;;  %v5151_v21 = vadd.f32 %v5150_v13, %v5120_v27  ;;  %v5083_v61 = vadd.f32 %v5082_v38, %v8866_v20  ;;  %v5121_v51 = vmul.f32 %v8866_v20, %v8866_v20 }
 0x247   : > { %v5043_v5 = vadd.f32 %v5042_v34, %v5012_v56  ;;  %v6525_v31 = vadd.f32 %v4830_v1, %v8781_v44  ;;  %v4975_v23 = vadd.f32 %v6522_v46, %v4974_v11  ;;  %v6495_v42 = vpop.f32.mrb[6].mxu0  ;;  %v5123_v25 = vmul.f32 %v8862_v19, %v8862_v19 }
 0x248   : > { %v8876_v15 = vadd.f32 %v6495_v42, %v8783_v8  ;;  %v4833_v37 = vpop.f32.mrb[7].mxu0  ;;  %v5084_v53 = vadd.f32 %v8854_v39, %v5083_v61  ;;  %v5152_v3 = vadd.f32 %v5151_v21, %v5121_v51 }
 0x249   : > { %v4976_v62 = vadd.f32 %v6525_v31, %v4975_v23  ;;  %v5014_v0 = vmul.f32 %v6525_v31, %v6525_v31  ;;  %v5044_v50 = vadd.f32 %v5043_v5, %v5013_v9  ;;  %v6527_v7 = vadd.f32 %v4833_v37, %v8785_v36  ;;  %5194 = vxpose.xlu0.b32.cont [3/16] (narrow) %v6520_v16, 8 }
 0x24a   : > { %v5153_v38 = vadd.f32 %v5152_v3, %v5122_v59  ;;  %v8882_v44 = vpop.f32.mrb[40].mxu1  ;;  %v5085_v27 = vadd.f32 %v8862_v19, %v5084_v53  ;;  %v5016_v36 = vmul.f32 %v8869_v10, %v8869_v10  ;;  %v5017_v53 = vmul.f32 %v8876_v15, %v8876_v15 }
 0x24b   : > { %v5045_v8 = vadd.f32 %v5044_v50, %v5014_v0  ;;  %v4977_v13 = vadd.f32 %v6527_v7, %v4976_v62  ;;  %v5015_v56 = vmul.f32 %v6527_v7, %v6527_v7  ;;  %v8885_v11 = vpop.f32.mrb[41].mxu1  ;;  %v5126_v51 = vmul.f32 %v8882_v44, %v8882_v44 }
 0x24c   : > { %v5086_v34 = vadd.f32 %v5085_v27, %v8885_v11  ;;  %v5124_v58 = vmul.f32 %v8885_v11, %v8885_v11  ;;  %v5154_v1 = vadd.f32 %v5153_v38, %v5123_v25  ;;  %v8890_v21 = vpop.f32.mrb[42].mxu1 }
 0x24d   : > { %v4978_v16 = vadd.f32 %v8869_v10, %v4977_v13  ;;  %v5046_v59 = vadd.f32 %v5045_v8, %v5015_v56  ;;  %v6498_v61 = vpop.f32.mrb[8].mxu0  ;;  %5195 = vxpose.xlu0.b32.cont [4/16] (narrow) %v6522_v46, 8  ;;  %v8897_v9 = vpop.f32.mrb[43].mxu1  ;;  %v5127_v38 = vmul.f32 %v8890_v21, %v8890_v21 }
 0x24e   : > { %v8900_v5 = vadd.f32 %v6498_v61, %v8787_v47  ;;  %v4846_v23 = vpop.f32.mrb[9].mxu0  ;;  %v5155_v42 = vadd.f32 %v5154_v1, %v5124_v58  ;;  %v5087_v37 = vadd.f32 %v5086_v34, %v8897_v9  ;;  %v5125_v25 = vmul.f32 %v8897_v9, %v8897_v9 }
 0x24f   : > { %v5047_v3 = vadd.f32 %v5046_v59, %v5016_v36  ;;  %v8908_v46 = vadd.f32 %v4846_v23, %v8789_v40  ;;  %v4979_v62 = vadd.f32 %v8876_v15, %v4978_v16  ;;  %v6499_v0 = vpop.f32.mrb[10].mxu0 }
 0x250   : > { %v8912_v47 = vadd.f32 %v6499_v0, %v8791_v4  ;;  %v4849_v50 = vpop.f32.mrb[11].mxu0  ;;  %v5088_v27 = vadd.f32 %v8882_v44, %v5087_v37  ;;  %v5156_v8 = vadd.f32 %v5155_v42, %v5125_v25 }
 0x251   : > { %v4980_v13 = vadd.f32 %v8908_v46, %v4979_v62  ;;  %v5018_v56 = vmul.f32 %v8908_v46, %v8908_v46  ;;  %v5048_v40 = vadd.f32 %v5047_v3, %v5017_v53  ;;  %v8921_v34 = vadd.f32 %v4849_v50, %v8793_v2  ;;  %5196 = vxpose.xlu0.b32.cont [5/16] (narrow) %v6525_v31, 8 }
 0x252   : > { %v5157_v58 = vadd.f32 %v5156_v8, %v5126_v51  ;;  %v8923_v4 = vpop.f32.mrb[44].mxu1  ;;  %v5089_v1 = vadd.f32 %v8890_v21, %v5088_v27  ;;  %v5020_v51 = vmul.f32 %v8900_v5, %v8900_v5 }
 0x253   : > { %9340 = vst [vmem:[#allocation3_spill] sm:$0xff] %v8923_v4  ;;  %v5049_v36 = vadd.f32 %v5048_v40, %v5018_v56  ;;  %v4981_v16 = vadd.f32 %v8921_v34, %v4980_v13  ;;  %v5019_v59 = vmul.f32 %v8921_v34, %v8921_v34  ;;  %v8929_v61 = vpop.f32.mrb[45].mxu1  ;;  %v5130_v3 = vmul.f32 %v8923_v4, %v8923_v4 }
 0x254   : > { %v5090_v23 = vadd.f32 %v5089_v1, %v8929_v61  ;;  %v5128_v2 = vmul.f32 %v8929_v61, %v8929_v61  ;;  %v5158_v42 = vadd.f32 %v5157_v58, %v5127_v38  ;;  %v8934_v31 = vpop.f32.mrb[46].mxu1  ;;  %v5021_v13 = vmul.f32 %v8912_v47, %v8912_v47 }
 0x255   : > { %9341 = vst [vmem:[#allocation4_spill] sm:$0xff] %v8934_v31  ;;  %v4982_v37 = vadd.f32 %v8900_v5, %v4981_v16  ;;  %v5050_v25 = vadd.f32 %v5049_v36, %v5019_v59  ;;  %v6502_v53 = vpop.f32.mrb[12].mxu0  ;;  %5197 = vxpose.xlu0.b32.cont [6/16] (narrow) %v6527_v7, 8  ;;  %v8941_v62 = vpop.f32.mrb[47].mxu1  ;;  %v5131_v36 = vmul.f32 %v8934_v31, %v8934_v31 }
 0x256   : > { %v8944_v0 = vadd.f32 %v6502_v53, %v8795_v63  ;;  %v4862_v50 = vpop.f32.mrb[13].mxu0  ;;  %v5159_v38 = vadd.f32 %v5158_v42, %v5128_v2  ;;  %v5091_v27 = vadd.f32 %v5090_v23, %v8941_v62  ;;  %v5129_v8 = vmul.f32 %v8941_v62, %v8941_v62 }
 0x257   : > { %v5051_v56 = vadd.f32 %v5050_v25, %v5020_v51  ;;  %v8952_v7 = vadd.f32 %v4862_v50, %v8797_v24  ;;  %v4983_v40 = vadd.f32 %v8912_v47, %v4982_v37  ;;  %v6503_v58 = vpop.f32.mrb[14].mxu0 }
 0x258   : > { %v8956_v63 = vadd.f32 %v6503_v58, %v8799_v43  ;;  %v4865_v1 = vpop.f32.mrb[15].mxu0  ;;  %v5092_v16 = vadd.f32 %v8923_v4, %v5091_v27  ;;  %v5160_v59 = vadd.f32 %v5159_v38, %v5129_v8 }
 0x259   : > { %v4984_v23 = vadd.f32 %v8952_v7, %v4983_v40  ;;  %v5022_v2 = vmul.f32 %v8952_v7, %v8952_v7  ;;  %v5052_v24 = vadd.f32 %v5051_v56, %v5021_v13  ;;  %v8965_v42 = vadd.f32 %v4865_v1, %v8801_v28  ;;  %5198 = vxpose.xlu0.b32.cont [7/16] (narrow) %v8869_v10, 8 }
 0x25a   : > { %v5161_v43 = vadd.f32 %v5160_v59, %v5130_v3  ;;  %v8968_v51 = vpop.f32.mrb[48].mxu1  ;;  %v5093_v37 = vadd.f32 %v8934_v31, %v5092_v16  ;;  %v5024_v3 = vmul.f32 %v8944_v0, %v8944_v0 }
 0x25b   : > { %v5053_v25 = vadd.f32 %v5052_v24, %v5022_v2  ;;  %v4985_v53 = vadd.f32 %v8965_v42, %v4984_v23  ;;  %v5023_v50 = vmul.f32 %v8965_v42, %v8965_v42  ;;  %v8974_v38 = vpop.f32.mrb[49].mxu1  ;;  %v5134_v58 = vmul.f32 %v8968_v51, %v8968_v51 }
 0x25c   : > { %v5094_v27 = vadd.f32 %v5093_v37, %v8974_v38  ;;  %v5132_v28 = vmul.f32 %v8974_v38, %v8974_v38  ;;  %v5162_v8 = vadd.f32 %v5161_v43, %v5131_v36  ;;  %v8979_v10 = vpop.f32.mrb[50].mxu1  ;;  %v5025_v24 = vmul.f32 %v8956_v63, %v8956_v63 }
 0x25d   : > { %v4986_v13 = vadd.f32 %v8944_v0, %v4985_v53  ;;  %v5054_v56 = vadd.f32 %v5053_v25, %v5023_v50  ;;  %v6506_v40 = vpop.f32.mrb[16].mxu0  ;;  %5199 = vxpose.xlu0.b32.cont [8/16] (narrow) %v8876_v15, 8  ;;  %v8987_v1 = vpop.f32.mrb[51].mxu1  ;;  %v5135_v50 = vmul.f32 %v8979_v10, %v8979_v10 }
 0x25e   : > { %v6536_v16 = vadd.f32 %v6506_v40, %v8803_v18  ;;  %v4878_v59 = vpop.f32.mrb[17].mxu0  ;;  %v5163_v36 = vadd.f32 %v5162_v8, %v5132_v28  ;;  %v5095_v23 = vadd.f32 %v5094_v27, %v8987_v1  ;;  %v5133_v2 = vmul.f32 %v8987_v1, %v8987_v1 }
 0x25f   : > { %v5055_v43 = vadd.f32 %v5054_v56, %v5024_v3  ;;  %v6537_v15 = vadd.f32 %v4878_v59, %v8805_v41  ;;  %v4987_v37 = vadd.f32 %v8956_v63, %v4986_v13  ;;  %v6507_v25 = vpop.f32.mrb[18].mxu0 }
 0x260   : > { %v8998_v53 = vadd.f32 %v6507_v25, %v8807_v54  ;;  %v4881_v18 = vpop.f32.mrb[19].mxu0  ;;  %v5096_v27 = vadd.f32 %v8968_v51, %v5095_v23  ;;  %v5164_v28 = vadd.f32 %v5163_v36, %v5133_v2 }
 0x261   : > { %v4988_v8 = vadd.f32 %v6537_v15, %v4987_v37  ;;  %v5026_v40 = vmul.f32 %v6537_v15, %v6537_v15  ;;  %v5056_v31 = vadd.f32 %v5055_v43, %v5025_v24  ;;  %v6539_v3 = vadd.f32 %v4881_v18, %v8809_v6  ;;  %5200 = vxpose.xlu0.b32.cont [9/16] (narrow) %v8908_v46, 8 }
 0x262   : > { %5224 = vxpose.xlu1.b32.start [1/16] (narrow) %v6537_v15, 8  ;;  %v5165_v41 = vadd.f32 %v5164_v28, %v5134_v58  ;;  %v9005_v13 = vpop.f32.mrb[52].mxu1  ;;  %v5097_v54 = vadd.f32 %v8979_v10, %v5096_v27  ;;  %v5028_v46 = vmul.f32 %v6536_v16, %v6536_v16 }
 0x263   : > { %v5057_v56 = vadd.f32 %v5056_v31, %v5026_v40  ;;  %v4989_v59 = vadd.f32 %v6539_v3, %v4988_v8  ;;  %v5027_v25 = vmul.f32 %v6539_v3, %v6539_v3  ;;  %v9008_v4 = vpop.f32.mrb[53].mxu1  ;;  %v5138_v31 = vmul.f32 %v9005_v13, %v9005_v13 }
 0x264   : > { %v5098_v36 = vadd.f32 %v5097_v54, %v9008_v4  ;;  %v5136_v23 = vmul.f32 %v9008_v4, %v9008_v4  ;;  %v5166_v2 = vadd.f32 %v5165_v41, %v5135_v50  ;;  %v9013_v6 = vpop.f32.mrb[54].mxu1  ;;  %v5029_v8 = vmul.f32 %v8998_v53, %v8998_v53 }
 0x265   : > { %v4990_v24 = vadd.f32 %v6536_v16, %v4989_v59  ;;  %v5058_v58 = vadd.f32 %v5057_v56, %v5027_v25  ;;  %v6510_v43 = vpop.f32.mrb[20].mxu0  ;;  %5201 = vxpose.xlu0.b32.cont [10/16] (narrow) %v8921_v34, 8  ;;  %v9018_v15 = vpop.f32.mrb[55].mxu1  ;;  %v5139_v56 = vmul.f32 %v9013_v6, %v9013_v6 }
 0x266   : > { %v9021_v37 = vadd.f32 %v6510_v43, %v8811_v12  ;;  %5225 = vxpose.xlu1.b32.cont [2/16] (narrow) %v6539_v3, 8  ;;  %v4894_v18 = vpop.f32.mrb[21].mxu0  ;;  %v5167_v27 = vadd.f32 %v5166_v2, %v5136_v23  ;;  %v5099_v50 = vadd.f32 %v5098_v36, %v9018_v15  ;;  %v5137_v28 = vmul.f32 %v9018_v15, %v9018_v15 }
 0x267   : > { %v5059_v34 = vadd.f32 %v5058_v58, %v5028_v46  ;;  %v6541_v40 = vadd.f32 %v4894_v18, %v8813_v48  ;;  %v4991_v41 = vadd.f32 %v8998_v53, %v4990_v24  ;;  %v6511_v54 = vpop.f32.mrb[22].mxu0 }
 0x268   : > { %v9031_v12 = vadd.f32 %v6511_v54, %v8815_v55  ;;  %v4897_v3 = vpop.f32.mrb[23].mxu0  ;;  %v5100_v59 = vadd.f32 %v9005_v13, %v5099_v50  ;;  %v5168_v25 = vadd.f32 %v5167_v27, %v5137_v28 }
 0x269   : > { %v4992_v36 = vadd.f32 %v6541_v40, %v4991_v41  ;;  %v5030_v23 = vmul.f32 %v6541_v40, %v6541_v40  ;;  %v5060_v2 = vadd.f32 %v5059_v34, %v5029_v8  ;;  %v6543_v46 = vadd.f32 %v4897_v3, %v8817_v17  ;;  %5202 = vxpose.xlu0.b32.cont [11/16] (narrow) %v8900_v5, 8 }
 0x26a   : > { %5226 = vxpose.xlu1.b32.cont [3/16] (narrow) %v6536_v16, 8  ;;  %v5169_v48 = vadd.f32 %v5168_v25, %v5138_v31  ;;  %v9038_v24 = vpop.f32.mrb[56].mxu1  ;;  %v5101_v55 = vadd.f32 %v9013_v6, %v5100_v59  ;;  %v5032_v5 = vmul.f32 %v9021_v37, %v9021_v37 }
 0x26b   : > { %v5061_v58 = vadd.f32 %v5060_v2, %v5030_v23  ;;  %v4993_v43 = vadd.f32 %v6543_v46, %v4992_v36  ;;  %v5031_v18 = vmul.f32 %v6543_v46, %v6543_v46  ;;  %v9041_v54 = vpop.f32.mrb[57].mxu1  ;;  %v5142_v34 = vmul.f32 %v9038_v24, %v9038_v24 }
 0x26c   : > { %v5102_v27 = vadd.f32 %v5101_v55, %v9041_v54  ;;  %v5140_v50 = vmul.f32 %v9041_v54, %v9041_v54  ;;  %v5170_v28 = vadd.f32 %v5169_v48, %v5139_v56  ;;  %v9046_v17 = vpop.f32.mrb[58].mxu1 }
 0x26d   : > { %v4994_v16 = vadd.f32 %v9021_v37, %v4993_v43  ;;  %v5062_v31 = vadd.f32 %v5061_v58, %v5031_v18  ;;  %v6514_v8 = vpop.f32.mrb[24].mxu0  ;;  %5203 = vxpose.xlu0.b32.cont [12/16] (narrow) %v8912_v47, 8  ;;  %v9054_v41 = vpop.f32.mrb[59].mxu1  ;;  %v5033_v47 = vmul.f32 %v9031_v12, %v9031_v12  ;;  %v5143_v58 = vmul.f32 %v9046_v17, %v9046_v17 }
 0x26e   : > { %v9057_v3 = vadd.f32 %v6514_v8, %v8819_v35  ;;  %5227 = vxpose.xlu1.b32.cont [4/16] (narrow) %v8998_v53, 8  ;;  %v4910_v56 = vpop.f32.mrb[25].mxu0  ;;  %v5171_v59 = vadd.f32 %v5170_v28, %v5140_v50  ;;  %v5103_v25 = vadd.f32 %v5102_v27, %v9054_v41  ;;  %v5141_v36 = vmul.f32 %v9054_v41, %v9054_v41 }
 0x26f   : > { %v5063_v23 = vadd.f32 %v5062_v31, %v5032_v5  ;;  %v9066_v2 = vadd.f32 %v4910_v56, %v8821_v29  ;;  %v4995_v48 = vadd.f32 %v9031_v12, %v4994_v16  ;;  %v6515_v35 = vpop.f32.mrb[26].mxu0 }
 0x270   : > { %v9070_v55 = vadd.f32 %v6515_v35, %v8823_v60  ;;  %v4913_v53 = vpop.f32.mrb[27].mxu0  ;;  %v5104_v43 = vadd.f32 %v9038_v24, %v5103_v25  ;;  %v5172_v18 = vadd.f32 %v5171_v59, %v5141_v36 }
 0x271   : > { %v4996_v27 = vadd.f32 %v9066_v2, %v4995_v48  ;;  %v5034_v50 = vmul.f32 %v9066_v2, %v9066_v2  ;;  %v5064_v29 = vadd.f32 %v5063_v23, %v5033_v47  ;;  %v9079_v28 = vadd.f32 %v4913_v53, %v8825_v45  ;;  %5204 = vxpose.xlu0.b32.cont [13/16] (narrow) %v8952_v7, 8 }
 0x272   : > { %5228 = vxpose.xlu1.b32.cont [5/16] (narrow) %v6541_v40, 8  ;;  %v5173_v60 = vadd.f32 %v5172_v18, %v5142_v34  ;;  %v9082_v5 = vpop.f32.mrb[60].mxu1  ;;  %v5105_v16 = vadd.f32 %v9046_v17, %v5104_v43  ;;  %v5036_v34 = vmul.f32 %v9057_v3, %v9057_v3 }
 0x273   : > { %v5065_v31 = vadd.f32 %v5064_v29, %v5034_v50  ;;  %v4997_v8 = vadd.f32 %v9079_v28, %v4996_v27  ;;  %v5035_v56 = vmul.f32 %v9079_v28, %v9079_v28  ;;  %v9088_v59 = vpop.f32.mrb[61].mxu1  ;;  %v5146_v48 = vmul.f32 %v9082_v5, %v9082_v5 }
 0x274   : > { %v5106_v25 = vadd.f32 %v5105_v16, %v9088_v59  ;;  %v5144_v45 = vmul.f32 %v9088_v59, %v9088_v59  ;;  %v5174_v7 = vadd.f32 %v5173_v60, %v5143_v58  ;;  %v9093_v40 = vpop.f32.mrb[62].mxu1  ;;  %v5037_v50 = vmul.f32 %v9070_v55, %v9070_v55 }
 0x275   : > { %v4998_v36 = vadd.f32 %v9057_v3, %v4997_v8  ;;  %v5066_v47 = vadd.f32 %v5065_v31, %v5035_v56  ;;  %v6518_v23 = vpop.f32.mrb[28].mxu0  ;;  %5205 = vxpose.xlu0.b32.cont [14/16] (narrow) %v8965_v42, 8  ;;  %v9101_v35 = vpop.f32.mrb[63].mxu1  ;;  %v5147_v31 = vmul.f32 %v9093_v40, %v9093_v40 }
 0x276   : > { %v9104_v53 = vadd.f32 %v6518_v23, %v8827_v49  ;;  %5229 = vxpose.xlu1.b32.cont [6/16] (narrow) %v6543_v46, 8  ;;  %v4926_v58 = vpop.f32.mrb[29].mxu0  ;;  %v5175_v43 = vadd.f32 %v5174_v7, %v5144_v45  ;;  %v5107_v18 = vadd.f32 %v5106_v25, %v9101_v35  ;;  %v5145_v27 = vmul.f32 %v9101_v35, %v9101_v35 }
 0x277   : > { %v5067_v42 = vadd.f32 %v5066_v47, %v5036_v34  ;;  %v9112_v29 = vadd.f32 %v4926_v58, %v8829_v33  ;;  %v4999_v60 = vadd.f32 %v9070_v55, %v4998_v36  ;;  %v6519_v16 = vpop.f32.mrb[30].mxu0 }
 0x278   : > { %v9116_v49 = vadd.f32 %v6519_v16, %v8831_v14  ;;  %v4929_v46 = vpop.f32.mrb[31].mxu0  ;;  %v5108_v8 = vadd.f32 %v9082_v5, %v5107_v18  ;;  %v5176_v56 = vadd.f32 %v5175_v43, %v5145_v27  ;;  %v5040_v18 = vmul.f32 %v9104_v53, %v9104_v53 }
 0x279   : > { %v5000_v25 = vadd.f32 %v9112_v29, %v4999_v60  ;;  %v5038_v45 = vmul.f32 %v9112_v29, %v9112_v29  ;;  %v5068_v33 = vadd.f32 %v5067_v42, %v5037_v50  ;;  %v6551_v7 = vadd.f32 %v4929_v46, %v8833_v52  ;;  %5206 = vxpose.xlu0.b32.cont [15/16] (narrow) %v8944_v0, 8 }
 0x27a   : > { %5230 = vxpose.xlu1.b32.cont [7/16] (narrow) %v9021_v37, 8  ;;  %v5109_v14 = vadd.f32 %v9093_v40, %v5108_v8  ;;  %v5177_v34 = vadd.f32 %v5176_v56, %v5146_v48  ;;  %v5041_v37 = vmul.f32 %v9116_v49, %v9116_v49 }
 0x27b   : > { %v5069_v36 = vadd.f32 %v5068_v33, %v5038_v45  ;;  %v5001_v47 = vadd.f32 %v6551_v7, %v5000_v25  ;;  %v5039_v23 = vmul.f32 %v6551_v7, %v6551_v7 }
 0x27c   : > { %v5110_v58 = vrot.slane %v5109_v14, 4  ;;  %v5178_v43 = vadd.f32 %v5177_v34, %v5147_v31 }
 0x27d   : > { %v5002_v27 = vadd.f32 %v9104_v53, %v5001_v47  ;;  %v5070_v50 = vadd.f32 %v5069_v36, %v5039_v23  ;;  %5207 = vxpose.xlu0.b32.end [16/16] (narrow) %v8956_v63, 8 }
 0x27e   : > { %v5111_v52 = vadd.f32 %v5110_v58, %v5109_v14  ;;  %v5179_v0 = vrot.slane %v5178_v43, 4  ;;  %5231 = vxpose.xlu1.b32.cont [8/16] (narrow) %v9031_v12, 8 }
 0x27f   : > { %v5003_v48 = vadd.f32 %v9116_v49, %v5002_v27  ;;  %v5071_v42 = vadd.f32 %v5070_v50, %v5040_v18 }
 0x280   : > { %v5112_v60 = vrot.slane %v5111_v52, 2  ;;  %v5180_v16 = vadd.f32 %v5179_v0, %v5178_v43 }
 0x281   : > { %v5004_v46 = vrot.slane %v5003_v48, 4  ;;  %v5072_v31 = vadd.f32 %v5071_v42, %v5041_v37  ;;  %5258 = vxpose.xlu0.b32.start [1/16] (narrow) %v8837_v22, 8 }
 0x282   : > { %v5181_v8 = vrot.slane %v5180_v16, 2  ;;  %5232 = vxpose.xlu1.b32.cont [9/16] (narrow) %v9066_v2, 8  ;;  %v5113_v25 = vadd.f32 %v5112_v60, %v5111_v52 }
 0x283   : > { %v5005_v63 = vadd.f32 %v5004_v46, %v5003_v48  ;;  %v5073_v56 = vrot.slane %v5072_v31, 4 }
 0x284   : > { %v5182_v33 = vadd.f32 %v5181_v8, %v5180_v16  ;;  %v5114_v36 = vrot.slane %v5113_v25, 1 }
 0x285   : > { %v5006_v12 = vrot.slane %v5005_v63, 2  ;;  %v5074_v45 = vadd.f32 %v5073_v56, %v5072_v31  ;;  %5259 = vxpose.xlu0.b32.cont [2/16] (narrow) %v8843_v26, 8 }
 0x286   : > { %5233 = vxpose.xlu1.b32.cont [10/16] (narrow) %v9079_v28, 8  ;;  %v5183_v22 = vrot.slane %v5182_v33, 1  ;;  %v5115_v58 = vadd.f32 %v5114_v36, %v5113_v25 }
 0x287   : > { %v5007_v14 = vadd.f32 %v5006_v12, %v5005_v63  ;;  %v5075_v34 = vrot.slane %v5074_v45, 2 }
 0x288   : > { %v5184_v27 = vadd.f32 %v5183_v22, %v5182_v33 }
 0x289   : > { %v5008_v47 = vrot.slane %v5007_v14, 1  ;;  %v5076_v23 = vadd.f32 %v5075_v34, %v5074_v45  ;;  %5260 = vxpose.xlu0.b32.cont [3/16] (narrow) %v8835_v32, 8 }
 0x28a   : > { %5234 = vxpose.xlu1.b32.cont [11/16] (narrow) %v9057_v3, 8 }
 0x28b   : > { %v5077_v2 = vrot.slane %v5076_v23, 1  ;;  %v5009_v43 = vadd.f32 %v5008_v47, %v5007_v14 }
 0x28d   : > { %v5078_v18 = vadd.f32 %v5077_v2, %v5076_v23  ;;  %5261 = vxpose.xlu0.b32.cont [4/16] (narrow) %v8841_v30, 8  ;;  %v9342_v30 = vld [vmem:[#allocation3_spill] sm:$0xff] }
 0x28e   : > { %5235 = vxpose.xlu1.b32.cont [12/16] (narrow) %v9070_v55, 8 }
 0x28f   : > { %v5186_v26 = vsel %vm5185_vm8, %v5009_v43, %v5078_v18 }
 0x290   : > { %v5188_v32 = vsel %vm5187_vm9, %v5186_v26, %v5115_v58 }
 0x291   : > { %v5190_v3 = vsel %vm1289_vm5, %v5188_v32, %v5184_v27  ;;  %5262 = vxpose.xlu0.b32.cont [5/16] (narrow) %v8857_v57, 8 }
 0x292   : > { %5191 = vst [vmem:[%s247_s24] sm:$0xf] %v5190_v3  ;;  %5236 = vxpose.xlu1.b32.cont [13/16] (narrow) %v9112_v29, 8 }
 0x295   : > { %5263 = vxpose.xlu0.b32.cont [6/16] (narrow) %v8866_v20, 8 }
 0x296   : > { %5237 = vxpose.xlu1.b32.cont [14/16] (narrow) %v6551_v7, 8 }
 0x299   : > { %5264 = vxpose.xlu0.b32.cont [7/16] (narrow) %v8854_v39, 8  ;;  %v9343_v39 = vld [vmem:[#allocation4_spill] sm:$0xff] }
 0x29a   : > { %5238 = vxpose.xlu1.b32.cont [15/16] (narrow) %v9104_v53, 8 }
 0x29d   : > { %5265 = vxpose.xlu0.b32.cont [8/16] (narrow) %v8862_v19, 8 }
 0x29e   : > { %5239 = vxpose.xlu1.b32.end [16/16] (narrow) %v9116_v49, 8 }
 0x2a1   : > { %5266 = vxpose.xlu0.b32.cont [9/16] (narrow) %v8885_v11, 8 }
 0x2a2   : > { %5290 = vxpose.xlu1.b32.start [1/16] (narrow) %v8974_v38, 8 }
 0x2a5   : > { %5267 = vxpose.xlu0.b32.cont [10/16] (narrow) %v8897_v9, 8 }
 0x2a6   : > { %5291 = vxpose.xlu1.b32.cont [2/16] (narrow) %v8987_v1, 8 }
 0x2a9   : > { %5268 = vxpose.xlu0.b32.cont [11/16] (narrow) %v8882_v44, 8 }
 0x2aa   : > { %5292 = vxpose.xlu1.b32.cont [3/16] (narrow) %v8968_v51, 8 }
 0x2ad   : > { %5269 = vxpose.xlu0.b32.cont [12/16] (narrow) %v8890_v21, 8 }
 0x2ae   : > { %5293 = vxpose.xlu1.b32.cont [4/16] (narrow) %v8979_v10, 8 }
 0x2b1   : > { %5270 = vxpose.xlu0.b32.cont [13/16] (narrow) %v8929_v61, 8 }
 0x2b2   : > { %5294 = vxpose.xlu1.b32.cont [5/16] (narrow) %v9008_v4, 8 }
 0x2b5   : > { %5271 = vxpose.xlu0.b32.cont [14/16] (narrow) %v8941_v62, 8 }
 0x2b6   : > { %5295 = vxpose.xlu1.b32.cont [6/16] (narrow) %v9018_v15, 8 }
 0x2b9   : > { %5272 = vxpose.xlu0.b32.cont [15/16] (narrow) %v9342_v30, 8 }
 0x2ba   : > { %5296 = vxpose.xlu1.b32.cont [7/16] (narrow) %v9005_v13, 8 }
 0x2bd   : > { %5273 = vxpose.xlu0.b32.end [16/16] (narrow) %v9343_v39, 8 }
 0x2be   : > { %5297 = vxpose.xlu1.b32.cont [8/16] (narrow) %v9013_v6, 8 }
 0x2c1   : > { %v5208_v57 = vpop.trf.xlu0 }
 0x2c2   : > { %5298 = vxpose.xlu1.b32.cont [9/16] (narrow) %v9041_v54, 8  ;;  %5256 = vst [vmem:[%s238_s28] sm:$0xff] %v5208_v57 }
 0x2c6   : > { %5299 = vxpose.xlu1.b32.cont [10/16] (narrow) %v9054_v41, 8 }
 0x2ca   : > { %5300 = vxpose.xlu1.b32.cont [11/16] (narrow) %v9038_v24, 8 }
 0x2ce   : > { %5301 = vxpose.xlu1.b32.cont [12/16] (narrow) %v9046_v17, 8 }
 0x2d2   : > { %5302 = vxpose.xlu1.b32.cont [13/16] (narrow) %v9088_v59, 8 }
 0x2d6   : > { %5303 = vxpose.xlu1.b32.cont [14/16] (narrow) %v9101_v35, 8 }
 0x2da   : > { %5304 = vxpose.xlu1.b32.cont [15/16] (narrow) %v9082_v5, 8 }
 0x2de   : > { %5305 = vxpose.xlu1.b32.end [16/16] (narrow) %v9093_v40, 8 }
 0x2e2   : > { %v5240_v19 = vpop.trf.xlu1 }
 0x2e3   : > { %5257 = vst [vmem:[%s238_s28 + $0x8] sm:$0xff] %v5240_v19 }
 0x301   : > { %v5274_v20 = vpop.trf.xlu0 }
 0x302   : > { %5322 = vst [vmem:[%s243_s30] sm:$0xff] %v5274_v20 }
 0x322   : > { %v5306_v44 = vpop.trf.xlu1 }
 0x323   : > { %5323 = vst [vmem:[%s243_s30 + $0x8] sm:$0xff] %v5306_v44 }
 0x324 PF: > { %s16_s18 = sadd.s32 1, %s6902_s18  }
 0x325   : > { %p13_p4 = scmp.ge.s32.totalorder %s16_s18, 4  }
 0x327   :  { %15 = sbr.rel (!%p13_p4) target bundleno = 1 (0x1), region = 96 }

</bundles_post_ra>
